<compile_context>
chip_gen: v7x
topology: tpu7x:2x2x1
jax: 0.10.0
libtpu: 0.0.40
codegen_flags: <defaults>
</compile_context>

<pallas_src>
import numpy as np
import jax
import jax.numpy as jnp
from jax import lax
from jax.experimental import pallas as pl
from jax.experimental.pallas import tpu as pltpu

_PRE = 8  # aligned zero rows prepended to the flattened input strip


def _resblock_kernel(xm_ref, xh_ref, w_ref, o_ref, xs_ref, hf_ref):
    """One (batch, H-strip) grid step of the fused residual block.

    xm_ref: (1, TH*Wp, C)  flattened main rows of the spatially padded input
    xh_ref: (1, 4*Wp,  C)  flattened 4-row bottom halo of the padded input
    w_ref : (2, 3, 3C, C)  tap-folded weights: w_ref[conv][ky][kx*C + ci, co]
    o_ref : (1, TH, W, C)  output strip
    xs_ref: (XS, C)        VMEM scratch: [8 zero rows | padded strip | zeros]
    hf_ref: (HF, C)        VMEM scratch: conv2's zero-padded hidden activation
    """
    _, TH, W, C = o_ref.shape
    Wp = W + 2
    M_h = (TH + 2) * Wp          # rows of the padded hidden activation frame
    M_o = TH * Wp                # output rows (incl. 2 junk columns per row)
    s = pl.program_id(1)
    n_strips = pl.num_programs(1)

    # ---- assemble the padded input strip in flat (row-major pixel, C) form --
    xs_ref[pl.ds(0, _PRE), :] = jnp.zeros((_PRE, C), jnp.float32)
    xs_ref[pl.ds(_PRE, TH * Wp), :] = xm_ref[0]
    xs_ref[pl.ds(_PRE + TH * Wp, 4 * Wp), :] = xh_ref[0]
    tail0 = _PRE + (TH + 4) * Wp
    xs_ref[pl.ds(tail0, xs_ref.shape[0] - tail0), :] = jnp.zeros(
        (xs_ref.shape[0] - tail0, C), jnp.float32)

    def conv3x3(src_ref, w, base, m):
        # 3x3 conv as 3 MXU matmuls: the 3 kx taps are lane-concatenated so the
        # contraction dim is K = 3*C; every tap patch is a row-offset slice of
        # the flat pixel buffer (no per-tap reshapes).
        acc = jnp.zeros((m, C), jnp.float32)
        for ky in range(3):
            patch = jnp.concatenate(
                [src_ref[pl.ds(base + ky * Wp + kx, m), :] for kx in range(3)],
                axis=1)                                    # (m, 3C)
            acc = acc + jnp.dot(patch, w[ky],
                                preferred_element_type=jnp.float32)
        return acc

    # ---- conv1 + ReLU, evaluated directly in conv2's padded-h frame ---------
    h = conv3x3(xs_ref, w_ref[0], _PRE - 1, M_h)

    # conv2's zero-padding ring: mask out the left/right padding columns and the
    # rows that fall outside the image (only hits the first / last strip).
    row_id = lax.broadcasted_iota(jnp.int32, (TH + 2, Wp, C), 0)
    col_id = lax.broadcasted_iota(jnp.int32, (TH + 2, Wp, C), 1)
    img_row = s * TH - 1 + row_id
    keep = ((col_id >= 1) & (col_id <= W)
            & (img_row >= 0) & (img_row < n_strips * TH))
    mask = keep.astype(jnp.float32).reshape(M_h, C)
    hf_ref[pl.ds(0, M_h), :] = jnp.maximum(h, 0.0) * mask
    hf_ref[pl.ds(M_h, hf_ref.shape[0] - M_h), :] = jnp.zeros(
        (hf_ref.shape[0] - M_h, C), jnp.float32)

    # ---- conv2 + residual add ------------------------------------------------
    acc = conv3x3(hf_ref, w_ref[1], 0, M_o)
    acc = acc + xs_ref[pl.ds(_PRE - 1 + 2 * Wp + 2, M_o), :]   # + x (residual)

    # drop the 2 junk columns per row and store the strip
    o_ref[0] = acc.reshape(TH, Wp, C)[:, :W, :]


def _fold_weight(w):
    # (Cout, Cin, 3, 3) OIHW -> (ky, kx*Cin + ci, Cout)
    c_out, c_in = w.shape[0], w.shape[1]
    return jnp.transpose(w, (2, 3, 1, 0)).reshape(3, 3 * c_in, c_out)


def _pick_strip_height(h):
    for th in (32, 16, 8, 4):
        if h % th == 0 and h // th >= 2:
            return th
    return h


def resblock_do_eval(x, w1, w2):
    """ResBlock_do_eval forward.

    x:  (B, C, H, W) float32 NCHW;  w1, w2: (C, C, 3, 3) float32 OIHW.
    returns (B, C, H, W) float32.
    """
    B, C, H, W = x.shape
    TH = _pick_strip_height(H)
    assert H % TH == 0 and TH % 4 == 0, "H must be a multiple of 4"
    assert W % 2 == 0, "W must be even (block sublane alignment)"
    nS = H // TH
    Wp = W + 2

    # NCHW -> NHWC; pad 2 rows top/bottom (fused 2-conv halo) and 1 col
    # left/right (conv1's own padding); flatten pixels row-major so the kernel
    # never has to reshape its input blocks.
    x_nhwc = jnp.transpose(x, (0, 2, 3, 1)).astype(jnp.float32)
    xpp = jnp.pad(x_nhwc, ((0, 0), (2, 2), (1, 1), (0, 0)))
    xpp_flat = xpp.reshape(B, (H + 4) * Wp, C)
    # TODO(synk): fold the spatial zero-pad into the kernel (masked border taps)
    # to avoid the extra HBM round-trip of the padded copy.

    wf = jnp.stack([_fold_weight(w1.astype(jnp.float32)),
                    _fold_weight(w2.astype(jnp.float32))], axis=0)  # (2,3,3C,C)

    xs_rows = _PRE + (TH + 4) * Wp + 8
    hf_rows = (TH + 2) * Wp + 8

    flops = 2 * 2 * 9 * B * H * W * C * C            # two 3x3 convs, MAC = 2 flops
    bytes_accessed = 4 * (B * (H + 4) * Wp * C       # padded input
                          + B * H * W * C            # output
                          + 2 * 3 * 3 * C * C)       # weights

    out_nhwc = pl.pallas_call(
        _resblock_kernel,
        out_shape=jax.ShapeDtypeStruct((B, H, W, C), jnp.float32),
        grid_spec=pltpu.PrefetchScalarGridSpec(
            num_scalar_prefetch=0,
            grid=(B, nS),
            in_specs=[
                # main strip rows  [s*TH, s*TH+TH) of the padded image
                pl.BlockSpec((1, TH * Wp, C), lambda b, s: (b, s, 0)),
                # 4-row bottom halo [s*TH+TH, s*TH+TH+4)
                pl.BlockSpec((1, 4 * Wp, C),
                             lambda b, s: (b, (s + 1) * (TH // 4), 0)),
                # folded weights for both convs (constant block)
                pl.BlockSpec((2, 3, 3 * C, C), lambda b, s: (0, 0, 0, 0)),
            ],
            out_specs=pl.BlockSpec((1, TH, W, C), lambda b, s: (b, s, 0, 0)),
            scratch_shapes=[
                pltpu.VMEM((xs_rows, C), jnp.float32),
                pltpu.VMEM((hf_rows, C), jnp.float32),
            ],
        ),
        compiler_params=pltpu.CompilerParams(
            dimension_semantics=("parallel", "parallel"),
            vmem_limit_bytes=32 * 1024 * 1024),
        cost_estimate=pl.CostEstimate(
            flops=flops, transcendentals=0, bytes_accessed=bytes_accessed),
    )(xpp_flat, xpp_flat, wf)

    return jnp.transpose(out_nhwc, (0, 3, 1, 2))


if __name__ == "__main__":
    key = jax.random.PRNGKey(0)
    kx_, kw1, kw2 = jax.random.split(key, 3)
    B, C, H, W = 2, 32, 16, 16

    x = jax.random.normal(kx_, (B, C, H, W), dtype=jnp.float32)
    scale = 1.0 / np.sqrt(9 * C)   # kaiming-like scale, deterministic
    w1 = (scale * jax.random.normal(kw1, (C, C, 3, 3))).astype(jnp.float32)
    w2 = (scale * jax.random.normal(kw2, (C, C, 3, 3))).astype(jnp.float32)

    out = jax.block_until_ready(resblock_do_eval(x, w1, w2))

    # Reference: plain XLA convs (same semantics as F.conv2d, stride 1, pad 1).
    def conv(z, w):
        return lax.conv_general_dilated(
            z, w, window_strides=(1, 1), padding=((1, 1), (1, 1)),
            dimension_numbers=("NCHW", "OIHW", "NCHW"),
            precision=lax.Precision.HIGHEST)

    ref = conv(jax.nn.relu(conv(x, w1)), w2) + x
    max_err = float(jnp.max(jnp.abs(out - ref)))
    assert np.allclose(np.asarray(out), np.asarray(ref),
                       rtol=1e-3, atol=1e-3), f"max_err={max_err}"
    print("KERNEL_OK")
</pallas_src>

<mosaic_0001>
module attributes {stable_mosaic.version = 11 : i64} {
  func.func @_resblock_kernel(%arg0: i32, %arg1: i32, %arg2: memref<1x144x32xf32, #tpu.memory_space<vmem>>, %arg3: memref<1x72x32xf32, #tpu.memory_space<vmem>>, %arg4: memref<2x3x96x32xf32, #tpu.memory_space<vmem>>, %arg5: memref<1x8x16x32xf32, #tpu.memory_space<vmem>>, %arg6: memref<232x32xf32, #tpu.memory_space<vmem>>, %arg7: memref<188x32xf32, #tpu.memory_space<vmem>>) attributes {dimension_semantics = [#tpu.dimension_semantics<parallel>, #tpu.dimension_semantics<parallel>], iteration_bounds = array<i64: 2, 2>, scalar_prefetch = 0 : i64, scratch_operands = 2 : i64, tpu.core_type = #tpu.core_type<tc>, window_params = [{transform_indices = @transform_0, window_bounds = array<i64: 1, 144, 32>}, {transform_indices = @transform_1, window_bounds = array<i64: 1, 72, 32>}, {pipeline_mode = #tpu.pipeline_mode<synchronous>, transform_indices = @transform_2, window_bounds = array<i64: 2, 3, 96, 32>}, {transform_indices = @transform_3, window_bounds = array<i64: 1, 8, 16, 32>}]} {
    %cst = arith.constant 0.000000e+00 : f32
    %0 = vector.broadcast %cst : f32 to vector<8x32xf32>
    %c0 = arith.constant 0 : index
    %c0_0 = arith.constant 0 : index
    %1 = vector.load %arg6[%c0, %c0_0] : memref<232x32xf32, #tpu.memory_space<vmem>>, vector<8x32xf32>
    tpu.vector_store %arg6[%c0, %c0_0], %0 {strides = array<i32>} : memref<232x32xf32, #tpu.memory_space<vmem>>, vector<8x32xf32>,
    %c0_1 = arith.constant 0 : index
    %c0_2 = arith.constant 0 : index
    %c0_3 = arith.constant 0 : index
    %2 = vector.load %arg2[%c0_1, %c0_2, %c0_3] : memref<1x144x32xf32, #tpu.memory_space<vmem>>, vector<1x144x32xf32>
    %3 = vector.shape_cast %2 : vector<1x144x32xf32> to vector<144x32xf32>
    %c8 = arith.constant 8 : index
    %c0_4 = arith.constant 0 : index
    %4 = vector.load %arg6[%c8, %c0_4] : memref<232x32xf32, #tpu.memory_space<vmem>>, vector<144x32xf32>
    tpu.vector_store %arg6[%c8, %c0_4], %3 {strides = array<i32>} : memref<232x32xf32, #tpu.memory_space<vmem>>, vector<144x32xf32>,
    %c0_5 = arith.constant 0 : index
    %c0_6 = arith.constant 0 : index
    %c0_7 = arith.constant 0 : index
    %5 = vector.load %arg3[%c0_5, %c0_6, %c0_7] : memref<1x72x32xf32, #tpu.memory_space<vmem>>, vector<1x72x32xf32>
    %6 = vector.shape_cast %5 : vector<1x72x32xf32> to vector<72x32xf32>
    %c152 = arith.constant 152 : index
    %c0_8 = arith.constant 0 : index
    %7 = vector.load %arg6[%c152, %c0_8] : memref<232x32xf32, #tpu.memory_space<vmem>>, vector<72x32xf32>
    tpu.vector_store %arg6[%c152, %c0_8], %6 {strides = array<i32>} : memref<232x32xf32, #tpu.memory_space<vmem>>, vector<72x32xf32>,
    %cst_9 = arith.constant 0.000000e+00 : f32
    %8 = vector.broadcast %cst_9 : f32 to vector<8x32xf32>
    %c224 = arith.constant 224 : index
    %c0_10 = arith.constant 0 : index
    %9 = vector.load %arg6[%c224, %c0_10] : memref<232x32xf32, #tpu.memory_space<vmem>>, vector<8x32xf32>
    tpu.vector_store %arg6[%c224, %c0_10], %8 {strides = array<i32>} : memref<232x32xf32, #tpu.memory_space<vmem>>, vector<8x32xf32>,
    %c0_11 = arith.constant 0 : index
    %c0_12 = arith.constant 0 : index
    %c0_13 = arith.constant 0 : index
    %c0_14 = arith.constant 0 : index
    %10 = vector.load %arg4[%c0_11, %c0_12, %c0_13, %c0_14] : memref<2x3x96x32xf32, #tpu.memory_space<vmem>>, vector<1x3x96x32xf32>
    %11 = vector.shape_cast %10 : vector<1x3x96x32xf32> to vector<3x96x32xf32>
    %cst_15 = arith.constant 0.000000e+00 : f32
    %12 = vector.broadcast %cst_15 : f32 to vector<180x32xf32>
    %c7 = arith.constant 7 : index
    %c0_16 = arith.constant 0 : index
    %13 = vector.load %arg6[%c7, %c0_16] : memref<232x32xf32, #tpu.memory_space<vmem>>, vector<180x32xf32>
    %c8_17 = arith.constant 8 : index
    %c0_18 = arith.constant 0 : index
    %14 = vector.load %arg6[%c8_17, %c0_18] : memref<232x32xf32, #tpu.memory_space<vmem>>, vector<180x32xf32>
    %c9 = arith.constant 9 : index
    %c0_19 = arith.constant 0 : index
    %15 = vector.load %arg6[%c9, %c0_19] : memref<232x32xf32, #tpu.memory_space<vmem>>, vector<180x32xf32>
    %16 = tpu.concatenate %13, %14, %15 in 1 : vector<180x32xf32>, vector<180x32xf32>, vector<180x32xf32> -> vector<180x96xf32>
    %17 = vector.extract_strided_slice %11 {offsets = [0, 0, 0], sizes = [1, 96, 32], strides = [1, 1, 1]} : vector<3x96x32xf32> to vector<1x96x32xf32>
    %18 = vector.shape_cast %17 : vector<1x96x32xf32> to vector<96x32xf32>
    %cst_20 = arith.constant dense<0.000000e+00> : vector<180x32xf32>
    %19 = tpu.matmul %16, %18, %cst_20 {dimension_numbers = #tpu.dot_dimension_numbers<[1], [0], [0], [1], [0, 0, 1, 1], [], []>} : vector<180x96xf32>, vector<96x32xf32>, vector<180x32xf32> -> vector<180x32xf32>
    %20 = arith.addf %12, %19 : vector<180x32xf32>
    %c25 = arith.constant 25 : index
    %c0_21 = arith.constant 0 : index
    %21 = vector.load %arg6[%c25, %c0_21] : memref<232x32xf32, #tpu.memory_space<vmem>>, vector<180x32xf32>
    %c26 = arith.constant 26 : index
    %c0_22 = arith.constant 0 : index
    %22 = vector.load %arg6[%c26, %c0_22] : memref<232x32xf32, #tpu.memory_space<vmem>>, vector<180x32xf32>
    %c27 = arith.constant 27 : index
    %c0_23 = arith.constant 0 : index
    %23 = vector.load %arg6[%c27, %c0_23] : memref<232x32xf32, #tpu.memory_space<vmem>>, vector<180x32xf32>
    %24 = tpu.concatenate %21, %22, %23 in 1 : vector<180x32xf32>, vector<180x32xf32>, vector<180x32xf32> -> vector<180x96xf32>
    %25 = vector.extract_strided_slice %11 {offsets = [1, 0, 0], sizes = [1, 96, 32], strides = [1, 1, 1]} : vector<3x96x32xf32> to vector<1x96x32xf32>
    %26 = vector.shape_cast %25 : vector<1x96x32xf32> to vector<96x32xf32>
    %cst_24 = arith.constant dense<0.000000e+00> : vector<180x32xf32>
    %27 = tpu.matmul %24, %26, %cst_24 {dimension_numbers = #tpu.dot_dimension_numbers<[1], [0], [0], [1], [0, 0, 1, 1], [], []>} : vector<180x96xf32>, vector<96x32xf32>, vector<180x32xf32> -> vector<180x32xf32>
    %28 = arith.addf %20, %27 : vector<180x32xf32>
    %c43 = arith.constant 43 : index
    %c0_25 = arith.constant 0 : index
    %29 = vector.load %arg6[%c43, %c0_25] : memref<232x32xf32, #tpu.memory_space<vmem>>, vector<180x32xf32>
    %c44 = arith.constant 44 : index
    %c0_26 = arith.constant 0 : index
    %30 = vector.load %arg6[%c44, %c0_26] : memref<232x32xf32, #tpu.memory_space<vmem>>, vector<180x32xf32>
    %c45 = arith.constant 45 : index
    %c0_27 = arith.constant 0 : index
    %31 = vector.load %arg6[%c45, %c0_27] : memref<232x32xf32, #tpu.memory_space<vmem>>, vector<180x32xf32>
    %32 = tpu.concatenate %29, %30, %31 in 1 : vector<180x32xf32>, vector<180x32xf32>, vector<180x32xf32> -> vector<180x96xf32>
    %33 = vector.extract_strided_slice %11 {offsets = [2, 0, 0], sizes = [1, 96, 32], strides = [1, 1, 1]} : vector<3x96x32xf32> to vector<1x96x32xf32>
    %34 = vector.shape_cast %33 : vector<1x96x32xf32> to vector<96x32xf32>
    %cst_28 = arith.constant dense<0.000000e+00> : vector<180x32xf32>
    %35 = tpu.matmul %32, %34, %cst_28 {dimension_numbers = #tpu.dot_dimension_numbers<[1], [0], [0], [1], [0, 0, 1, 1], [], []>} : vector<180x96xf32>, vector<96x32xf32>, vector<180x32xf32> -> vector<180x32xf32>
    %36 = arith.addf %28, %35 : vector<180x32xf32>
    %37 = tpu.iota {dimensions = array<i32: 0>} : vector<10x18x32xi32>
    %38 = tpu.iota {dimensions = array<i32: 1>} : vector<10x18x32xi32>
    %c8_i32 = arith.constant 8 : i32
    %39 = arith.muli %arg1, %c8_i32 : i32
    %c1_i32 = arith.constant 1 : i32
    %40 = arith.subi %39, %c1_i32 : i32
    %41 = vector.broadcast %40 : i32 to vector<10x18x32xi32>
    %42 = arith.addi %41, %37 : vector<10x18x32xi32>
    %c1_i32_29 = arith.constant 1 : i32
    %43 = vector.broadcast %c1_i32_29 : i32 to vector<10x18x32xi32>
    %44 = arith.cmpi sge, %38, %43 : vector<10x18x32xi32>
    %c16_i32 = arith.constant 16 : i32
    %45 = vector.broadcast %c16_i32 : i32 to vector<10x18x32xi32>
    %46 = arith.cmpi sle, %38, %45 : vector<10x18x32xi32>
    %47 = arith.andi %44, %46 : vector<10x18x32xi1>
    %c0_i32 = arith.constant 0 : i32
    %48 = vector.broadcast %c0_i32 : i32 to vector<10x18x32xi32>
    %49 = arith.cmpi sge, %42, %48 : vector<10x18x32xi32>
    %50 = arith.andi %47, %49 : vector<10x18x32xi1>
    %c16_i32_30 = arith.constant 16 : i32
    %51 = vector.broadcast %c16_i32_30 : i32 to vector<10x18x32xi32>
    %52 = arith.cmpi slt, %42, %51 : vector<10x18x32xi32>
    %53 = arith.andi %50, %52 : vector<10x18x32xi1>
    %54 = arith.extui %53 : vector<10x18x32xi1> to vector<10x18x32xi32>
    %55 = arith.sitofp %54 : vector<10x18x32xi32> to vector<10x18x32xf32>
    %56 = vector.shape_cast %55 : vector<10x18x32xf32> to vector<180x32xf32>
    %cst_31 = arith.constant 0.000000e+00 : f32
    %57 = vector.broadcast %cst_31 : f32 to vector<180x32xf32>
    %58 = arith.maximumf %36, %57 : vector<180x32xf32>
    %59 = arith.mulf %58, %56 : vector<180x32xf32>
    %c0_32 = arith.constant 0 : index
    %c0_33 = arith.constant 0 : index
    %60 = vector.load %arg7[%c0_32, %c0_33] : memref<188x32xf32, #tpu.memory_space<vmem>>, vector<180x32xf32>
    tpu.vector_store %arg7[%c0_32, %c0_33], %59 {strides = array<i32>} : memref<188x32xf32, #tpu.memory_space<vmem>>, vector<180x32xf32>,
    %cst_34 = arith.constant 0.000000e+00 : f32
    %61 = vector.broadcast %cst_34 : f32 to vector<8x32xf32>
    %c180 = arith.constant 180 : index
    %c0_35 = arith.constant 0 : index
    %62 = vector.load %arg7[%c180, %c0_35] : memref<188x32xf32, #tpu.memory_space<vmem>>, vector<8x32xf32>
    tpu.vector_store %arg7[%c180, %c0_35], %61 {strides = array<i32>} : memref<188x32xf32, #tpu.memory_space<vmem>>, vector<8x32xf32>,
    %c1 = arith.constant 1 : index
    %c0_36 = arith.constant 0 : index
    %c0_37 = arith.constant 0 : index
    %c0_38 = arith.constant 0 : index
    %63 = vector.load %arg4[%c1, %c0_36, %c0_37, %c0_38] : memref<2x3x96x32xf32, #tpu.memory_space<vmem>>, vector<1x3x96x32xf32>
    %64 = vector.shape_cast %63 : vector<1x3x96x32xf32> to vector<3x96x32xf32>
    %cst_39 = arith.constant 0.000000e+00 : f32
    %65 = vector.broadcast %cst_39 : f32 to vector<144x32xf32>
    %c0_40 = arith.constant 0 : index
    %c0_41 = arith.constant 0 : index
    %66 = vector.load %arg7[%c0_40, %c0_41] : memref<188x32xf32, #tpu.memory_space<vmem>>, vector<144x32xf32>
    %c1_42 = arith.constant 1 : index
    %c0_43 = arith.constant 0 : index
    %67 = vector.load %arg7[%c1_42, %c0_43] : memref<188x32xf32, #tpu.memory_space<vmem>>, vector<144x32xf32>
    %c2 = arith.constant 2 : index
    %c0_44 = arith.constant 0 : index
    %68 = vector.load %arg7[%c2, %c0_44] : memref<188x32xf32, #tpu.memory_space<vmem>>, vector<144x32xf32>
    %69 = tpu.concatenate %66, %67, %68 in 1 : vector<144x32xf32>, vector<144x32xf32>, vector<144x32xf32> -> vector<144x96xf32>
    %70 = vector.extract_strided_slice %64 {offsets = [0, 0, 0], sizes = [1, 96, 32], strides = [1, 1, 1]} : vector<3x96x32xf32> to vector<1x96x32xf32>
    %71 = vector.shape_cast %70 : vector<1x96x32xf32> to vector<96x32xf32>
    %cst_45 = arith.constant dense<0.000000e+00> : vector<144x32xf32>
    %72 = tpu.matmul %69, %71, %cst_45 {dimension_numbers = #tpu.dot_dimension_numbers<[1], [0], [0], [1], [0, 0, 1, 1], [], []>} : vector<144x96xf32>, vector<96x32xf32>, vector<144x32xf32> -> vector<144x32xf32>
    %73 = arith.addf %65, %72 : vector<144x32xf32>
    %c18 = arith.constant 18 : index
    %c0_46 = arith.constant 0 : index
    %74 = vector.load %arg7[%c18, %c0_46] : memref<188x32xf32, #tpu.memory_space<vmem>>, vector<144x32xf32>
    %c19 = arith.constant 19 : index
    %c0_47 = arith.constant 0 : index
    %75 = vector.load %arg7[%c19, %c0_47] : memref<188x32xf32, #tpu.memory_space<vmem>>, vector<144x32xf32>
    %c20 = arith.constant 20 : index
    %c0_48 = arith.constant 0 : index
    %76 = vector.load %arg7[%c20, %c0_48] : memref<188x32xf32, #tpu.memory_space<vmem>>, vector<144x32xf32>
    %77 = tpu.concatenate %74, %75, %76 in 1 : vector<144x32xf32>, vector<144x32xf32>, vector<144x32xf32> -> vector<144x96xf32>
    %78 = vector.extract_strided_slice %64 {offsets = [1, 0, 0], sizes = [1, 96, 32], strides = [1, 1, 1]} : vector<3x96x32xf32> to vector<1x96x32xf32>
    %79 = vector.shape_cast %78 : vector<1x96x32xf32> to vector<96x32xf32>
    %cst_49 = arith.constant dense<0.000000e+00> : vector<144x32xf32>
    %80 = tpu.matmul %77, %79, %cst_49 {dimension_numbers = #tpu.dot_dimension_numbers<[1], [0], [0], [1], [0, 0, 1, 1], [], []>} : vector<144x96xf32>, vector<96x32xf32>, vector<144x32xf32> -> vector<144x32xf32>
    %81 = arith.addf %73, %80 : vector<144x32xf32>
    %c36 = arith.constant 36 : index
    %c0_50 = arith.constant 0 : index
    %82 = vector.load %arg7[%c36, %c0_50] : memref<188x32xf32, #tpu.memory_space<vmem>>, vector<144x32xf32>
    %c37 = arith.constant 37 : index
    %c0_51 = arith.constant 0 : index
    %83 = vector.load %arg7[%c37, %c0_51] : memref<188x32xf32, #tpu.memory_space<vmem>>, vector<144x32xf32>
    %c38 = arith.constant 38 : index
    %c0_52 = arith.constant 0 : index
    %84 = vector.load %arg7[%c38, %c0_52] : memref<188x32xf32, #tpu.memory_space<vmem>>, vector<144x32xf32>
    %85 = tpu.concatenate %82, %83, %84 in 1 : vector<144x32xf32>, vector<144x32xf32>, vector<144x32xf32> -> vector<144x96xf32>
    %86 = vector.extract_strided_slice %64 {offsets = [2, 0, 0], sizes = [1, 96, 32], strides = [1, 1, 1]} : vector<3x96x32xf32> to vector<1x96x32xf32>
    %87 = vector.shape_cast %86 : vector<1x96x32xf32> to vector<96x32xf32>
    %cst_53 = arith.constant dense<0.000000e+00> : vector<144x32xf32>
    %88 = tpu.matmul %85, %87, %cst_53 {dimension_numbers = #tpu.dot_dimension_numbers<[1], [0], [0], [1], [0, 0, 1, 1], [], []>} : vector<144x96xf32>, vector<96x32xf32>, vector<144x32xf32> -> vector<144x32xf32>
    %89 = arith.addf %81, %88 : vector<144x32xf32>
    %c45_54 = arith.constant 45 : index
    %c0_55 = arith.constant 0 : index
    %90 = vector.load %arg6[%c45_54, %c0_55] : memref<232x32xf32, #tpu.memory_space<vmem>>, vector<144x32xf32>
    %91 = arith.addf %89, %90 : vector<144x32xf32>
    %92 = vector.shape_cast %91 : vector<144x32xf32> to vector<8x18x32xf32>
    %93 = vector.extract_strided_slice %92 {offsets = [0, 0, 0], sizes = [8, 16, 32], strides = [1, 1, 1]} : vector<8x18x32xf32> to vector<8x16x32xf32>
    %c0_56 = arith.constant 0 : index
    %c0_57 = arith.constant 0 : index
    %c0_58 = arith.constant 0 : index
    %c0_59 = arith.constant 0 : index
    %94 = vector.load %arg5[%c0_56, %c0_57, %c0_58, %c0_59] : memref<1x8x16x32xf32, #tpu.memory_space<vmem>>, vector<1x8x16x32xf32>
    %95 = vector.shape_cast %94 : vector<1x8x16x32xf32> to vector<8x16x32xf32>
    %96 = vector.shape_cast %93 : vector<8x16x32xf32> to vector<1x8x16x32xf32>
    tpu.vector_store %arg5[%c0_56, %c0_57, %c0_58, %c0_59], %96 {strides = array<i32>} : memref<1x8x16x32xf32, #tpu.memory_space<vmem>>, vector<1x8x16x32xf32>,
    return
  }
  func.func @transform_0(%arg0: i32, %arg1: i32) -> (i32, i32, i32) {
    %c0_i32 = arith.constant 0 : i32
    %c0_i32_0 = arith.constant 0 : i32
    return %arg0, %arg1, %c0_i32 : i32, i32, i32
  }
  func.func @transform_1(%arg0: i32, %arg1: i32) -> (i32, i32, i32) {
    %c1_i32 = arith.constant 1 : i32
    %0 = arith.addi %arg1, %c1_i32 : i32
    %c2_i32 = arith.constant 2 : i32
    %1 = arith.muli %0, %c2_i32 : i32
    %c0_i32 = arith.constant 0 : i32
    %c0_i32_0 = arith.constant 0 : i32
    return %arg0, %1, %c0_i32 : i32, i32, i32
  }
  func.func @transform_2(%arg0: i32, %arg1: i32) -> (i32, i32, i32, i32) {
    %c0_i32 = arith.constant 0 : i32
    %c0_i32_0 = arith.constant 0 : i32
    %c0_i32_1 = arith.constant 0 : i32
    %c0_i32_2 = arith.constant 0 : i32
    %c0_i32_3 = arith.constant 0 : i32
    return %c0_i32, %c0_i32_0, %c0_i32_1, %c0_i32_2 : i32, i32, i32, i32
  }
  func.func @transform_3(%arg0: i32, %arg1: i32) -> (i32, i32, i32, i32) {
    %c0_i32 = arith.constant 0 : i32
    %c0_i32_0 = arith.constant 0 : i32
    %c0_i32_1 = arith.constant 0 : i32
    return %arg0, %arg1, %c0_i32, %c0_i32_0 : i32, i32, i32, i32
  }
}

</mosaic_0001>

<bundles_post_ra>
// kernel: tpu_custom_call.1
= control target key start
LH: loop header
LB: loop body
LE: loop exit
PB: predicated region body
PF: predicated region fallthrough
CT: control target
= control target key end

     0   :  { %8 = vsyncpa [#allocation5], 0  ;;  %s8819_s0 = inlined_call_operand.vmem [shape: f32[2,360,32], index: 0, kind: input, shape index: {}]   ;;  %s8820_s1 = inlined_call_operand.vmem [shape: f32[2,360,32], index: 1, kind: input, shape index: {}]   ;;  %s8821_s2 = inlined_call_operand.vmem [shape: f32[2,3,96,32], index: 2, kind: input, shape index: {}]   ;;  %s8822_s3 = inlined_call_operand.hbm [shape: f32[2,16,16,32], index: 3, kind: output, shape index: {}]  }
   0x1   :  { %10 = vsyncpa [#allocation5 + $0x1], 0  ;;  %s6760_s12 = smov 0   ;;  %s6762_s13 = smov 0  }
   0x2   :  { %s6764_s14 = smov 0   ;;  %s6766_s15 = smov 0  }
   0x3   :  { %s6768_s16 = smov 0   ;;  %s6770_s17 = smov 0  }
   0x4   :  { %s6772_s18 = smov 0   ;;  %s6774_s19 = smov 0  }
   0x5 LB: > { %s5458_s20 = sadd.s32 4294967295, %s6725_s19   ;;  %s5459_s21 = sadd.s32 4294967294, %s6725_s19   ;;  %s6725_s19 = sphi %s6774_s19, %s16_s19   ;;  %s6721_s18 = sphi %s6772_s18, %s8841_s18   ;;  %s6717_s17 = sphi %s6770_s17, %s8840_s17   ;;  %s6713_s16 = sphi %s6768_s16, %s8839_s16   ;;  %s6709_s15 = sphi %s6766_s15, %s8838_s15   ;;  %s6705_s14 = sphi %s6764_s14, %s8837_s14   ;;  %s6701_s13 = sphi %s6762_s13, %s8836_s13   ;;  %s6697_s12 = sphi %s6760_s12, %s8835_s12  }
   0x6   : > { %s25_s22 = sadd.s32 1, %s6717_s17  ;;  %s28_s23 = sadd.s32 1, %s6721_s18 }
   0x7   : > { %p26_p0 = scmp.ge.s32.totalorder %s25_s22, 2  ;;  %p128_p1 = scmp.ne.s32.totalorder %s6705_s14, %s6701_s13 }
   0x8   : > { %p129_p2 = scmp.eq.s32.totalorder %s5458_s20, 3  ;;  %p134_p5 = scmp.ne.s32.totalorder %s6701_s13, %s6697_s12 }
   0x9   : > { %s8843_s22 = smov (%p26_p0, %s25_s22), 0  ;;  %s8845_s23 = smov (!%p26_p0, %s28_s23), %s6721_s18 }
   0xa   : > { %s114_s24 = ssub.s32 %s6717_s17, %s8843_s22  ;;  %p6811_p3 = por %p129_p2, %p128_p1 }
   0xb   : > { %p30_p4 = scmp.ge.s32.totalorder %s8845_s23, 2  ;;  %p135_p6 = scmp.eq.s32.totalorder %s5459_s21, 3 }
   0xc   : > { %p5464_p7 = scmp.ge.s32.totalorder %s6725_s19, 1  ;;  %p194_p9 = scmp.lt.s32.totalorder %s6725_s19, 5 }
   0xd   : > { %s8847_s23 = smov (%p30_p4, %s8845_s23), 0  ;;  %p6820_p8 = por %p135_p6, %p134_p5 }
   0xe   : > { %s113_s27 = ssub.s32 %s6721_s18, %s8847_s23  ;;  %s118_s28 = sadd.s32 1, %s6705_s14 }
   0xf   : > { %s115_s29 = sor.u32 %s114_s24, %s113_s27  ;;  %p195_p10 = pnand %p5464_p7, %p194_p9 }
  0x10   : > { %p116_p11 = scmp.eq.s32.totalorder %s115_s29, 0  ;;  %s237_s4 = smul.u32 (!%p195_p10), 18, %s6709_s15  ;;  %v339_v0 = vld [vmem:[%s8821_s2 + $0x60] sm:$0xff] (!%p195_p10)  ;;  %v340_v1 = vld [vmem:[%s8821_s2 + $0x68] sm:$0xff] (!%p195_p10)  ;;  %v6727_v2 = vmov (!%p195_p10), 0.0|0.0   ;;  %v341_v4 = vld [vmem:[%s8821_s2 + $0x70] sm:$0xff] (!%p195_p10) }
  0x11   : > { %198 = sbr.rel (%p195_p10) target bundleno = 1099 (0x44b), region = 32  ;;  %p242_p12 = scmp.lt.s32.totalorder (!%p195_p10), %s6713_s16, 1  ;;  %6302 = vmatprep.subr.bf16.mxu0 (!%p195_p10), %v6727_v2  ;;  %v6303_v3 = vpack.c.bf16 (!%p195_p10), %v340_v1, %v339_v0  ;;  %v342_v5 = vld [vmem:[%s8821_s2 + $0x78] sm:$0xff] (!%p195_p10)  ;;  %6428 = vmatprep.subr.bf16.mxu1 (!%p195_p10), %v6727_v2  ;;  %v343_v7 = vld [vmem:[%s8821_s2 + $0x80] sm:$0xff] (!%p195_p10)  ;;  %v344_v8 = vld [vmem:[%s8821_s2 + $0x88] sm:$0xff] (!%p195_p10)  ;;  %vm270_vm0 = vcmask (!%p195_p10), 261120  }
  0x12   : > { %s6829_s30 = scalar_select %p116_p11, %s6705_s14, %s118_s28  }
  0x13   : > { %p244_p13 = scmp.lt.s32.totalorder (!%p195_p10), %s237_s4, 44  ;;  %s255_s24 = sadd.s32 (!%p195_p10), 1, %s6709_s15  ;;  %6304 = vmatpush3.bf16.msra.mxu0 (!%p195_p10), %v6303_v3  ;;  %v6306_v6 = vpack.c.bf16 (!%p195_p10), %v342_v5, %v341_v4  ;;  %v6309_v9 = vpack.c.bf16 (!%p195_p10), %v344_v8, %v343_v7  ;;  %v345_v10 = vld [vmem:[%s8821_s2 + $0x90] sm:$0xff] (!%p195_p10)  ;;  %v346_v11 = vld [vmem:[%s8821_s2 + $0x98] sm:$0xff] (!%p195_p10)  ;;  %vm6728_vm1 = vmmov (!%p195_p10), 0   ;;  %v6729_v15 = vmov (!%p195_p10), 0.0  }
  0x14   : > { %6305 = vmatprep.subr.bf16.mxu0 (!%p195_p10), %v6727_v2  ;;  %s5468_s7 = smul.u32 (!%p195_p10), 18, %s255_s24  ;;  %5894 = vmatprep.mubr.msk.f32.mxu0 (!%p195_p10), %vm6728_vm1, %v6729_v15  ;;  %271 = vst.msk [vmem:[#allocation2] sm:$0xff] (!%p195_p10), %vm270_vm0, %v6729_v15  ;;  %326 = vst.msk [vmem:[#allocation2 + $0xe0] sm:$0xff] (!%p195_p10), %vm270_vm0, %v6729_v15  ;;  %v6312_v19 = vpack.c.bf16 (!%p195_p10), %v346_v11, %v345_v10  ;;  %v347_v20 = vld [vmem:[%s8821_s2 + $0xa0] sm:$0xff] (!%p195_p10)  ;;  %v348_v21 = vld [vmem:[%s8821_s2 + $0xa8] sm:$0xff] (!%p195_p10)  ;;  %s6731_s6 = smov (!%p195_p10), 64  }
  0x15   : > { %3312 = vst.msk [vmem:[#allocation3 + $0xb4] sm:$0xff] (!%p195_p10), %vm270_vm0, %v6729_v15  ;;  %6086 = vmatprep.mubr.msk.f32.mxu1 (!%p195_p10), %vm6728_vm1, %v6729_v15  ;;  %v349_v34 = vld [vmem:[%s8821_s2 + $0xb0] sm:$0xff] (!%p195_p10)  ;;  %v350_v35 = vld [vmem:[%s8821_s2 + $0xb8] sm:$0xff] (!%p195_p10)  ;;  %v6315_v39 = vpack.c.bf16 (!%p195_p10), %v348_v21, %v347_v20  ;;  %vm639_vm2 = vcmask (!%p195_p10), 523264   ;;  %vm942_vm3 = vcmask (!%p195_p10), 785408   ;;  %s6737_s5 = smov (!%p195_p10), [#allocation4]  }
  0x16   : > { %p260_p0 = scmp.lt.s32.totalorder (!%p195_p10), %s5468_s7, 44  ;;  %v6318_v47 = vpack.c.bf16 (!%p195_p10), %v350_v35, %v349_v34  ;;  %v355_v35 = vld [vmem:[%s8821_s2 + $0xe0] sm:$0xff] (!%p195_p10) }
  0x17   : > { %6307 = vmatpush3.bf16.msra.mxu0 (!%p195_p10), %v6306_v6 }
  0x18   : > { %s6848_s21 = scalar_select %p242_p12, %s6713_s16, 1  ;;  %6308 = vmatprep.subr.bf16.mxu0 %v6727_v2 }
  0x19   : > { %s8849_s4 = smov (!%p244_p13, %s237_s4), 44  ;;  %s8851_s7 = smov (!%p260_p0, %s5468_s7), 44 }
  0x1a   : > { %s6547_s27 = smul.u32 45, %s6848_s21  ;;  %s5664_s21 = sshll.u32 %s6713_s16, 5 }
  0x1b   : > { %6310 = vmatpush3.bf16.msra.mxu0 %v6309_v9 }
  0x1c   : > { %s247_s8 = sadd.s32 %s6547_s27, %s8849_s4  ;;  %s263_s10 = sadd.s32 %s6547_s27, %s8851_s7  ;;  %6311 = vmatprep.subr.bf16.mxu0 %v6727_v2 }
  0x1d   : > { %s5466_s9 = sshll.u32 %s247_s8, 3  ;;  %s5469_s11 = sshll.u32 %s263_s10, 3 }
  0x1e   : > { %s6871_s24 = scalar_lea.vmem %s8819_s0, %s5466_s9  ;;  %s6922_s7 = scalar_lea.vmem %s8820_s1, %s5469_s11 }
  0x1f   : > { %v275_v12 = vld [vmem:[%s6871_s24 + $0x18] sm:$0xff]  ;;  %v276_v13 = vld [vmem:[%s6871_s24 + $0x20] sm:$0xff]  ;;  %v274_v14 = vld [vmem:[%s6871_s24 + $0x10] sm:$0xff]  ;;  %6313 = vmatpush3.bf16.msra.mxu0 %v6312_v19  ;;  %s6730_s4 = smov 32   ;;  %s5539_s10 = sshll.u32 %s6709_s15, 3 }
  0x20   : > { %293 = vst.msk [vmem:[#allocation2 + $0x20] sm:$0xff] %vm270_vm0, %v275_v12  ;;  %294 = vst.msk [vmem:[#allocation2 + $0x28] sm:$0xff] %vm270_vm0, %v276_v13  ;;  %v277_v16 = vld [vmem:[%s6871_s24 + $0x28] sm:$0xff]  ;;  %v278_v17 = vld [vmem:[%s6871_s24 + $0x30] sm:$0xff]  ;;  %6314 = vmatprep.subr.bf16.mxu0 %v6727_v2  ;;  %s5540_s11 = sadd.s32 4294967295, %s5539_s10 }
  0x21   : > { %292 = vst.msk [vmem:[#allocation2 + $0x18] sm:$0xff] %vm270_vm0, %v274_v14  ;;  %v279_v18 = vld [vmem:[%s6871_s24 + $0x38] sm:$0xff]  ;;  %295 = vst.msk [vmem:[#allocation2 + $0x30] sm:$0xff] %vm270_vm0, %v277_v16  ;;  %v280_v22 = vld [vmem:[%s6871_s24 + $0x40] sm:$0xff] }
  0x22   : > { %296 = vst.msk [vmem:[#allocation2 + $0x38] sm:$0xff] %vm270_vm0, %v278_v17  ;;  %297 = vst.msk [vmem:[#allocation2 + $0x40] sm:$0xff] %vm270_vm0, %v279_v18  ;;  %v281_v23 = vld [vmem:[%s6871_s24 + $0x48] sm:$0xff]  ;;  %v282_v24 = vld [vmem:[%s6871_s24 + $0x50] sm:$0xff] }
  0x23   : > { %298 = vst.msk [vmem:[#allocation2 + $0x48] sm:$0xff] %vm270_vm0, %v280_v22  ;;  %299 = vst.msk [vmem:[#allocation2 + $0x50] sm:$0xff] %vm270_vm0, %v281_v23  ;;  %v283_v25 = vld [vmem:[%s6871_s24 + $0x58] sm:$0xff]  ;;  %v284_v26 = vld [vmem:[%s6871_s24 + $0x60] sm:$0xff]  ;;  %6316 = vmatpush3.bf16.msra.mxu0 %v6315_v39 }
  0x24   : > { %300 = vst.msk [vmem:[#allocation2 + $0x58] sm:$0xff] %vm270_vm0, %v282_v24  ;;  %v285_v27 = vld [vmem:[%s6871_s24 + $0x68] sm:$0xff]  ;;  %301 = vst.msk [vmem:[#allocation2 + $0x60] sm:$0xff] %vm270_vm0, %v283_v25  ;;  %v286_v28 = vld [vmem:[%s6871_s24 + $0x70] sm:$0xff]  ;;  %6317 = vmatprep.subr.bf16.mxu0 %v6727_v2 }
  0x25   : > { %302 = vst.msk [vmem:[#allocation2 + $0x68] sm:$0xff] %vm270_vm0, %v284_v26  ;;  %303 = vst.msk [vmem:[#allocation2 + $0x70] sm:$0xff] %vm270_vm0, %v285_v27  ;;  %v287_v29 = vld [vmem:[%s6871_s24 + $0x78] sm:$0xff]  ;;  %v288_v30 = vld [vmem:[%s6871_s24 + $0x80] sm:$0xff] }
  0x26   : > { %304 = vst.msk [vmem:[#allocation2 + $0x78] sm:$0xff] %vm270_vm0, %v286_v28  ;;  %305 = vst.msk [vmem:[#allocation2 + $0x80] sm:$0xff] %vm270_vm0, %v287_v29  ;;  %v289_v31 = vld [vmem:[%s6871_s24 + $0x88] sm:$0xff]  ;;  %v308_v32 = vld [vmem:[%s6922_s7] sm:$0xff] }
  0x27   : > { %306 = vst.msk [vmem:[#allocation2 + $0x88] sm:$0xff] %vm270_vm0, %v288_v30  ;;  %v309_v33 = vld [vmem:[%s6922_s7 + $0x8] sm:$0xff]  ;;  %307 = vst.msk [vmem:[#allocation2 + $0x90] sm:$0xff] %vm270_vm0, %v289_v31  ;;  %v310_v36 = vld [vmem:[%s6922_s7 + $0x10] sm:$0xff]  ;;  %6319 = vmatpush3.bf16.msra.mxu0 %v6318_v47 }
  0x28   : > { %317 = vst.msk [vmem:[#allocation2 + $0x98] sm:$0xff] %vm270_vm0, %v308_v32  ;;  %318 = vst.msk [vmem:[#allocation2 + $0xa0] sm:$0xff] %vm270_vm0, %v309_v33  ;;  %v311_v37 = vld [vmem:[%s6922_s7 + $0x18] sm:$0xff]  ;;  %v312_v38 = vld [vmem:[%s6922_s7 + $0x20] sm:$0xff]  ;;  %6320 = vmatprep.subr.bf16.mxu0 %v6727_v2 }
  0x29   : > { %319 = vst.msk [vmem:[#allocation2 + $0xa8] sm:$0xff] %vm270_vm0, %v310_v36  ;;  %320 = vst.msk [vmem:[#allocation2 + $0xb0] sm:$0xff] %vm270_vm0, %v311_v37  ;;  %v313_v40 = vld [vmem:[%s6922_s7 + $0x28] sm:$0xff]  ;;  %v314_v41 = vld [vmem:[%s6922_s7 + $0x30] sm:$0xff] }
  0x2a   : > { %321 = vst.msk [vmem:[#allocation2 + $0xb8] sm:$0xff] %vm270_vm0, %v312_v38  ;;  %v272_v42 = vld [vmem:[%s6871_s24] sm:$0xff]  ;;  %322 = vst.msk [vmem:[#allocation2 + $0xc0] sm:$0xff] %vm270_vm0, %v313_v40  ;;  %v691_v48 = vld [vmem:[#allocation2 + $0x2b] sm:$0xff] }
  0x2b   : > { %v667_v43 = vld [vmem:[#allocation2 + $0x22] sm:$0xff]  ;;  %v666_v44 = vld [vmem:[#allocation2 + $0x1a] sm:$0xff]  ;;  %323 = vst.msk [vmem:[#allocation2 + $0xc8] sm:$0xff] %vm270_vm0, %v314_v41  ;;  %290 = vst.msk [vmem:[#allocation2 + $0x8] sm:$0xff] %vm270_vm0, %v272_v42 }
  0x2c   : > { %737 = vrot.lane.b32.xlu1 %v667_v43, %s6730_s4  ;;  %735 = vrot.lane.b32.xlu0 %v666_v44, %s6730_s4  ;;  %v690_v45 = vld [vmem:[#allocation2 + $0x23] sm:$0xff]  ;;  %v689_v46 = vld [vmem:[#allocation2 + $0x1b] sm:$0xff]  ;;  %v692_v50 = vld [vmem:[#allocation2 + $0x33] sm:$0xff] }
  0x2d   : > { %v668_v49 = vld [vmem:[#allocation2 + $0x2a] sm:$0xff]  ;;  %v669_v51 = vld [vmem:[#allocation2 + $0x32] sm:$0xff]  ;;  %v693_v52 = vld [vmem:[#allocation2 + $0x3b] sm:$0xff] }
  0x2e   : > { %v670_v53 = vld [vmem:[#allocation2 + $0x3a] sm:$0xff]  ;;  %v273_v54 = vld [vmem:[%s6871_s24 + $0x8] sm:$0xff]  ;;  %v673_v60 = vld [vmem:[#allocation2 + $0x52] sm:$0xff]  ;;  %s6635_s24 = sshll.u32 %s6737_s5, 4  ;;  %s6636_s24 = int_to_ptr.vmem [resolvable:$false] %s6635_s24 }
  0x2f   : > { %291 = vst.msk [vmem:[#allocation2 + $0x10] sm:$0xff] %vm270_vm0, %v273_v54  ;;  %v694_v55 = vld [vmem:[#allocation2 + $0x43] sm:$0xff]  ;;  %v695_v57 = vld [vmem:[#allocation2 + $0x4b] sm:$0xff]  ;;  %v696_v59 = vld [vmem:[#allocation2 + $0x53] sm:$0xff]  ;;  %s6637_s8 = scalar_lea.vmem %s6636_s24, 4096 }
  0x30   : > { %829 = vrot.lane.b32.xlu1 %v690_v45, %s6731_s6  ;;  %827 = vrot.lane.b32.xlu0 %v689_v46, %s6731_s6  ;;  %v671_v56 = vld [vmem:[#allocation2 + $0x42] sm:$0xff]  ;;  %v672_v58 = vld [vmem:[#allocation2 + $0x4a] sm:$0xff]  ;;  %v674_v62 = vld [vmem:[#allocation2 + $0x5a] sm:$0xff] }
  0x31   : > { %v697_v61 = vld [vmem:[#allocation2 + $0x5b] sm:$0xff]  ;;  %v698_v63 = vld [vmem:[#allocation2 + $0x63] sm:$0xff]  ;;  %v699_v1 = vld [vmem:[#allocation2 + $0x6b] sm:$0xff] }
  0x32   : > { %v675_v0 = vld [vmem:[#allocation2 + $0x62] sm:$0xff]  ;;  %v676_v3 = vld [vmem:[#allocation2 + $0x6a] sm:$0xff]  ;;  %v700_v4 = vld [vmem:[#allocation2 + $0x73] sm:$0xff] }
  0x33   : > { %v677_v5 = vld [vmem:[#allocation2 + $0x72] sm:$0xff]  ;;  %v701_v6 = vld [vmem:[#allocation2 + $0x7b] sm:$0xff]  ;;  %v702_v8 = vld [vmem:[#allocation2 + $0x83] sm:$0xff] }
  0x34   : > { %831 = vrot.lane.b32.xlu1 %v691_v48, %s6731_s6  ;;  %739 = vrot.lane.b32.xlu0 %v668_v49, %s6730_s4  ;;  %v678_v7 = vld [vmem:[#allocation2 + $0x7a] sm:$0xff]  ;;  %v679_v9 = vld [vmem:[#allocation2 + $0x82] sm:$0xff]  ;;  %v703_v10 = vld [vmem:[#allocation2 + $0x8b] sm:$0xff] }
  0x35   : > { %v680_v11 = vld [vmem:[#allocation2 + $0x8a] sm:$0xff]  ;;  %v704_v12 = vld [vmem:[#allocation2 + $0x93] sm:$0xff]  ;;  %v705_v14 = vld [vmem:[#allocation2 + $0x9b] sm:$0xff] }
  0x36   : > { %v681_v13 = vld [vmem:[#allocation2 + $0x92] sm:$0xff]  ;;  %v682_v16 = vld [vmem:[#allocation2 + $0x9a] sm:$0xff]  ;;  %v706_v17 = vld [vmem:[#allocation2 + $0xa3] sm:$0xff] }
  0x37   : > { %v683_v18 = vld [vmem:[#allocation2 + $0xa2] sm:$0xff]  ;;  %v707_v19 = vld [vmem:[#allocation2 + $0xab] sm:$0xff]  ;;  %v708_v21 = vld [vmem:[#allocation2 + $0xb3] sm:$0xff] }
  0x38   : > { %833 = vrot.lane.b32.xlu1 %v692_v50, %s6731_s6  ;;  %741 = vrot.lane.b32.xlu0 %v669_v51, %s6730_s4  ;;  %v684_v20 = vld [vmem:[#allocation2 + $0xaa] sm:$0xff]  ;;  %v685_v22 = vld [vmem:[#allocation2 + $0xb2] sm:$0xff]  ;;  %v709_v23 = vld [vmem:[#allocation2 + $0xbb] sm:$0xff] }
  0x39   : > { %v686_v24 = vld [vmem:[#allocation2 + $0xba] sm:$0xff]  ;;  %v352_v26 = vld [vmem:[%s8821_s2 + $0xc8] sm:$0xff]  ;;  %v353_v30 = vld [vmem:[%s8821_s2 + $0xd0] sm:$0xff] }
  0x3a   : > { %v351_v25 = vld [vmem:[%s8821_s2 + $0xc0] sm:$0xff]  ;;  %v354_v31 = vld [vmem:[%s8821_s2 + $0xd8] sm:$0xff]  ;;  %v711_v33 = vld [vmem:[#allocation2 + $0xcb] sm:$0xf] }
  0x3b   : > { %v710_v27 = vld [vmem:[#allocation2 + $0xc3] sm:$0xff]  ;;  %v7004_v29 = vpack.c.bf16 %v352_v26, %v351_v25  ;;  %v7015_v32 = vpack.c.bf16 %v354_v31, %v353_v30  ;;  %v357_v40 = vld [vmem:[%s8821_s2 + $0xf0] sm:$0xff]  ;;  %v358_v41 = vld [vmem:[%s8821_s2 + $0xf8] sm:$0xff] }
  0x3c   : > { %835 = vrot.lane.b32.xlu1 %v693_v52, %s6731_s6  ;;  %743 = vrot.lane.b32.xlu0 %v670_v53, %s6730_s4  ;;  %v687_v28 = vld [vmem:[#allocation2 + $0xc2] sm:$0xff]  ;;  %v688_v34 = vld [vmem:[#allocation2 + $0xca] sm:$0xf]  ;;  %v7039_v42 = vpack.c.bf16 %v358_v41, %v357_v40  ;;  %v410_v43 = vld [vmem:[#allocation2 + $0x11] sm:$0xff] }
  0x3d   : > { %6434 = vmatpush3.bf16.msra.mxu1 %v7004_v29  ;;  %v356_v36 = vld [vmem:[%s8821_s2 + $0xe8] sm:$0xff]  ;;  %v387_v44 = vld [vmem:[#allocation2 + $0x10] sm:$0xff]  ;;  %v359_v45 = vld [vmem:[%s8821_s2 + $0x100] sm:$0xff] }
  0x3e   : > { %6429 = vmatprep.subr.bf16.mxu1 %v6727_v2  ;;  %v7027_v37 = vpack.c.bf16 %v356_v36, %v355_v35  ;;  %v409_v38 = vld [vmem:[#allocation2 + $0x9] sm:$0xff]  ;;  %v411_v48 = vld [vmem:[#allocation2 + $0x19] sm:$0xff]  ;;  %v412_v53 = vld [vmem:[#allocation2 + $0x21] sm:$0xff] }
  0x3f   : > { %v386_v39 = vld [vmem:[#allocation2 + $0x8] sm:$0xff]  ;;  %v388_v49 = vld [vmem:[#allocation2 + $0x18] sm:$0xff]  ;;  %v361_v50 = vld [vmem:[%s8821_s2 + $0x110] sm:$0xff] }
  0x40   : > { %837 = vrot.lane.b32.xlu1 %v694_v55, %s6731_s6  ;;  %745 = vrot.lane.b32.xlu0 %v671_v56, %s6730_s4  ;;  %v360_v46 = vld [vmem:[%s8821_s2 + $0x108] sm:$0xff]  ;;  %v362_v51 = vld [vmem:[%s8821_s2 + $0x118] sm:$0xff]  ;;  %v389_v54 = vld [vmem:[#allocation2 + $0x20] sm:$0xff] }
  0x41   : > { %6435 = vmatpush3.bf16.msra.mxu1 %v7015_v32  ;;  %v7051_v47 = vpack.c.bf16 %v360_v46, %v359_v45  ;;  %v7063_v52 = vpack.c.bf16 %v362_v51, %v361_v50  ;;  %v413_v55 = vld [vmem:[#allocation2 + $0x29] sm:$0xff]  ;;  %v334_v31 = vld [vmem:[%s8821_s2 + $0x38] sm:$0xff]  ;;  %v335_v41 = vld [vmem:[%s8821_s2 + $0x40] sm:$0xff] }
  0x42   : > { %6430 = vmatprep.subr.bf16.mxu1 %v6727_v2  ;;  %v390_v56 = vld [vmem:[#allocation2 + $0x28] sm:$0xff]  ;;  %v333_v30 = vld [vmem:[%s8821_s2 + $0x30] sm:$0xff]  ;;  %v316_v45 = vld [vmem:[%s6922_s7 + $0x40] sm:$0xff] }
  0x43   : > { %v1468_v26 = vld [vmem:[#allocation2 + $0x4c] sm:$0xff]  ;;  %325 = vst.msk [vmem:[#allocation2 + $0xd8] sm:$0xff] %vm270_vm0, %v316_v45  ;;  %v1469_v50 = vld [vmem:[#allocation2 + $0x54] sm:$0xff]  ;;  %v7207_v45 = vld [vmem:[#allocation2 + $0x81] sm:$0xff] }
  0x44   : > { %839 = vrot.lane.b32.xlu1 %v695_v57, %s6731_s6  ;;  %747 = vrot.lane.b32.xlu0 %v672_v58, %s6730_s4  ;;  %v391_v57 = vld [vmem:[#allocation2 + $0x30] sm:$0xff]  ;;  %v1466_v58 = vld [vmem:[#allocation2 + $0x3c] sm:$0xff]  ;;  %v394_v46 = vld [vmem:[#allocation2 + $0x48] sm:$0xff] }
  0x45   : > { %6436 = vmatpush3.bf16.msra.mxu1 %v7027_v37 }
  0x46   : > { %6431 = vmatprep.subr.bf16.mxu1 %v6727_v2 }
  0x48   : > { %841 = vrot.lane.b32.xlu1 %v696_v59, %s6731_s6  ;;  %749 = vrot.lane.b32.xlu0 %v673_v60, %s6730_s4  ;;  %v414_v59 = vld [vmem:[#allocation2 + $0x31] sm:$0xff]  ;;  %v1489_v60 = vld [vmem:[#allocation2 + $0x3d] sm:$0xff] }
  0x49   : > { %6437 = vmatpush3.bf16.msra.mxu1 %v7039_v42 }
  0x4a   : > { %6432 = vmatprep.subr.bf16.mxu1 %v6727_v2 }
  0x4c   : > { %843 = vrot.lane.b32.xlu1 %v697_v61, %s6731_s6  ;;  %751 = vrot.lane.b32.xlu0 %v674_v62, %s6730_s4 }
  0x4d   : > { %6438 = vmatpush3.bf16.msra.mxu1 %v7051_v47 }
  0x4e   : > { %6433 = vmatprep.subr.bf16.mxu1 %v6727_v2 }
  0x50   : > { %845 = vrot.lane.b32.xlu1 %v698_v63, %s6731_s6  ;;  %753 = vrot.lane.b32.xlu0 %v675_v0, %s6730_s4  ;;  %v327_v63 = vld [vmem:[%s8821_s2] sm:$0xff]  ;;  %v328_v0 = vld [vmem:[%s8821_s2 + $0x8] sm:$0xff] }
  0x51   : > { %6439 = vmatpush3.bf16.msra.mxu1 %v7063_v52 }
  0x54   : > { %847 = vrot.lane.b32.xlu1 %v699_v1, %s6731_s6  ;;  %755 = vrot.lane.b32.xlu0 %v676_v3, %s6730_s4  ;;  %v392_v1 = vld [vmem:[#allocation2 + $0x38] sm:$0xff] }
  0x58   : > { %849 = vrot.lane.b32.xlu1 %v700_v4, %s6731_s6  ;;  %757 = vrot.lane.b32.xlu0 %v677_v5, %s6730_s4 }
  0x5c   : > { %851 = vrot.lane.b32.xlu1 %v701_v6, %s6731_s6  ;;  %759 = vrot.lane.b32.xlu0 %v678_v7, %s6730_s4  ;;  %v1467_v7 = vld [vmem:[#allocation2 + $0x44] sm:$0xff] }
  0x60   : > { %853 = vrot.lane.b32.xlu1 %v702_v8, %s6731_s6  ;;  %761 = vrot.lane.b32.xlu0 %v679_v9, %s6730_s4  ;;  %v6321_v8 = vpack.c.bf16 %v328_v0, %v327_v63  ;;  %v418_v0 = vld [vmem:[#allocation2 + $0x51] sm:$0xff] }
  0x64   : > { %855 = vrot.lane.b32.xlu1 %v703_v10, %s6731_s6  ;;  %763 = vrot.lane.b32.xlu0 %v680_v11, %s6730_s4  ;;  %v329_v10 = vld [vmem:[%s8821_s2 + $0x10] sm:$0xff]  ;;  %v330_v11 = vld [vmem:[%s8821_s2 + $0x18] sm:$0xff] }
  0x68   : > { %857 = vrot.lane.b32.xlu1 %v704_v12, %s6731_s6  ;;  %765 = vrot.lane.b32.xlu0 %v681_v13, %s6730_s4  ;;  %v315_v12 = vld [vmem:[%s6922_s7 + $0x38] sm:$0xff]  ;;  %s234_s7 = sand.u32 1, %s6701_s13  }
  0x69   : > { %324 = vst.msk [vmem:[#allocation2 + $0xd0] sm:$0xff] %vm270_vm0, %v315_v12  ;;  %s5465_s9 = sshll.u32 %s234_s7, 7 }
  0x6a   : > { %s8667_s10 = scalar_lea.vmem [#allocation4], %s5465_s9 }
  0x6b   : > { %s5358_s27 = sshll.u32 %s8667_s10, 4  ;;  %s8759_s27 = int_to_ptr.vmem [resolvable:$true] %s5358_s27 }
  0x6c   : > { %859 = vrot.lane.b32.xlu1 %v705_v14, %s6731_s6  ;;  %767 = vrot.lane.b32.xlu0 %v682_v16, %s6730_s4  ;;  %v415_v14 = vld [vmem:[#allocation2 + $0x39] sm:$0xff]  ;;  %s6631_s29 = scalar_lea.vmem %s8759_s27, 2048  ;;  %p6638_p5 = scmp.lt.s32.totalorder %s8759_s27, %s6636_s24 }
  0x6d   : > { %p6632_p1 = scmp.ne.s32.totalorder %s8759_s27, %s6631_s29  ;;  %p6639_p6 = scmp.lt.s32.totalorder %s6637_s8, %s6631_s29 }
  0x6f   : > { %p6633_p2 = pnand %p6632_p1, %p6811_p3  ;;  %p6640_p7 = por %p6639_p6, %p6638_p5 }
  0x70   : > { %861 = vrot.lane.b32.xlu1 %v706_v17, %s6731_s6  ;;  %769 = vrot.lane.b32.xlu0 %v683_v18, %s6730_s4  ;;  %v1490_v18 = vld [vmem:[#allocation2 + $0x45] sm:$0xff] }
  0x71   : > { %p6634_p4 = pneg %p6633_p2 }
  0x73   : > { %p6641_p9 = pnand %p6640_p7, %p6634_p4 }
  0x74   : > { %863 = vrot.lane.b32.xlu1 %v707_v19, %s6731_s6  ;;  %771 = vrot.lane.b32.xlu0 %v684_v20, %s6730_s4  ;;  %v6324_v19 = vpack.c.bf16 %v330_v11, %v329_v10  ;;  %v331_v20 = vld [vmem:[%s8821_s2 + $0x20] sm:$0xff] }
  0x75   : > { %v1493_v11 = vld [vmem:[#allocation2 + $0x5d] sm:$0xff] }
  0x78   : > { %865 = vrot.lane.b32.xlu1 %v708_v21, %s6731_s6  ;;  %773 = vrot.lane.b32.xlu0 %v685_v22, %s6730_s4  ;;  %v332_v21 = vld [vmem:[%s8821_s2 + $0x28] sm:$0xff] }
  0x7c   : > { %867 = vrot.lane.b32.xlu1 %v709_v23, %s6731_s6  ;;  %775 = vrot.lane.b32.xlu0 %v686_v24, %s6730_s4  ;;  %v393_v23 = vld [vmem:[#allocation2 + $0x40] sm:$0xff] }
  0x80   : > { %869 = vrot.lane.b32.xlu1 %v710_v27, %s6731_s6  ;;  %777 = vrot.lane.b32.xlu0 %v687_v28, %s6730_s4  ;;  %v6327_v27 = vpack.c.bf16 %v332_v21, %v331_v20 }
  0x84   : > { %871 = vrot.lane.b32.xlu1 %v711_v33, %s6731_s6  ;;  %779 = vrot.lane.b32.xlu0 %v688_v34, %s6730_s4  ;;  %v416_v34 = vld [vmem:[#allocation2 + $0x41] sm:$0xff] }
  0x88   : > { %547 = vrot.lane.b32.xlu1 %v409_v38, %s6731_s6  ;;  %455 = vrot.lane.b32.xlu0 %v386_v39, %s6730_s4  ;;  %v1491_v38 = vld [vmem:[#allocation2 + $0x4d] sm:$0xff]  ;;  %v6330_v39 = vpack.c.bf16 %v334_v31, %v333_v30  ;;  %v397_v30 = vld [vmem:[#allocation2 + $0x60] sm:$0xff] }
  0x8c   : > { %549 = vrot.lane.b32.xlu1 %v410_v43, %s6731_s6  ;;  %457 = vrot.lane.b32.xlu0 %v387_v44, %s6730_s4  ;;  %v336_v43 = vld [vmem:[%s8821_s2 + $0x48] sm:$0xff] }
  0x8d   : > { %v6333_v51 = vpack.c.bf16 %v336_v43, %v335_v41  ;;  %v1495_v41 = vld [vmem:[#allocation2 + $0x6d] sm:$0xff] }
  0x90   : > { %551 = vrot.lane.b32.xlu1 %v411_v48, %s6731_s6  ;;  %459 = vrot.lane.b32.xlu0 %v388_v49, %s6730_s4 }
  0x94   : > { %553 = vrot.lane.b32.xlu1 %v412_v53, %s6731_s6  ;;  %461 = vrot.lane.b32.xlu0 %v389_v54, %s6730_s4  ;;  %v337_v54 = vld [vmem:[%s8821_s2 + $0x50] sm:$0xff] }
  0x98   : > { %555 = vrot.lane.b32.xlu1 %v413_v55, %s6731_s6  ;;  %463 = vrot.lane.b32.xlu0 %v390_v56, %s6730_s4 }
  0x9c   : > { %465 = vrot.lane.b32.xlu1 %v391_v57, %s6730_s4  ;;  %1537 = vrot.lane.b32.xlu0 %v1466_v58, %s6730_s4  ;;  %v417_v57 = vld [vmem:[#allocation2 + $0x49] sm:$0xff] }
  0x9e   : > { %v738_v61 = vpop.permute.xlu1 %737  ;;  %v736_v62 = vpop.permute.xlu0 %735 }
  0x9f   : > { %v897_v3 = vsel %vm270_vm0, %v412_v53, %v738_v61  ;;  %v896_v4 = vsel %vm270_vm0, %v411_v48, %v736_v62 }
  0xa0   : > { %557 = vrot.lane.b32.xlu1 %v414_v59, %s6731_s6  ;;  %1629 = vrot.lane.b32.xlu0 %v1489_v60, %s6731_s6  ;;  %v1492_v60 = vld [vmem:[#allocation2 + $0x55] sm:$0xff] }
  0xa2   : > { %v830_v5 = vpop.permute.xlu1 %829  ;;  %v828_v6 = vpop.permute.xlu0 %827 }
  0xa3   : > { %v919_v9 = vsel %vm639_vm2, %v896_v4, %v828_v6  ;;  %v920_v13 = vsel %vm639_vm2, %v897_v3, %v830_v5  ;;  %v1470_v5 = vld [vmem:[#allocation2 + $0x5c] sm:$0xff] }
  0xa4   : > { %5895 = vmatmul.mubr.msk.f32.vlgmr.msra.gmra.mrb[0].mxu0 %vm942_vm3, %v919_v9  ;;  %467 = vrot.lane.b32.xlu1 %v392_v1, %s6730_s4  ;;  %v395_v1 = vld [vmem:[#allocation2 + $0x50] sm:$0xff] }
  0xa5   : > { %1539 = vrot.lane.b32.xlu0 %v1467_v7, %s6730_s4  ;;  %5897 = vmatprep.mubr.msk.f32.mxu0 %vm6728_vm1, %v6729_v15 }
  0xa6   : > { %v832_v16 = vpop.permute.xlu1 %831  ;;  %v740_v17 = vpop.permute.xlu0 %739  ;;  %6322 = vmatpush3.bf16.msra.mxu0 %v6321_v8  ;;  %v419_v8 = vld [vmem:[#allocation2 + $0x59] sm:$0xff] }
  0xa7   : > { %6323 = vmatprep.subr.bf16.mxu0 %v6727_v2  ;;  %v898_v22 = vsel %vm270_vm0, %v413_v55, %v740_v17  ;;  %v338_v55 = vld [vmem:[%s8821_s2 + $0x58] sm:$0xff] }
  0xa8   : > { %5898 = vmatmul.mubr.msk.f32.gmra.mrb[2].mxu0 %vm942_vm3, %v920_v13  ;;  %559 = vrot.lane.b32.xlu1 %v415_v14, %s6731_s6  ;;  %v921_v28 = vsel %vm639_vm2, %v898_v22, %v832_v16  ;;  %v6336_v61 = vpack.c.bf16 %v338_v55, %v337_v54  ;;  %v396_v16 = vld [vmem:[#allocation2 + $0x58] sm:$0xff]  ;;  %v421_v22 = vld [vmem:[#allocation2 + $0x69] sm:$0xff] }
  0xa9   : > { %1631 = vrot.lane.b32.xlu0 %v1490_v18, %s6731_s6  ;;  %5900 = vmatprep.mubr.msk.f32.mxu0 %vm6728_vm1, %v6729_v15  ;;  %v7217_v54 = vld [vmem:[#allocation2 + $0x89] sm:$0xff] }
  0xaa   : > { %v834_v24 = vpop.permute.xlu1 %833  ;;  %v742_v25 = vpop.permute.xlu0 %741  ;;  %6325 = vmatpush3.bf16.msra.mxu0 %v6324_v19  ;;  %v1471_v19 = vld [vmem:[#allocation2 + $0x64] sm:$0xff] }
  0xab   : > { %6326 = vmatprep.subr.bf16.mxu0 %v6727_v2  ;;  %v899_v33 = vsel %vm270_vm0, %v414_v59, %v742_v25  ;;  %v1494_v25 = vld [vmem:[#allocation2 + $0x65] sm:$0xff] }
  0xac   : > { %5901 = vmatmul.mubr.msk.f32.gmra.mrb[4].mxu0 %vm942_vm3, %v921_v28  ;;  %469 = vrot.lane.b32.xlu1 %v393_v23, %s6730_s4  ;;  %v922_v40 = vsel %vm639_vm2, %v899_v33, %v834_v24  ;;  %v422_v28 = vld [vmem:[#allocation2 + $0x71] sm:$0xff] }
  0xad   : > { %1541 = vrot.lane.b32.xlu0 %v1468_v26, %s6730_s4  ;;  %5903 = vmatprep.mubr.msk.f32.mxu0 %vm6728_vm1, %v6729_v15 }
  0xae   : > { %v836_v35 = vpop.permute.xlu1 %835  ;;  %v744_v36 = vpop.permute.xlu0 %743  ;;  %6328 = vmatpush3.bf16.msra.mxu0 %v6327_v27 }
  0xaf   : > { %6329 = vmatprep.subr.bf16.mxu0 %v6727_v2  ;;  %v900_v44 = vsel %vm270_vm0, %v415_v14, %v744_v36  ;;  %v420_v14 = vld [vmem:[#allocation2 + $0x61] sm:$0xff] }
  0xb0   : > { %5904 = vmatmul.mubr.msk.f32.gmra.mrb[6].mxu0 %vm942_vm3, %v922_v40  ;;  %561 = vrot.lane.b32.xlu1 %v416_v34, %s6731_s6  ;;  %v923_v53 = vsel %vm639_vm2, %v900_v44, %v836_v35 }
  0xb1   : > { %1633 = vrot.lane.b32.xlu0 %v1491_v38, %s6731_s6  ;;  %5906 = vmatprep.mubr.msk.f32.mxu0 %vm6728_vm1, %v6729_v15  ;;  %v7197_v38 = vld [vmem:[#allocation2 + $0x79] sm:$0xff] }
  0xb2   : > { %v838_v48 = vpop.permute.xlu1 %837  ;;  %v746_v49 = vpop.permute.xlu0 %745  ;;  %6331 = vmatpush3.bf16.msra.mxu0 %v6330_v39 }
  0xb3   : > { %6332 = vmatprep.subr.bf16.mxu0 %v6727_v2  ;;  %v901_v56 = vsel %vm270_vm0, %v416_v34, %v746_v49  ;;  %v1472_v34 = vld [vmem:[#allocation2 + $0x6c] sm:$0xff] }
  0xb4   : > { %5907 = vmatmul.mubr.msk.f32.gmra.mrb[8].mxu0 %vm942_vm3, %v923_v53  ;;  %471 = vrot.lane.b32.xlu1 %v394_v46, %s6730_s4  ;;  %v924_v62 = vsel %vm639_vm2, %v901_v56, %v838_v48  ;;  %v398_v46 = vld [vmem:[#allocation2 + $0x68] sm:$0xff] }
  0xb5   : > { %1543 = vrot.lane.b32.xlu0 %v1469_v50, %s6730_s4  ;;  %5909 = vmatprep.mubr.msk.f32.mxu0 %vm6728_vm1, %v6729_v15  ;;  %v1473_v50 = vld [vmem:[#allocation2 + $0x74] sm:$0xff] }
  0xb6   : > { %v840_v58 = vpop.permute.xlu1 %839  ;;  %v748_v59 = vpop.permute.xlu0 %747  ;;  %6334 = vmatpush3.bf16.msra.mxu0 %v6333_v51 }
  0xb7   : > { %6335 = vmatprep.subr.bf16.mxu0 %v6727_v2  ;;  %v902_v63 = vsel %vm270_vm0, %v417_v57, %v748_v59 }
  0xb8   : > { %5910 = vmatmul.mubr.msk.f32.gmra.mrb[10].mxu0 %vm942_vm3, %v924_v62  ;;  %563 = vrot.lane.b32.xlu1 %v417_v57, %s6731_s6  ;;  %v925_v6 = vsel %vm639_vm2, %v902_v63, %v840_v58  ;;  %v1496_v57 = vld [vmem:[#allocation2 + $0x75] sm:$0xff] }
  0xb9   : > { %1635 = vrot.lane.b32.xlu0 %v1492_v60, %s6731_s6  ;;  %5912 = vmatprep.mubr.msk.f32.mxu0 %vm6728_vm1, %v6729_v15  ;;  %v7227_v60 = vld [vmem:[#allocation2 + $0x91] sm:$0xff] }
  0xba   : > { %v842_v3 = vpop.permute.xlu1 %841  ;;  %v750_v4 = vpop.permute.xlu0 %749  ;;  %6337 = vmatpush3.bf16.msra.mxu0 %v6336_v61  ;;  %v399_v61 = vld [vmem:[#allocation2 + $0x70] sm:$0xff] }
  0xbb   : > { %6338 = vmatprep.subr.bf16.mxu0 %v6727_v2  ;;  %v903_v7 = vsel %vm270_vm0, %v418_v0, %v750_v4  ;;  %v7237_v4 = vld [vmem:[#allocation2 + $0x99] sm:$0xff] }
  0xbc   : > { %5913 = vmatmul.mubr.msk.f32.gmra.mrb[12].mxu0 %vm942_vm3, %v925_v6  ;;  %473 = vrot.lane.b32.xlu1 %v395_v1, %s6730_s4  ;;  %v926_v12 = vsel %vm639_vm2, %v903_v7, %v842_v3  ;;  %v1497_v7 = vld [vmem:[#allocation2 + $0x7d] sm:$0xff] }
  0xbd   : > { %1545 = vrot.lane.b32.xlu0 %v1470_v5, %s6730_s4  ;;  %5915 = vmatprep.mubr.msk.f32.mxu0 %vm6728_vm1, %v6729_v15 }
  0xbe   : > { %v844_v9 = vpop.permute.xlu1 %843  ;;  %v752_v10 = vpop.permute.xlu0 %751 }
  0xbf   : > { %v904_v13 = vsel %vm270_vm0, %v419_v8, %v752_v10  ;;  %v7247_v10 = vld [vmem:[#allocation2 + $0xa1] sm:$0xff] }
  0xc0   : > { %5916 = vmatmul.mubr.msk.f32.gmra.mrb[14].mxu0 %vm942_vm3, %v926_v12  ;;  %565 = vrot.lane.b32.xlu1 %v418_v0, %s6731_s6  ;;  %v927_v20 = vsel %vm639_vm2, %v904_v13, %v844_v9  ;;  %v1474_v0 = vld [vmem:[#allocation2 + $0x7c] sm:$0xff] }
  0xc1   : > { %1637 = vrot.lane.b32.xlu0 %v1493_v11, %s6731_s6  ;;  %5918 = vmatprep.mubr.msk.f32.mxu0 %vm6728_vm1, %v6729_v15  ;;  %v400_v11 = vld [vmem:[#allocation2 + $0x78] sm:$0xff] }
  0xc2   : > { %v846_v17 = vpop.permute.xlu1 %845  ;;  %v754_v18 = vpop.permute.xlu0 %753 }
  0xc3   : > { %v905_v21 = vsel %vm270_vm0, %v420_v14, %v754_v18  ;;  %v7257_v18 = vld [vmem:[#allocation2 + $0xa9] sm:$0xff] }
  0xc4   : > { %5919 = vmatmul.mubr.msk.f32.gmra.mrb[16].mxu0 %vm942_vm3, %v927_v20  ;;  %475 = vrot.lane.b32.xlu1 %v396_v16, %s6730_s4  ;;  %v928_v26 = vsel %vm639_vm2, %v905_v21, %v846_v17  ;;  %v1498_v21 = vld [vmem:[#allocation2 + $0x85] sm:$0xff] }
  0xc5   : > { %1547 = vrot.lane.b32.xlu0 %v1471_v19, %s6730_s4  ;;  %5921 = vmatprep.mubr.msk.f32.mxu0 %vm6728_vm1, %v6729_v15 }
  0xc6   : > { %v848_v23 = vpop.permute.xlu1 %847  ;;  %v756_v24 = vpop.permute.xlu0 %755 }
  0xc7   : > { %v906_v27 = vsel %vm270_vm0, %v421_v22, %v756_v24  ;;  %v7268_v24 = vld [vmem:[#allocation2 + $0xb1] sm:$0xff] }
  0xc8   : > { %5922 = vmatmul.mubr.msk.f32.gmra.mrb[18].mxu0 %vm942_vm3, %v928_v26  ;;  %567 = vrot.lane.b32.xlu1 %v419_v8, %s6731_s6  ;;  %v929_v35 = vsel %vm639_vm2, %v906_v27, %v848_v23 }
  0xc9   : > { %1639 = vrot.lane.b32.xlu0 %v1494_v25, %s6731_s6  ;;  %5924 = vmatprep.mubr.msk.f32.mxu0 %vm6728_vm1, %v6729_v15  ;;  %v401_v25 = vld [vmem:[#allocation2 + $0x80] sm:$0xff] }
  0xca   : > { %v850_v31 = vpop.permute.xlu1 %849  ;;  %v758_v33 = vpop.permute.xlu0 %757 }
  0xcb   : > { %v907_v36 = vsel %vm270_vm0, %v422_v28, %v758_v33  ;;  %v663_v33 = vld [vmem:[#allocation2 + $0xb9] sm:$0xff] }
  0xcc   : > { %5925 = vmatmul.mubr.msk.f32.gmra.mrb[20].mxu0 %vm942_vm3, %v929_v35  ;;  %477 = vrot.lane.b32.xlu1 %v397_v30, %s6730_s4  ;;  %v930_v43 = vsel %vm639_vm2, %v907_v36, %v850_v31  ;;  %v1499_v36 = vld [vmem:[#allocation2 + $0x8d] sm:$0xff] }
  0xcd   : > { %1549 = vrot.lane.b32.xlu0 %v1472_v34, %s6730_s4  ;;  %5927 = vmatprep.mubr.msk.f32.mxu0 %vm6728_vm1, %v6729_v15 }
  0xce   : > { %v852_v39 = vpop.permute.xlu1 %851  ;;  %v760_v40 = vpop.permute.xlu0 %759 }
  0xcf   : > { %v908_v44 = vsel %vm270_vm0, %v7197_v38, %v760_v40  ;;  %v664_v40 = vld [vmem:[#allocation2 + $0xc1] sm:$0xff] }
  0xd0   : > { %5928 = vmatmul.mubr.msk.f32.gmra.mrb[22].mxu0 %vm942_vm3, %v930_v43  ;;  %569 = vrot.lane.b32.xlu1 %v420_v14, %s6731_s6  ;;  %v931_v51 = vsel %vm639_vm2, %v908_v44, %v852_v39  ;;  %v1475_v14 = vld [vmem:[#allocation2 + $0x84] sm:$0xff] }
  0xd1   : > { %1641 = vrot.lane.b32.xlu0 %v1495_v41, %s6731_s6  ;;  %5930 = vmatprep.mubr.msk.f32.mxu0 %vm6728_vm1, %v6729_v15  ;;  %v402_v41 = vld [vmem:[#allocation2 + $0x88] sm:$0xff] }
  0xd2   : > { %v854_v48 = vpop.permute.xlu1 %853  ;;  %v762_v49 = vpop.permute.xlu0 %761 }
  0xd3   : > { %v909_v53 = vsel %vm270_vm0, %v7207_v45, %v762_v49 }
  0xd4   : > { %5931 = vmatmul.mubr.msk.f32.gmra.mrb[24].mxu0 %vm942_vm3, %v931_v51  ;;  %479 = vrot.lane.b32.xlu1 %v398_v46, %s6730_s4  ;;  %v932_v58 = vsel %vm639_vm2, %v909_v53, %v854_v48  ;;  %v1477_v46 = vld [vmem:[#allocation2 + $0x94] sm:$0xff] }
  0xd5   : > { %1551 = vrot.lane.b32.xlu0 %v1473_v50, %s6730_s4  ;;  %5933 = vmatprep.mubr.msk.f32.mxu0 %vm6728_vm1, %v6729_v15  ;;  %v1500_v53 = vld [vmem:[#allocation2 + $0x95] sm:$0xff] }
  0xd6   : > { %v856_v55 = vpop.permute.xlu1 %855  ;;  %v764_v56 = vpop.permute.xlu0 %763 }
  0xd7   : > { %v910_v59 = vsel %vm270_vm0, %v7217_v54, %v764_v56 }
  0xd8   : > { %5934 = vmatmul.mubr.msk.f32.gmra.mrb[26].mxu0 %vm942_vm3, %v932_v58  ;;  %571 = vrot.lane.b32.xlu1 %v421_v22, %s6731_s6  ;;  %v933_v1 = vsel %vm639_vm2, %v910_v59, %v856_v55  ;;  %v403_v58 = vld [vmem:[#allocation2 + $0x90] sm:$0xff] }
  0xd9   : > { %1643 = vrot.lane.b32.xlu0 %v1496_v57, %s6731_s6  ;;  %5936 = vmatprep.mubr.msk.f32.mxu0 %vm6728_vm1, %v6729_v15  ;;  %v363_v57 = vld [vmem:[#allocation2 + $0x7] sm:$0xff] }
  0xda   : > { %v858_v62 = vpop.permute.xlu1 %857  ;;  %v766_v63 = vpop.permute.xlu0 %765 }
  0xdb   : > { %v911_v3 = vsel %vm270_vm0, %v7227_v60, %v766_v63 }
  0xdc   : > { %5937 = vmatmul.mubr.msk.f32.gmra.mrb[28].mxu0 %vm942_vm3, %v933_v1  ;;  %481 = vrot.lane.b32.xlu1 %v399_v61, %s6730_s4  ;;  %v934_v8 = vsel %vm639_vm2, %v911_v3, %v858_v62  ;;  %v1478_v62 = vld [vmem:[#allocation2 + $0x9c] sm:$0xff] }
  0xdd   : > { %1553 = vrot.lane.b32.xlu0 %v1474_v0, %s6730_s4  ;;  %5939 = vmatprep.mubr.msk.f32.mxu0 %vm6728_vm1, %v6729_v15 }
  0xde   : > { %v860_v5 = vpop.permute.xlu1 %859  ;;  %v768_v6 = vpop.permute.xlu0 %767 }
  0xdf   : > { %v912_v9 = vsel %vm270_vm0, %v7237_v4, %v768_v6 }
  0xe0   : > { %5940 = vmatmul.mubr.msk.f32.gmra.mrb[30].mxu0 %vm942_vm3, %v934_v8  ;;  %573 = vrot.lane.b32.xlu1 %v422_v28, %s6731_s6  ;;  %v935_v16 = vsel %vm639_vm2, %v912_v9, %v860_v5  ;;  %v1476_v28 = vld [vmem:[#allocation2 + $0x8c] sm:$0xff]  ;;  %v1501_v5 = vld [vmem:[#allocation2 + $0x9d] sm:$0xff] }
  0xe1   : > { %1645 = vrot.lane.b32.xlu0 %v1497_v7, %s6731_s6  ;;  %5942 = vmatprep.mubr.msk.f32.mxu0 %vm6728_vm1, %v6729_v15  ;;  %v365_v8 = vld [vmem:[#allocation2 + $0x17] sm:$0xff] }
  0xe2   : > { %v862_v12 = vpop.permute.xlu1 %861  ;;  %v770_v13 = vpop.permute.xlu0 %769  ;;  %v404_v9 = vld [vmem:[#allocation2 + $0x98] sm:$0xff] }
  0xe3   : > { %v913_v17 = vsel %vm270_vm0, %v7247_v10, %v770_v13  ;;  %v1479_v13 = vld [vmem:[#allocation2 + $0xa4] sm:$0xff] }
  0xe4   : > { %5943 = vmatmul.mubr.msk.f32.gmra.mrb[32].mxu0 %vm942_vm3, %v935_v16  ;;  %483 = vrot.lane.b32.xlu1 %v400_v11, %s6730_s4  ;;  %v936_v22 = vsel %vm639_vm2, %v913_v17, %v862_v12  ;;  %v366_v16 = vld [vmem:[#allocation2 + $0x1f] sm:$0xff] }
  0xe5   : > { %1555 = vrot.lane.b32.xlu0 %v1475_v14, %s6730_s4  ;;  %5945 = vmatprep.mubr.msk.f32.mxu0 %vm6728_vm1, %v6729_v15 }
  0xe6   : > { %v864_v19 = vpop.permute.xlu1 %863  ;;  %v772_v20 = vpop.permute.xlu0 %771 }
  0xe7   : > { %v914_v23 = vsel %vm270_vm0, %v7257_v18, %v772_v20  ;;  %v1502_v20 = vld [vmem:[#allocation2 + $0xa5] sm:$0xff] }
  0xe8   : > { %5946 = vmatmul.mubr.msk.f32.gmra.mrb[34].mxu0 %vm942_vm3, %v936_v22  ;;  %575 = vrot.lane.b32.xlu1 %v7197_v38, %s6731_s6  ;;  %v937_v30 = vsel %vm639_vm2, %v914_v23, %v864_v19  ;;  %v367_v22 = vld [vmem:[#allocation2 + $0x27] sm:$0xff] }
  0xe9   : > { %1647 = vrot.lane.b32.xlu0 %v1498_v21, %s6731_s6  ;;  %5948 = vmatprep.mubr.msk.f32.mxu0 %vm6728_vm1, %v6729_v15  ;;  %v405_v23 = vld [vmem:[#allocation2 + $0xa0] sm:$0xff] }
  0xea   : > { %v866_v26 = vpop.permute.xlu1 %865  ;;  %v774_v27 = vpop.permute.xlu0 %773 }
  0xeb   : > { %v915_v31 = vsel %vm270_vm0, %v7268_v24, %v774_v27 }
  0xec   : > { %5949 = vmatmul.mubr.msk.f32.gmra.mrb[36].mxu0 %vm942_vm3, %v937_v30  ;;  %485 = vrot.lane.b32.xlu1 %v401_v25, %s6730_s4  ;;  %v938_v38 = vsel %vm639_vm2, %v915_v31, %v866_v26  ;;  %v1480_v26 = vld [vmem:[#allocation2 + $0xac] sm:$0xff] }
  0xed   : > { %1557 = vrot.lane.b32.xlu0 %v1476_v28, %s6730_s4  ;;  %5951 = vmatprep.mubr.msk.f32.mxu0 %vm6728_vm1, %v6729_v15  ;;  %v368_v28 = vld [vmem:[#allocation2 + $0x2f] sm:$0xff] }
  0xee   : > { %v868_v34 = vpop.permute.xlu1 %867  ;;  %v776_v35 = vpop.permute.xlu0 %775 }
  0xef   : > { %v916_v39 = vsel %vm270_vm0, %v663_v33, %v776_v35  ;;  %v1503_v33 = vld [vmem:[#allocation2 + $0xad] sm:$0xff] }
  0xf0   : > { %5952 = vmatmul.mubr.msk.f32.gmra.mrb[38].mxu0 %vm942_vm3, %v938_v38  ;;  %577 = vrot.lane.b32.xlu1 %v7207_v45, %s6731_s6  ;;  %v939_v48 = vsel %vm639_vm2, %v916_v39, %v868_v34  ;;  %v665_v45 = vld [vmem:[#allocation2 + $0xc9] sm:$0xf] }
  0xf1   : > { %1649 = vrot.lane.b32.xlu0 %v1499_v36, %s6731_s6  ;;  %5954 = vmatprep.mubr.msk.f32.mxu0 %vm6728_vm1, %v6729_v15  ;;  %v406_v36 = vld [vmem:[#allocation2 + $0xa8] sm:$0xff] }
  0xf2   : > { %v870_v43 = vpop.permute.xlu1 %869  ;;  %v778_v44 = vpop.permute.xlu0 %777 }
  0xf3   : > { %v917_v49 = vsel %vm270_vm0, %v664_v40, %v778_v44  ;;  %v1481_v40 = vld [vmem:[#allocation2 + $0xb4] sm:$0xff] }
  0xf4   : > { %5955 = vmatmul.mubr.msk.f32.gmra.mrb[40].mxu0 %vm942_vm3, %v939_v48  ;;  %487 = vrot.lane.b32.xlu1 %v402_v41, %s6730_s4  ;;  %v940_v55 = vsel %vm639_vm2, %v917_v49, %v870_v43  ;;  %v1444_v48 = vld [vmem:[#allocation2 + $0x43] sm:$0xff]  ;;  %v407_v49 = vld [vmem:[#allocation2 + $0xb0] sm:$0xff] }
  0xf5   : > { %1559 = vrot.lane.b32.xlu0 %v1477_v46, %s6730_s4  ;;  %5957 = vmatprep.mubr.msk.f32.mxu0 %vm6728_vm1, %v6729_v15  ;;  %v1504_v46 = vld [vmem:[#allocation2 + $0xb5] sm:$0xff] }
  0xf6   : > { %v872_v50 = vpop.permute.xlu1 %871  ;;  %v780_v51 = vpop.permute.xlu0 %779 }
  0xf7   : > { %v918_v56 = vsel %vm270_vm0, %v665_v45, %v780_v51 }
  0xf8   : > { %5958 = vmatmul.mubr.msk.f32.gmra.mrb[42].mxu0 %vm942_vm3, %v940_v55  ;;  %579 = vrot.lane.b32.xlu1 %v7217_v54, %s6731_s6  ;;  %v941_v63 = vsel %vm639_vm2, %v918_v56, %v872_v50  ;;  %v364_v54 = vld [vmem:[#allocation2 + $0xf] sm:$0xff]  ;;  %v1482_v50 = vld [vmem:[#allocation2 + $0xbc] sm:$0xff] }
  0xf9   : > { %1651 = vrot.lane.b32.xlu0 %v1500_v53, %s6731_s6  ;;  %5960 = vmatprep.mubr.msk.f32.mxu0 %vm6728_vm1, %v6729_v15 }
  0xfa   : > { %v548_v59 = vpop.permute.xlu1 %547  ;;  %v456_v61 = vpop.permute.xlu0 %455 }
  0xfb   : > { %v616_v0 = vsel %vm270_vm0, %v363_v57, %v456_v61  ;;  %v1505_v57 = vld [vmem:[#allocation2 + $0xbd] sm:$0xff]  ;;  %v1445_v61 = vld [vmem:[#allocation2 + $0x4b] sm:$0xff] }
  0xfc   : > { %5961 = vmatmul.mubr.msk.f32.gmra.mrb[44].mxu0 %vm942_vm3, %v941_v63  ;;  %489 = vrot.lane.b32.xlu1 %v403_v58, %s6730_s4  ;;  %v640_v6 = vsel %vm639_vm2, %v616_v0, %v548_v59  ;;  %v1483_v0 = vld [vmem:[#allocation2 + $0xc4] sm:$0xff] }
  0xfd   : > { %1561 = vrot.lane.b32.xlu0 %v1478_v62, %s6730_s4  ;;  %5987 = vmatprep.mubr.msk.f32.mxu0 %vm6728_vm1, %v6729_v15  ;;  %v408_v62 = vld [vmem:[#allocation2 + $0xb8] sm:$0xf] }
  0xfe   : > { %v550_v1 = vpop.permute.xlu1 %549  ;;  %v458_v3 = vpop.permute.xlu0 %457 }
  0xff   : > { %v617_v7 = vsel %vm270_vm0, %v364_v54, %v458_v3 }
 0x100   : > { %581 = vrot.lane.b32.xlu1 %v7227_v60, %s6731_s6  ;;  %5988 = vmatmul.mubr.msk.f32.vlgmr.msra.gmra.mrb[0].mxu0 %vm942_vm3, %v640_v6  ;;  %v641_v14 = vsel %vm639_vm2, %v617_v7, %v550_v1  ;;  %v431_v6 = vld [vmem:[#allocation2 + $0xb9] sm:$0xf] }
 0x101   : > { %1653 = vrot.lane.b32.xlu0 %v1501_v5, %s6731_s6  ;;  %5990 = vmatprep.mubr.msk.f32.mxu0 %vm6728_vm1, %v6729_v15 }
 0x102   : > { %v552_v11 = vpop.permute.xlu1 %551  ;;  %v460_v12 = vpop.permute.xlu0 %459  ;;  %6340 = vmatpush3.bf16.msra.mxu0 %v7004_v29 }
 0x103   : > { %6341 = vmatprep.subr.bf16.mxu0 %v6727_v2  ;;  %v618_v60 = vsel %vm270_vm0, %v365_v8, %v460_v12  ;;  %v1506_v8 = vld [vmem:[#allocation2 + $0xc5] sm:$0xff]  ;;  %v1446_v12 = vld [vmem:[#allocation2 + $0x53] sm:$0xff] }
 0x104   : > { %491 = vrot.lane.b32.xlu1 %v404_v9, %s6730_s4  ;;  %5991 = vmatmul.mubr.msk.f32.gmra.mrb[2].mxu0 %vm942_vm3, %v641_v14  ;;  %v642_v29 = vsel %vm639_vm2, %v618_v60, %v552_v11  ;;  %v1484_v60 = vld [vmem:[#allocation2 + $0xcc] sm:$0xff] }
 0x105   : > { %1563 = vrot.lane.b32.xlu0 %v1479_v13, %s6730_s4  ;;  %5993 = vmatprep.mubr.msk.f32.mxu0 %vm6728_vm1, %v6729_v15  ;;  %v1464_v13 = vld [vmem:[#allocation2 + $0x2c] sm:$0xff] }
 0x106   : > { %v554_v17 = vpop.permute.xlu1 %553  ;;  %v462_v19 = vpop.permute.xlu0 %461  ;;  %6343 = vmatpush3.bf16.msra.mxu0 %v7015_v32 }
 0x107   : > { %6344 = vmatprep.subr.bf16.mxu0 %v6727_v2  ;;  %v619_v21 = vsel %vm270_vm0, %v366_v16, %v462_v19 }
 0x108   : > { %583 = vrot.lane.b32.xlu1 %v7237_v4, %s6731_s6  ;;  %5994 = vmatmul.mubr.msk.f32.gmra.mrb[4].mxu0 %vm942_vm3, %v642_v29  ;;  %v643_v27 = vsel %vm639_vm2, %v619_v21, %v554_v17  ;;  %v372_v29 = vld [vmem:[#allocation2 + $0x4f] sm:$0xff] }
 0x109   : > { %1655 = vrot.lane.b32.xlu0 %v1502_v20, %s6731_s6  ;;  %5996 = vmatprep.mubr.msk.f32.mxu0 %vm6728_vm1, %v6729_v15  ;;  %v1487_v21 = vld [vmem:[#allocation2 + $0x2d] sm:$0xff] }
 0x10a   : > { %v556_v25 = vpop.permute.xlu1 %555  ;;  %v464_v32 = vpop.permute.xlu0 %463  ;;  %6346 = vmatpush3.bf16.msra.mxu0 %v7027_v37  ;;  %v1443_v37 = vld [vmem:[#allocation2 + $0x3b] sm:$0xff] }
 0x10b   : > { %6347 = vmatprep.subr.bf16.mxu0 %v6727_v2  ;;  %v620_v4 = vsel %vm270_vm0, %v367_v22, %v464_v32 }
 0x10c   : > { %493 = vrot.lane.b32.xlu1 %v405_v23, %s6730_s4  ;;  %5997 = vmatmul.mubr.msk.f32.gmra.mrb[6].mxu0 %vm942_vm3, %v643_v27  ;;  %v644_v34 = vsel %vm639_vm2, %v620_v4, %v556_v25  ;;  %v1507_v23 = vld [vmem:[#allocation2 + $0xcd] sm:$0xff]  ;;  %v1488_v27 = vld [vmem:[#allocation2 + $0x35] sm:$0xff] }
 0x10d   : > { %1565 = vrot.lane.b32.xlu0 %v1480_v26, %s6730_s4  ;;  %5999 = vmatprep.mubr.msk.f32.mxu0 %vm6728_vm1, %v6729_v15  ;;  %v1447_v26 = vld [vmem:[#allocation2 + $0x5b] sm:$0xff] }
 0x10e   : > { %v466_v30 = vpop.permute.xlu1 %465  ;;  %v1538_v31 = vpop.permute.xlu0 %1537  ;;  %6349 = vmatpush3.bf16.msra.mxu0 %v7039_v42 }
 0x10f   : > { %6350 = vmatprep.subr.bf16.mxu0 %v6727_v2  ;;  %v621_v35 = vsel %vm270_vm0, %v368_v28, %v466_v30  ;;  %v1696_v42 = vsel %vm270_vm0, %v1443_v37, %v1538_v31  ;;  %v1465_v28 = vld [vmem:[#allocation2 + $0x34] sm:$0xff] }
 0x110   : > { %585 = vrot.lane.b32.xlu1 %v7247_v10, %s6731_s6  ;;  %6000 = vmatmul.mubr.msk.f32.gmra.mrb[8].mxu0 %vm942_vm3, %v644_v34  ;;  %v369_v10 = vld [vmem:[#allocation2 + $0x37] sm:$0xff] }
 0x111   : > { %1657 = vrot.lane.b32.xlu0 %v1503_v33, %s6731_s6  ;;  %6002 = vmatprep.mubr.msk.f32.mxu0 %vm6728_vm1, %v6729_v15  ;;  %v373_v34 = vld [vmem:[#allocation2 + $0x57] sm:$0xff] }
 0x112   : > { %v558_v38 = vpop.permute.xlu1 %557  ;;  %v1630_v39 = vpop.permute.xlu0 %1629  ;;  %6352 = vmatpush3.bf16.msra.mxu0 %v7051_v47 }
 0x113   : > { %v645_v41 = vsel %vm639_vm2, %v621_v35, %v558_v38  ;;  %v1719_v43 = vsel %vm639_vm2, %v1696_v42, %v1630_v39  ;;  %6353 = vmatprep.subr.bf16.mxu0 %v6727_v2  ;;  %v1508_v35 = vld [vmem:[#allocation2 + $0xd5] sm:$0xff]  ;;  %v1448_v42 = vld [vmem:[#allocation2 + $0x63] sm:$0xff] }
 0x114   : > { %495 = vrot.lane.b32.xlu1 %v406_v36, %s6730_s4  ;;  %6003 = vmatmul.mubr.msk.f32.gmra.mrb[10].mxu0 %vm942_vm3, %v645_v41  ;;  %v1485_v38 = vld [vmem:[#allocation2 + $0xd4] sm:$0xff] }
 0x115   : > { %1567 = vrot.lane.b32.xlu0 %v1481_v40, %s6730_s4  ;;  %6087 = vmatmul.mubr.msk.f32.vlgmr.msra.gmra.mrb[0].mxu1 %vm942_vm3, %v1719_v43  ;;  %v1509_v43 = vld [vmem:[#allocation2 + $0xdd] sm:$0xf] }
 0x116   : > { %v468_v44 = vpop.permute.xlu1 %467  ;;  %6005 = vmatprep.mubr.msk.f32.mxu0 %vm6728_vm1, %v6729_v15  ;;  %6089 = vmatprep.mubr.msk.f32.mxu1 %vm6728_vm1, %v6729_v15 }
 0x117   : > { %v1540_v47 = vpop.permute.xlu0 %1539  ;;  %6355 = vmatpush3.bf16.msra.mxu0 %v7063_v52  ;;  %v622_v2 = vsel %vm270_vm0, %v369_v10, %v468_v44  ;;  %v370_v52 = vld [vmem:[#allocation2 + $0x3f] sm:$0xff] }
 0x118   : > { %587 = vrot.lane.b32.xlu1 %v7257_v18, %s6731_s6  ;;  %v1697_v51 = vsel %vm270_vm0, %v1444_v48, %v1540_v47  ;;  %v1486_v44 = vld [vmem:[#allocation2 + $0xdc] sm:$0xf] }
 0x119   : > { %1659 = vrot.lane.b32.xlu0 %v1504_v46, %s6731_s6  ;;  %v374_v48 = vld [vmem:[#allocation2 + $0x5f] sm:$0xff] }
 0x11a   : > { %v560_v45 = vpop.permute.xlu1 %559 }
 0x11b   : > { %v646_v53 = vsel %vm639_vm2, %v622_v2, %v560_v45  ;;  %v1632_v55 = vpop.permute.xlu0 %1631  ;;  %v1449_v45 = vld [vmem:[#allocation2 + $0x6b] sm:$0xff] }
 0x11c   : > { %v1720_v56 = vsel %vm639_vm2, %v1697_v51, %v1632_v55  ;;  %497 = vrot.lane.b32.xlu1 %v407_v49, %s6730_s4  ;;  %6006 = vmatmul.mubr.msk.f32.gmra.mrb[12].mxu0 %vm942_vm3, %v646_v53 }
 0x11d   : > { %1569 = vrot.lane.b32.xlu0 %v1482_v50, %s6730_s4  ;;  %6090 = vmatmul.mubr.msk.f32.gmra.mrb[2].mxu1 %vm942_vm3, %v1720_v56 }
 0x11e   : > { %v470_v18 = vpop.permute.xlu1 %469  ;;  %6008 = vmatprep.mubr.msk.f32.mxu0 %vm6728_vm1, %v6729_v15  ;;  %6092 = vmatprep.mubr.msk.f32.mxu1 %vm6728_vm1, %v6729_v15 }
 0x11f   : > { %v1542_v58 = vpop.permute.xlu0 %1541  ;;  %v623_v59 = vsel %vm270_vm0, %v370_v52, %v470_v18 }
 0x120   : > { %589 = vrot.lane.b32.xlu1 %v7268_v24, %s6731_s6  ;;  %v1698_v54 = vsel %vm270_vm0, %v1445_v61, %v1542_v58  ;;  %v371_v24 = vld [vmem:[#allocation2 + $0x47] sm:$0xff] }
 0x121   : > { %1661 = vrot.lane.b32.xlu0 %v1505_v57, %s6731_s6  ;;  %v375_v57 = vld [vmem:[#allocation2 + $0x67] sm:$0xff] }
 0x122   : > { %v562_v63 = vpop.permute.xlu1 %561 }
 0x123   : > { %v647_v1 = vsel %vm639_vm2, %v623_v59, %v562_v63  ;;  %v1634_v3 = vpop.permute.xlu0 %1633  ;;  %v1450_v59 = vld [vmem:[#allocation2 + $0x73] sm:$0xff] }
 0x124   : > { %v1721_v5 = vsel %vm639_vm2, %v1698_v54, %v1634_v3  ;;  %499 = vrot.lane.b32.xlu1 %v408_v62, %s6730_s4  ;;  %6009 = vmatmul.mubr.msk.f32.gmra.mrb[14].mxu0 %vm942_vm3, %v647_v1 }
 0x125   : > { %1571 = vrot.lane.b32.xlu0 %v1483_v0, %s6730_s4  ;;  %6093 = vmatmul.mubr.msk.f32.gmra.mrb[4].mxu1 %vm942_vm3, %v1721_v5  ;;  %v376_v5 = vld [vmem:[#allocation2 + $0x6f] sm:$0xff] }
 0x126   : > { %v472_v7 = vpop.permute.xlu1 %471  ;;  %6011 = vmatprep.mubr.msk.f32.mxu0 %vm6728_vm1, %v6729_v15  ;;  %6095 = vmatprep.mubr.msk.f32.mxu1 %vm6728_vm1, %v6729_v15 }
 0x127   : > { %v1544_v9 = vpop.permute.xlu0 %1543  ;;  %v624_v11 = vsel %vm270_vm0, %v371_v24, %v472_v7 }
 0x128   : > { %591 = vrot.lane.b32.xlu1 %v431_v6, %s6731_s6  ;;  %v1699_v16 = vsel %vm270_vm0, %v1446_v12, %v1544_v9  ;;  %v1451_v6 = vld [vmem:[#allocation2 + $0x7b] sm:$0xff] }
 0x129   : > { %1663 = vrot.lane.b32.xlu0 %v1506_v8, %s6731_s6 }
 0x12a   : > { %v564_v14 = vpop.permute.xlu1 %563 }
 0x12b   : > { %v648_v17 = vsel %vm639_vm2, %v624_v11, %v564_v14  ;;  %v1636_v19 = vpop.permute.xlu0 %1635 }
 0x12c   : > { %v1722_v20 = vsel %vm639_vm2, %v1699_v16, %v1636_v19  ;;  %1533 = vrot.lane.b32.xlu1 %v1464_v13, %s6730_s4  ;;  %6012 = vmatmul.mubr.msk.f32.gmra.mrb[16].mxu0 %vm942_vm3, %v648_v17  ;;  %v1452_v17 = vld [vmem:[#allocation2 + $0x83] sm:$0xff] }
 0x12d   : > { %1573 = vrot.lane.b32.xlu0 %v1484_v60, %s6730_s4  ;;  %6096 = vmatmul.mubr.msk.f32.gmra.mrb[6].mxu1 %vm942_vm3, %v1722_v20  ;;  %v377_v60 = vld [vmem:[#allocation2 + $0x77] sm:$0xff] }
 0x12e   : > { %v474_v22 = vpop.permute.xlu1 %473  ;;  %6014 = vmatprep.mubr.msk.f32.mxu0 %vm6728_vm1, %v6729_v15  ;;  %6098 = vmatprep.mubr.msk.f32.mxu1 %vm6728_vm1, %v6729_v15 }
 0x12f   : > { %v1546_v25 = vpop.permute.xlu0 %1545  ;;  %v625_v32 = vsel %vm270_vm0, %v372_v29, %v474_v22 }
 0x130   : > { %1625 = vrot.lane.b32.xlu1 %v1487_v21, %s6731_s6  ;;  %v1700_v30 = vsel %vm270_vm0, %v1447_v26, %v1546_v25 }
 0x131   : > { %1665 = vrot.lane.b32.xlu0 %v1507_v23, %s6731_s6 }
 0x132   : > { %v566_v4 = vpop.permute.xlu1 %565 }
 0x133   : > { %v649_v31 = vsel %vm639_vm2, %v625_v32, %v566_v4  ;;  %v1638_v33 = vpop.permute.xlu0 %1637  ;;  %v378_v32 = vld [vmem:[#allocation2 + $0x7f] sm:$0xff] }
 0x134   : > { %v1723_v37 = vsel %vm639_vm2, %v1700_v30, %v1638_v33  ;;  %6015 = vmatmul.mubr.msk.f32.gmra.mrb[18].mxu0 %vm942_vm3, %v649_v31  ;;  %1627 = vrot.lane.b32.xlu1 %v1488_v27, %s6731_s6  ;;  %v1453_v27 = vld [vmem:[#allocation2 + $0x8b] sm:$0xff] }
 0x135   : > { %1535 = vrot.lane.b32.xlu0 %v1465_v28, %s6730_s4  ;;  %6099 = vmatmul.mubr.msk.f32.gmra.mrb[8].mxu1 %vm942_vm3, %v1723_v37 }
 0x136   : > { %v476_v36 = vpop.permute.xlu1 %475  ;;  %6017 = vmatprep.mubr.msk.f32.mxu0 %vm6728_vm1, %v6729_v15  ;;  %6101 = vmatprep.mubr.msk.f32.mxu1 %vm6728_vm1, %v6729_v15 }
 0x137   : > { %v1548_v39 = vpop.permute.xlu0 %1547  ;;  %v626_v40 = vsel %vm270_vm0, %v373_v34, %v476_v36 }
 0x138   : > { %1667 = vrot.lane.b32.xlu1 %v1508_v35, %s6731_s6  ;;  %v1701_v41 = vsel %vm270_vm0, %v1448_v42, %v1548_v39  ;;  %v379_v35 = vld [vmem:[#allocation2 + $0x87] sm:$0xff]  ;;  %v1454_v42 = vld [vmem:[#allocation2 + $0x93] sm:$0xff] }
 0x139   : > { %1575 = vrot.lane.b32.xlu0 %v1485_v38, %s6730_s4 }
 0x13a   : > { %v568_v10 = vpop.permute.xlu1 %567 }
 0x13b   : > { %v650_v46 = vsel %vm639_vm2, %v626_v40, %v568_v10  ;;  %v1640_v47 = vpop.permute.xlu0 %1639 }
 0x13c   : > { %v1724_v2 = vsel %vm639_vm2, %v1701_v41, %v1640_v47  ;;  %6018 = vmatmul.mubr.msk.f32.gmra.mrb[20].mxu0 %vm942_vm3, %v650_v46  ;;  %1669 = vrot.lane.b32.xlu1 %v1509_v43, %s6731_s6  ;;  %v380_v46 = vld [vmem:[#allocation2 + $0x8f] sm:$0xff] }
 0x13d   : > { %1577 = vrot.lane.b32.xlu0 %v1486_v44, %s6730_s4  ;;  %6102 = vmatmul.mubr.msk.f32.gmra.mrb[10].mxu1 %vm942_vm3, %v1724_v2  ;;  %v1455_v2 = vld [vmem:[#allocation2 + $0x9b] sm:$0xff] }
 0x13e   : > { %v478_v49 = vpop.permute.xlu1 %477  ;;  %6020 = vmatprep.mubr.msk.f32.mxu0 %vm6728_vm1, %v6729_v15  ;;  %6104 = vmatprep.mubr.msk.f32.mxu1 %vm6728_vm1, %v6729_v15 }
 0x13f   : > { %v1550_v50 = vpop.permute.xlu0 %1549  ;;  %v627_v51 = vsel %vm270_vm0, %v374_v48, %v478_v49 }
 0x140   : > { %v1702_v53 = vsel %vm270_vm0, %v1449_v45, %v1550_v50 }
 0x142   : > { %v570_v55 = vpop.permute.xlu1 %569 }
 0x143   : > { %v651_v56 = vsel %vm639_vm2, %v627_v51, %v570_v55  ;;  %v1642_v52 = vpop.permute.xlu0 %1641 }
 0x144   : > { %v1725_v18 = vsel %vm639_vm2, %v1702_v53, %v1642_v52  ;;  %6021 = vmatmul.mubr.msk.f32.gmra.mrb[22].mxu0 %vm942_vm3, %v651_v56  ;;  %v381_v56 = vld [vmem:[#allocation2 + $0x97] sm:$0xff] }
 0x145   : > { %6105 = vmatmul.mubr.msk.f32.gmra.mrb[12].mxu1 %vm942_vm3, %v1725_v18  ;;  %6023 = vmatprep.mubr.msk.f32.mxu0 %vm6728_vm1, %v6729_v15  ;;  %v1456_v18 = vld [vmem:[#allocation2 + $0xa3] sm:$0xff] }
 0x146   : > { %v480_v58 = vpop.permute.xlu1 %479  ;;  %6107 = vmatprep.mubr.msk.f32.mxu1 %vm6728_vm1, %v6729_v15 }
 0x147   : > { %v1552_v61 = vpop.permute.xlu0 %1551  ;;  %v628_v62 = vsel %vm270_vm0, %v375_v57, %v480_v58 }
 0x148   : > { %v1703_v63 = vsel %vm270_vm0, %v1450_v59, %v1552_v61 }
 0x14a   : > { %v572_v0 = vpop.permute.xlu1 %571 }
 0x14b   : > { %v652_v54 = vsel %vm639_vm2, %v628_v62, %v572_v0  ;;  %v1644_v1 = vpop.permute.xlu0 %1643 }
 0x14c   : > { %v1726_v3 = vsel %vm639_vm2, %v1703_v63, %v1644_v1  ;;  %6024 = vmatmul.mubr.msk.f32.gmra.mrb[24].mxu0 %vm942_vm3, %v652_v54  ;;  %v382_v54 = vld [vmem:[#allocation2 + $0x9f] sm:$0xff] }
 0x14d   : > { %6108 = vmatmul.mubr.msk.f32.gmra.mrb[14].mxu1 %vm942_vm3, %v1726_v3  ;;  %6026 = vmatprep.mubr.msk.f32.mxu0 %vm6728_vm1, %v6729_v15  ;;  %v1457_v3 = vld [vmem:[#allocation2 + $0xab] sm:$0xff] }
 0x14e   : > { %v482_v24 = vpop.permute.xlu1 %481  ;;  %6110 = vmatprep.mubr.msk.f32.mxu1 %vm6728_vm1, %v6729_v15 }
 0x14f   : > { %v1554_v7 = vpop.permute.xlu0 %1553  ;;  %v629_v8 = vsel %vm270_vm0, %v376_v5, %v482_v24 }
 0x150   : > { %v1704_v9 = vsel %vm270_vm0, %v1451_v6, %v1554_v7 }
 0x152   : > { %v574_v11 = vpop.permute.xlu1 %573 }
 0x153   : > { %v653_v12 = vsel %vm639_vm2, %v629_v8, %v574_v11  ;;  %v1646_v13 = vpop.permute.xlu0 %1645 }
 0x154   : > { %v1727_v14 = vsel %vm639_vm2, %v1704_v9, %v1646_v13  ;;  %6027 = vmatmul.mubr.msk.f32.gmra.mrb[26].mxu0 %vm942_vm3, %v653_v12  ;;  %v383_v12 = vld [vmem:[#allocation2 + $0xa7] sm:$0xff] }
 0x155   : > { %6111 = vmatmul.mubr.msk.f32.gmra.mrb[16].mxu1 %vm942_vm3, %v1727_v14  ;;  %6029 = vmatprep.mubr.msk.f32.mxu0 %vm6728_vm1, %v6729_v15  ;;  %v1458_v14 = vld [vmem:[#allocation2 + $0xb3] sm:$0xff] }
 0x156   : > { %v484_v16 = vpop.permute.xlu1 %483  ;;  %6113 = vmatprep.mubr.msk.f32.mxu1 %vm6728_vm1, %v6729_v15 }
 0x157   : > { %v1556_v19 = vpop.permute.xlu0 %1555  ;;  %v630_v20 = vsel %vm270_vm0, %v377_v60, %v484_v16 }
 0x158   : > { %v1705_v29 = vsel %vm270_vm0, %v1452_v17, %v1556_v19 }
 0x15a   : > { %v576_v21 = vpop.permute.xlu1 %575 }
 0x15b   : > { %v654_v22 = vsel %vm639_vm2, %v630_v20, %v576_v21  ;;  %v1648_v23 = vpop.permute.xlu0 %1647 }
 0x15c   : > { %v1728_v25 = vsel %vm639_vm2, %v1705_v29, %v1648_v23  ;;  %6030 = vmatmul.mubr.msk.f32.gmra.mrb[28].mxu0 %vm942_vm3, %v654_v22  ;;  %v384_v22 = vld [vmem:[#allocation2 + $0xaf] sm:$0xff] }
 0x15d   : > { %6114 = vmatmul.mubr.msk.f32.gmra.mrb[18].mxu1 %vm942_vm3, %v1728_v25  ;;  %6032 = vmatprep.mubr.msk.f32.mxu0 %vm6728_vm1, %v6729_v15  ;;  %v1459_v25 = vld [vmem:[#allocation2 + $0xbb] sm:$0xff] }
 0x15e   : > { %v486_v26 = vpop.permute.xlu1 %485  ;;  %6116 = vmatprep.mubr.msk.f32.mxu1 %vm6728_vm1, %v6729_v15 }
 0x15f   : > { %v1558_v4 = vpop.permute.xlu0 %1557  ;;  %v631_v28 = vsel %vm270_vm0, %v378_v32, %v486_v26 }
 0x160   : > { %v1706_v30 = vsel %vm270_vm0, %v1453_v27, %v1558_v4 }
 0x162   : > { %v578_v31 = vpop.permute.xlu1 %577 }
 0x163   : > { %v655_v33 = vsel %vm639_vm2, %v631_v28, %v578_v31  ;;  %v1650_v37 = vpop.permute.xlu0 %1649 }
 0x164   : > { %v1729_v34 = vsel %vm639_vm2, %v1706_v30, %v1650_v37  ;;  %6033 = vmatmul.mubr.msk.f32.gmra.mrb[30].mxu0 %vm942_vm3, %v655_v33  ;;  %v385_v33 = vld [vmem:[#allocation2 + $0xb7] sm:$0xf] }
 0x165   : > { %6117 = vmatmul.mubr.msk.f32.gmra.mrb[20].mxu1 %vm942_vm3, %v1729_v34  ;;  %6035 = vmatprep.mubr.msk.f32.mxu0 %vm6728_vm1, %v6729_v15  ;;  %v1460_v34 = vld [vmem:[#allocation2 + $0xc3] sm:$0xff] }
 0x166   : > { %v488_v36 = vpop.permute.xlu1 %487  ;;  %6119 = vmatprep.mubr.msk.f32.mxu1 %vm6728_vm1, %v6729_v15 }
 0x167   : > { %v1560_v38 = vpop.permute.xlu0 %1559  ;;  %v632_v39 = vsel %vm270_vm0, %v379_v35, %v488_v36 }
 0x168   : > { %v1707_v40 = vsel %vm270_vm0, %v1454_v42, %v1560_v38 }
 0x16a   : > { %v580_v41 = vpop.permute.xlu1 %579 }
 0x16b   : > { %v656_v43 = vsel %vm639_vm2, %v632_v39, %v580_v41  ;;  %v1652_v10 = vpop.permute.xlu0 %1651 }
 0x16c   : > { %v1730_v44 = vsel %vm639_vm2, %v1707_v40, %v1652_v10  ;;  %6036 = vmatmul.mubr.msk.f32.gmra.mrb[32].mxu0 %vm942_vm3, %v656_v43  ;;  %v1441_v43 = vld [vmem:[#allocation2 + $0x2b] sm:$0xff] }
 0x16d   : > { %6120 = vmatmul.mubr.msk.f32.gmra.mrb[22].mxu1 %vm942_vm3, %v1730_v44  ;;  %6038 = vmatprep.mubr.msk.f32.mxu0 %vm6728_vm1, %v6729_v15  ;;  %v1461_v44 = vld [vmem:[#allocation2 + $0xcb] sm:$0xff] }
 0x16e   : > { %v490_v47 = vpop.permute.xlu1 %489  ;;  %6122 = vmatprep.mubr.msk.f32.mxu1 %vm6728_vm1, %v6729_v15 }
 0x16f   : > { %v1562_v48 = vpop.permute.xlu0 %1561  ;;  %v633_v49 = vsel %vm270_vm0, %v380_v46, %v490_v47 }
 0x170   : > { %v1708_v45 = vsel %vm270_vm0, %v1455_v2, %v1562_v48 }
 0x172   : > { %v582_v50 = vpop.permute.xlu1 %581 }
 0x173   : > { %v657_v51 = vsel %vm639_vm2, %v633_v49, %v582_v50  ;;  %v1654_v53 = vpop.permute.xlu0 %1653 }
 0x174   : > { %v1731_v55 = vsel %vm639_vm2, %v1708_v45, %v1654_v53  ;;  %6039 = vmatmul.mubr.msk.f32.gmra.mrb[34].mxu0 %vm942_vm3, %v657_v51  ;;  %v1442_v51 = vld [vmem:[#allocation2 + $0x33] sm:$0xff] }
 0x175   : > { %6123 = vmatmul.mubr.msk.f32.gmra.mrb[24].mxu1 %vm942_vm3, %v1731_v55  ;;  %6041 = vmatprep.mubr.msk.f32.mxu0 %vm6728_vm1, %v6729_v15 }
 0x176   : > { %v492_v52 = vpop.permute.xlu1 %491  ;;  %6125 = vmatprep.mubr.msk.f32.mxu1 %vm6728_vm1, %v6729_v15 }
 0x177   : > { %v1564_v57 = vpop.permute.xlu0 %1563  ;;  %v634_v58 = vsel %vm270_vm0, %v381_v56, %v492_v52 }
 0x178   : > { %v1709_v59 = vsel %vm270_vm0, %v1456_v18, %v1564_v57  ;;  %v1462_v18 = vld [vmem:[#allocation2 + $0xd3] sm:$0xff] }
 0x17a   : > { %v584_v61 = vpop.permute.xlu1 %583 }
 0x17b   : > { %v658_v62 = vsel %vm639_vm2, %v634_v58, %v584_v61  ;;  %v1656_v63 = vpop.permute.xlu0 %1655 }
 0x17c   : > { %v1732_v0 = vsel %vm639_vm2, %v1709_v59, %v1656_v63  ;;  %6042 = vmatmul.mubr.msk.f32.gmra.mrb[36].mxu0 %vm942_vm3, %v658_v62  ;;  %v1463_v62 = vld [vmem:[#allocation2 + $0xdb] sm:$0xf] }
 0x17d   : > { %6126 = vmatmul.mubr.msk.f32.gmra.mrb[26].mxu1 %vm942_vm3, %v1732_v0  ;;  %6044 = vmatprep.mubr.msk.f32.mxu0 %vm6728_vm1, %v6729_v15 }
 0x17e   : > { %v494_v1 = vpop.permute.xlu1 %493  ;;  %6128 = vmatprep.mubr.msk.f32.mxu1 %vm6728_vm1, %v6729_v15 }
 0x17f   : > { %v1566_v5 = vpop.permute.xlu0 %1565  ;;  %v635_v24 = vsel %vm270_vm0, %v382_v54, %v494_v1 }
 0x180   : > { %v1710_v6 = vsel %vm270_vm0, %v1457_v3, %v1566_v5  ;;  %v2012_v3 = vlaneseq }
 0x182   : > { %v586_v7 = vpop.permute.xlu1 %585  ;;  %v7584_v5 = vshrl.u32 %v2012_v3, 7 }
 0x183   : > { %v659_v8 = vsel %vm639_vm2, %v635_v24, %v586_v7  ;;  %v1658_v9 = vpop.permute.xlu0 %1657  ;;  %v7586_v24 = vstv %s5540_s11  ;;  %s5674_s11 = sshll.u32 %s6709_s15, 4 }
 0x184   : > { %v1733_v11 = vsel %vm639_vm2, %v1710_v6, %v1658_v9  ;;  %6045 = vmatmul.mubr.msk.f32.gmra.mrb[38].mxu0 %vm942_vm3, %v659_v8  ;;  %v7589_v6 = vadd.s32 16, %v7584_v5  ;;  %v2019_v7 = vadd.s32 1, %v7586_v24  ;;  %vm2037_vm5 = vcmp.ge.s32.totalorder %v7586_v24, 0  ;;  %s5355_s15 = sadd.s32 %s5674_s11, %s5664_s21 }
 0x185   : > { %6129 = vmatmul.mubr.msk.f32.gmra.mrb[28].mxu1 %vm942_vm3, %v1733_v11  ;;  %6047 = vmatprep.mubr.msk.f32.mxu0 %vm6728_vm1, %v6729_v15  ;;  %vm2028_vm6 = vcmp.ge.s32.totalorder %v7584_v5, 1  ;;  %v6732_v8 = vmov 269488144   ;;  %v6733_v11 = vmov 842150450   ;;  %vm2077_vm9 = vcmp.lt.s32.totalorder %v7586_v24, 16 }
 0x186   : > { %v496_v13 = vpop.permute.xlu1 %495  ;;  %6131 = vmatprep.mubr.msk.f32.mxu1 %vm6728_vm1, %v6729_v15  ;;  %vm2033_vm4 = vcmp.le.s32.totalorder %v7589_v6, 16  ;;  %vm2038_vm7 = vcmp.ge.s32.totalorder %v2019_v7, 0  ;;  %v2208_v9 = vunpack.c.l.s4 %v6732_v8  ;;  %vm2078_vm11 = vcmp.lt.s32.totalorder %v2019_v7, 16  ;;  %s5665_s16 = sshll.u32 %s5355_s15, 7 }
 0x187   : > { %v1568_v60 = vpop.permute.xlu0 %1567  ;;  %v636_v16 = vsel %vm270_vm0, %v383_v12, %v496_v13  ;;  %v2215_v12 = vunpack.c.l.s4 %v6733_v11  ;;  %v6734_v13 = vmov 1414812756   ;;  %vm2049_vm8 = vmand %vm2033_vm4, %vm2037_vm5 }
 0x188   : > { %v1711_v17 = vsel %vm270_vm0, %v1458_v14, %v1568_v60  ;;  %v2222_v14 = vunpack.c.l.s4 %v6734_v13  ;;  %vm2050_vm10 = vmand %vm2028_vm6, %vm2038_vm7  ;;  %v2209_v60 = vunpack.c.0.s8 %v2208_v9 }
 0x189   : > { %vm2089_vm12 = vmand %vm2049_vm8, %vm2077_vm9 }
 0x18a   : > { %v588_v19 = vpop.permute.xlu1 %587  ;;  %vm2090_vm13 = vmand %vm2050_vm10, %vm2078_vm11 }
 0x18b   : > { %v660_v20 = vsel %vm639_vm2, %v636_v16, %v588_v19  ;;  %v1660_v29 = vpop.permute.xlu0 %1659  ;;  %v2216_v16 = vunpack.c.0.s8 %v2215_v12  ;;  %v7607_v19 = vsub.s32 %v2209_v60, %v7584_v5  ;;  %vm2091_vm14 = vmand %vm2038_vm7, %vm2078_vm11  ;;  %v7674_v12 = vadd.s32 3, %v7586_v24 }
 0x18c   : > { %v1734_v21 = vsel %vm639_vm2, %v1711_v17, %v1660_v29  ;;  %6048 = vmatmul.mubr.msk.f32.gmra.mrb[40].mxu0 %vm942_vm3, %v660_v20  ;;  %v2223_v17 = vunpack.c.0.s8 %v2222_v14  ;;  %v6735_v29 = vmov 1983009808  }
 0x18d   : > { %6132 = vmatmul.mubr.msk.f32.gmra.mrb[30].mxu1 %vm942_vm3, %v1734_v21  ;;  %6050 = vmatprep.mubr.msk.f32.mxu0 %vm6728_vm1, %v6729_v15  ;;  %v7610_v20 = vsub.s32 %v2216_v16, %v7584_v5  ;;  %v2863_v21 = vunpack.c.l.s4 %v6735_v29  ;;  %v5587_v16 = vld [vmem:[%s8821_s2 + $0x1a0] sm:$0xff] }
 0x18e   : > { %v498_v23 = vpop.permute.xlu1 %497  ;;  %6134 = vmatprep.mubr.msk.f32.mxu1 %vm6728_vm1, %v6729_v15 }
 0x18f   : > { %v1570_v32 = vpop.permute.xlu0 %1569  ;;  %v637_v26 = vsel %vm270_vm0, %v384_v22, %v498_v23  ;;  %v5543_v22 = vsel %vm2089_vm12, 1.0, %v6729_v15  ;;  %v5544_v23 = vsel %vm2090_vm13, 1.0, %v6729_v15  ;;  %vm2040_vm13 = vcmp.ge.s32.totalorder %v7674_v12, 0 }
 0x190   : > { %v1712_v27 = vsel %vm270_vm0, %v1459_v25, %v1570_v32  ;;  %v7615_v25 = vsub.s32 %v2223_v17, %v7584_v5  ;;  %v6736_v32 = vmov 1987475062   ;;  %v5588_v17 = vld [vmem:[%s8821_s2 + $0x1a8] sm:$0xff] }
 0x191   : > { %v6364_v29 = vpack.c.bf16 %v5588_v17, %v5587_v16 }
 0x192   : > { %v590_v4 = vpop.permute.xlu1 %589 }
 0x193   : > { %v661_v28 = vsel %vm639_vm2, %v637_v26, %v590_v4  ;;  %v1662_v30 = vpop.permute.xlu0 %1661  ;;  %v2229_v26 = vunpack.c.l.s4 %v6736_v32  ;;  %v2269_v4 = vrot.slane %v5543_v22, %v7607_v19 }
 0x194   : > { %v1735_v31 = vsel %vm639_vm2, %v1712_v27, %v1662_v30  ;;  %6051 = vmatmul.mubr.msk.f32.gmra.mrb[42].mxu0 %vm942_vm3, %v661_v28  ;;  %v2276_v28 = vrot.slane %v5544_v23, %v7607_v19  ;;  %v2864_v30 = vunpack.c.0.s8 %v2863_v21 }
 0x195   : > { %6135 = vmatmul.mubr.msk.f32.gmra.mrb[32].mxu1 %vm942_vm3, %v1735_v31  ;;  %6053 = vmatprep.mubr.msk.f32.mxu0 %vm6728_vm1, %v6729_v15 }
 0x196   : > { %v500_v37 = vpop.permute.xlu1 %499  ;;  %6137 = vmatprep.mubr.msk.f32.mxu1 %vm6728_vm1, %v6729_v15 }
 0x197   : > { %v1572_v35 = vpop.permute.xlu0 %1571  ;;  %v638_v36 = vsel %vm270_vm0, %v385_v33, %v500_v37  ;;  %v2230_v33 = vunpack.c.0.s8 %v2229_v26  ;;  %v2283_v37 = vrot.slane %v5544_v23, %v7610_v20 }
 0x198   : > { %v1713_v42 = vsel %vm270_vm0, %v1460_v34, %v1572_v35  ;;  %v2290_v34 = vrot.slane %v5544_v23, %v7615_v25  ;;  %v7622_v35 = vadd.s32 2, %v7586_v24 }
 0x19a   : > { %v592_v38 = vpop.permute.xlu1 %591  ;;  %vm2039_vm15 = vcmp.ge.s32.totalorder %v7622_v35, 0  ;;  %vm2079_vm10 = vcmp.lt.s32.totalorder %v7622_v35, 16 }
 0x19b   : > { %v662_v39 = vsel %vm639_vm2, %v638_v36, %v592_v38  ;;  %v1664_v40 = vpop.permute.xlu0 %1663  ;;  %vm2053_vm8 = vmand %vm2028_vm6, %vm2039_vm15 }
 0x19c   : > { %v1736_v41 = vsel %vm639_vm2, %v1713_v42, %v1664_v40  ;;  %6054 = vmatmul.mubr.msk.f32.gmra.mrb[44].mxu0 %vm942_vm3, %v662_v39  ;;  %v7627_v42 = vsub.s32 %v2864_v30, %v7584_v5  ;;  %v7630_v39 = vsub.s32 %v2230_v33, %v7584_v5  ;;  %v2894_v40 = vcombine.low %v2269_v4, %v2276_v28  ;;  %vm2093_vm12 = vmand %vm2053_vm8, %vm2079_vm10  ;;  %v5589_v30 = vld [vmem:[%s8821_s2 + $0x1b0] sm:$0xff] }
 0x19d   : > { %6138 = vmatmul.mubr.msk.f32.gmra.mrb[34].mxu1 %vm942_vm3, %v1736_v41  ;;  %6080 = vmatprep.mubr.msk.f32.mxu0 %vm6728_vm1, %v6729_v15  ;;  %v2895_v41 = vcombine.low %v2283_v37, %v2290_v34  ;;  %vm2080_vm8 = vcmp.lt.s32.totalorder %v7674_v12, 16 }
 0x19e   : > { %v1534_v10 = vpop.permute.xlu1 %1533  ;;  %6140 = vmatprep.mubr.msk.f32.mxu1 %vm6728_vm1, %v6729_v15 }
 0x19f   : > { %v1574_v46 = vpop.permute.xlu0 %1573  ;;  %v1694_v47 = vsel %vm270_vm0, %v1441_v43, %v1534_v10  ;;  %v5545_v43 = vsel %vm2091_vm14, 1.0, %v6729_v15  ;;  %vm2055_vm14 = vmand %vm2033_vm4, %vm2039_vm15 }
 0x1a0   : > { %v1714_v2 = vsel %vm270_vm0, %v1461_v44, %v1574_v46  ;;  %v2902_v46 = vrot.slane %v2894_v40, %v7627_v42  ;;  %v2325_v7 = vrot.slane %v5545_v43, %v7630_v39 }
 0x1a2   : > { %v1626_v48 = vpop.permute.xlu1 %1625 }
 0x1a3   : > { %v1717_v49 = vsel %vm639_vm2, %v1694_v47, %v1626_v48  ;;  %v1666_v45 = vpop.permute.xlu0 %1665  ;;  %v2909_v47 = vrot.slane %v2895_v41, %v7627_v42  ;;  %v2304_v48 = vrot.slane %v5545_v43, %v7607_v19 }
 0x1a4   : > { %v1737_v50 = vsel %vm639_vm2, %v1714_v2, %v1666_v45  ;;  %6081 = vmatmul.mubr.msk.f32.vlgmr.msra.gmra.mrb[0].mxu0 %vm942_vm3, %v1717_v49  ;;  %v2297_v2 = vrot.slane %v5544_v23, %v7630_v39  ;;  %v2311_v49 = vrot.slane %v5545_v43, %v7610_v20  ;;  %v2318_v45 = vrot.slane %v5545_v43, %v7615_v25 }
 0x1a5   : > { %6141 = vmatmul.mubr.msk.f32.gmra.mrb[36].mxu1 %vm942_vm3, %v1737_v50  ;;  %6083 = vmatprep.mubr.msk.f32.mxu0 %vm6728_vm1, %v6729_v15  ;;  %v5583_v50 = vld [vmem:[%s8821_s2 + $0x180] sm:$0xff] }
 0x1a6   : > { %v1628_v53 = vpop.permute.xlu1 %1627  ;;  %6143 = vmatprep.mubr.msk.f32.mxu1 %vm6728_vm1, %v6729_v15 }
 0x1a7   : > { %v1536_v55 = vpop.permute.xlu0 %1535 }
 0x1a8   : > { %v1695_v56 = vsel %vm270_vm0, %v1442_v51, %v1536_v55  ;;  %v5584_v51 = vld [vmem:[%s8821_s2 + $0x188] sm:$0xff] }
 0x1a9   : > { %v1718_v52 = vsel %vm639_vm2, %v1695_v56, %v1628_v53  ;;  %v6356_v53 = vpack.c.bf16 %v5584_v51, %v5583_v50 }
 0x1aa   : > { %6084 = vmatmul.mubr.msk.f32.gmra.mrb[2].mxu0 %vm942_vm3, %v1718_v52  ;;  %v1668_v57 = vpop.permute.xlu1 %1667  ;;  %v2910_v52 = vcombine.low %v2902_v46, %v2909_v47 }
 0x1ab   : > { %v1576_v58 = vpop.permute.xlu0 %1575  ;;  %6357 = vmatprep.subr.bf16.mxu1 %v6356_v53 }
 0x1ac   : > { %v1715_v59 = vsel %vm270_vm0, %v1462_v18, %v1576_v58  ;;  %6359 = vmatpush3.bf16.msra.mxu1 %v6356_v53 }
 0x1ad   : > { %v1738_v61 = vsel %vm639_vm2, %v1715_v59, %v1668_v57  ;;  %v2911_v57 = vcombine.low %v2297_v2, %v2304_v48  ;;  %v5591_v2 = vld [vmem:[%s8821_s2 + $0x1c0] sm:$0xff]  ;;  %v5592_v48 = vld [vmem:[%s8821_s2 + $0x1c8] sm:$0xff] }
 0x1ae   : > { %6144 = vmatmul.mubr.msk.f32.gmra.mrb[38].mxu1 %vm942_vm3, %v1738_v61  ;;  %v1670_v63 = vpop.permute.xlu1 %1669  ;;  %v2912_v61 = vcombine.low %v2311_v49, %v2318_v45  ;;  %v6372_v49 = vpack.c.bf16 %v5592_v48, %v5591_v2 }
 0x1af   : > { %v1578_v0 = vpop.permute.xlu0 %1577  ;;  %6146 = vmatprep.mubr.msk.f32.mxu1 %vm6728_vm1, %v6729_v15  ;;  %vm2052_vm1 = vmand %vm2033_vm4, %vm2038_vm7  ;;  %v2919_v14 = vrot.slane %v2911_v57, %v7627_v42 }
 0x1b0   : > { %v1716_v54 = vsel %vm270_vm0, %v1463_v62, %v1578_v0  ;;  %vm2092_vm7 = vmand %vm2052_vm1, %vm2078_vm11  ;;  %v5585_v0 = vld [vmem:[%s8821_s2 + $0x190] sm:$0xff]  ;;  %v2926_v60 = vrot.slane %v2912_v61, %v7627_v42  ;;  %v5594_v61 = vld [vmem:[%s8821_s2 + $0x1d8] sm:$0xff] }
 0x1b1   : > { %v1739_v1 = vsel %vm639_vm2, %v1716_v54, %v1670_v63  ;;  %v5546_v62 = vsel %vm2092_vm7, 1.0, %v6729_v15  ;;  %v5547_v63 = vsel %vm2093_vm12, 1.0, %v6729_v15  ;;  %v5586_v54 = vld [vmem:[%s8821_s2 + $0x198] sm:$0xff]  ;;  %vm2094_vm11 = vmand %vm2039_vm15, %vm2079_vm10 }
 0x1b2   : > { %6147 = vmatmul.mubr.msk.f32.gmra.mrb[40].mxu1 %vm942_vm3, %v1739_v1  ;;  %v6360_v1 = vpack.c.bf16 %v5586_v54, %v5585_v0  ;;  %v2332_v8 = vrot.slane %v5546_v62, %v7607_v19  ;;  %v2339_v9 = vrot.slane %v5547_v63, %v7607_v19  ;;  %v2346_v11 = vrot.slane %v5547_v63, %v7610_v20  ;;  %vm2056_vm1 = vmand %vm2028_vm6, %vm2040_vm13 }
 0x1b3   : > { %v2927_v4 = vcombine.low %v2919_v14, %v2926_v60  ;;  %v5548_v33 = vsel %vm2094_vm11, 1.0, %v6729_v15  ;;  %v2353_v40 = vrot.slane %v5547_v63, %v7615_v25  ;;  %v2360_v41 = vrot.slane %v5547_v63, %v7630_v39  ;;  %vm7716_vm15 = vmand %vm2055_vm14, %vm2079_vm10 }
 0x1b4   : > { %6361 = vmatprep.subr.bf16.mxu1 %v6360_v1  ;;  %v2928_v32 = vcombine.low %v2325_v7, %v2332_v8  ;;  %v2929_v26 = vcombine.low %v2339_v9, %v2346_v11  ;;  %v2374_v46 = vrot.slane %v5548_v33, %v7610_v20  ;;  %vm2096_vm7 = vmand %vm2056_vm1, %vm2080_vm8  ;;  %v5549_v57 = vsel %vm7716_vm15, 1.0, %v6729_v15 }
 0x1b5   : > { %6363 = vmatpush3.bf16.msra.mxu1 %v6360_v1  ;;  %v2945_v53 = vcombine.low %v2353_v40, %v2360_v41  ;;  %v2388_v0 = vrot.slane %v5548_v33, %v7630_v39  ;;  %v2395_v54 = vrot.slane %v5549_v57, %v7607_v19  ;;  %vm2097_vm10 = vmand %vm2040_vm13, %vm2080_vm8 }
 0x1b6   : > { %6365 = vmatprep.subr.bf16.mxu1 %v6364_v29  ;;  %vm2058_vm12 = vmand %vm2033_vm4, %vm2040_vm13 }
 0x1b7   : > { %v2953_v7 = vrot.slane %v2945_v53, %v7627_v42  ;;  %vm2098_vm11 = vmand %vm2058_vm12, %vm2080_vm8 }
 0x1b8   : > { %v5552_v12 = vsel %vm2098_vm11, 1.0, %v6729_v15 }
 0x1b9   : > { %6367 = vmatpush3.bf16.msra.mxu1 %v6364_v29  ;;  %v2458_v53 = vrot.slane %v5552_v12, %v7607_v19 }
 0x1db   : > { %v1337_v27 = vpop.f32.mrb[4].mxu0 }
 0x1dc   : > { %v5995_v31 = vpop.f32.mrb[5].mxu0 }
 0x1dd   : > { %v5590_v31 = vld [vmem:[%s8821_s2 + $0x1b8] sm:$0xff] }
 0x1de   : > { %v6368_v37 = vpack.c.bf16 %v5590_v31, %v5589_v30 }
 0x1df   : > { %v1342_v36 = vpop.f32.mrb[6].mxu0 }
 0x1e0   : > { %v5998_v38 = vpop.f32.mrb[7].mxu0  ;;  %6369 = vmatprep.subr.bf16.mxu1 %v6368_v37 }
 0x1e1   : > { %v2943_v38 = vrot.slane %v2929_v26, %v7627_v42  ;;  %6371 = vmatpush3.bf16.msra.mxu1 %v6368_v37 }
 0x1e2   : > { %6373 = vmatprep.subr.bf16.mxu1 %v6372_v49 }
 0x1e3   : > { %v7637_v10 = vpop.f32.mrb[8].mxu0 }
 0x1e4   : > { %v6001_v44 = vpop.f32.mrb[9].mxu0 }
 0x1e5   : > { %v2367_v44 = vrot.slane %v5548_v33, %v7607_v19  ;;  %6375 = vmatpush3.bf16.msra.mxu1 %v6372_v49 }
 0x1e7   : > { %v7659_v55 = vpop.f32.mrb[10].mxu0 }
 0x1e8   : > { %v1885_v56 = vpop.f32.mrb[0].mxu1  ;;  %v6004_v18 = vpop.f32.mrb[11].mxu0 }
 0x1e9   : > { %v6440_v58 = vadd.f32 %v1885_v56, %v1337_v27  ;;  %v6088_v59 = vpop.f32.mrb[1].mxu1  ;;  %v2946_v18 = vcombine.low %v2367_v44, %v2374_v46 }
 0x1ea   : > { %v5593_v59 = vld [vmem:[%s8821_s2 + $0x1d0] sm:$0xff] }
 0x1eb   : > { %v2839_v3 = vmax.f32 %v6440_v58, 0.0  ;;  %v5550_v58 = vsel %vm2096_vm7, 1.0, %v6729_v15  ;;  %v6376_v62 = vpack.c.bf16 %v5594_v61, %v5593_v59  ;;  %v2960_v8 = vrot.slane %v2946_v18, %v7627_v42 }
 0x1ec   : > { %v2402_v1 = vrot.slane %v5550_v58, %v7607_v19  ;;  %v2416_v31 = vrot.slane %v5550_v58, %v7615_v25 }
 0x1ed   : > { %v3267_v13 = vmul.f32 %v2910_v52, %v2839_v3  ;;  %6377 = vmatprep.subr.bf16.mxu1 %v6376_v62  ;;  %v2961_v29 = vcombine.low %v2953_v7, %v2960_v8 }
 0x1ee   : > { %6379 = vmatpush3.bf16.msra.mxu1 %v6376_v62  ;;  %v2963_v16 = vcombine.low %v2395_v54, %v2402_v1 }
 0x1ef   : > { %3290 = vst.msk [vmem:[#allocation3 + $0x10] sm:$0xff] %vm270_vm0, %v3267_v13  ;;  %v7685_v21 = vpop.f32.mrb[12].mxu0 }
 0x1f0   : > { %v1890_v22 = vpop.f32.mrb[2].mxu1  ;;  %v6007_v23 = vpop.f32.mrb[13].mxu0 }
 0x1f1   : > { %v6441_v27 = vadd.f32 %v1890_v22, %v1342_v36  ;;  %v6091_v28 = vpop.f32.mrb[3].mxu1  ;;  %v2936_v36 = vrot.slane %v2928_v32, %v7627_v42  ;;  %v5551_v32 = vsel %vm2097_vm10, 1.0, %v6729_v15 }
 0x1f2   : > { %v2409_v28 = vrot.slane %v5550_v58, %v7610_v20  ;;  %v2430_v37 = vrot.slane %v5551_v32, %v7607_v19 }
 0x1f3   : > { %v2840_v34 = vmax.f32 %v6441_v27, 0.0  ;;  %v2944_v50 = vcombine.low %v2936_v36, %v2943_v38 }
 0x1f4   : > { %v2979_v47 = vcombine.low %v2409_v28, %v2416_v31 }
 0x1f5   : > { %v3268_v43 = vmul.f32 %v2927_v4, %v2840_v34  ;;  %v2977_v4 = vrot.slane %v2963_v16, %v7627_v42 }
 0x1f7   : > { %3291 = vst.msk [vmem:[#allocation3 + $0x18] sm:$0xff] %vm270_vm0, %v3268_v43  ;;  %v7729_v35 = vpop.f32.mrb[14].mxu0 }
 0x1f8   : > { %v1895_v45 = vpop.f32.mrb[4].mxu1  ;;  %v6010_v51 = vpop.f32.mrb[15].mxu0 }
 0x1f9   : > { %v6442_v56 = vadd.f32 %v1895_v45, %v7637_v10  ;;  %v6094_v52 = vpop.f32.mrb[5].mxu1  ;;  %v2381_v10 = vrot.slane %v5548_v33, %v7615_v25  ;;  %v2423_v33 = vrot.slane %v5550_v58, %v7630_v39  ;;  %v2451_v51 = vrot.slane %v5551_v32, %v7630_v39 }
 0x1fa   : > { %v2987_v52 = vrot.slane %v2979_v47, %v7627_v42 }
 0x1fb   : > { %v2841_v63 = vmax.f32 %v6442_v56, 0.0  ;;  %v2962_v60 = vcombine.low %v2381_v10, %v2388_v0  ;;  %v2980_v2 = vcombine.low %v2423_v33, %v2430_v37  ;;  %v2997_v10 = vcombine.low %v2451_v51, %v2458_v53 }
 0x1fd   : > { %v3269_v3 = vmul.f32 %v2944_v50, %v2841_v63  ;;  %v2970_v27 = vrot.slane %v2962_v60, %v7627_v42  ;;  %v2444_v50 = vrot.slane %v5551_v32, %v7615_v25  ;;  %v2994_v18 = vrot.slane %v2980_v2, %v7627_v42 }
 0x1fe   : > { %v3586_v9 = vld [vmem:[#allocation3 + $0x13] sm:$0xff] }
 0x1ff   : > { %3292 = vst.msk [vmem:[#allocation3 + $0x20] sm:$0xff] %vm270_vm0, %v3269_v3  ;;  %3640 = vrot.lane.b32.xlu0 %v3586_v9, %s6730_s4  ;;  %v7750_v11 = vpop.f32.mrb[16].mxu0  ;;  %v3604_v23 = vld [vmem:[#allocation3 + $0x14] sm:$0xff]  ;;  %v2978_v41 = vcombine.low %v2970_v27, %v2977_v4  ;;  %v2995_v54 = vcombine.low %v2987_v52, %v2994_v18 }
 0x200   : > { %v1900_v13 = vpop.f32.mrb[6].mxu1  ;;  %v6013_v14 = vpop.f32.mrb[17].mxu0  ;;  %v3370_v34 = vld [vmem:[#allocation3 + $0x11] sm:$0xff] }
 0x201   : > { %v6443_v17 = vadd.f32 %v1900_v13, %v7659_v55  ;;  %v6097_v22 = vpop.f32.mrb[7].mxu1  ;;  %v7767_v55 = vadd.s32 4, %v7586_v24  ;;  %v7782_v48 = vld [vmem:[#allocation3 + $0x12] sm:$0xff]  ;;  %v3011_v14 = vrot.slane %v2997_v10, %v7627_v42 }
 0x203   : > { %v2842_v26 = vmax.f32 %v6443_v17, 0.0  ;;  %3712 = vrot.lane.b32.xlu0 %v3604_v23, %s6731_s6  ;;  %vm2041_vm13 = vcmp.ge.s32.totalorder %v7767_v55, 0  ;;  %vm2081_vm1 = vcmp.lt.s32.totalorder %v7767_v55, 16 }
 0x204   : > { %vm2059_vm14 = vmand %vm2028_vm6, %vm2041_vm13 }
 0x205   : > { %v3270_v30 = vmul.f32 %v2961_v29, %v2842_v26  ;;  %vm2099_vm8 = vmand %vm2059_vm14, %vm2081_vm1 }
 0x206   : > { %v3587_v36 = vld [vmem:[#allocation3 + $0x1b] sm:$0xff]  ;;  %v5553_v3 = vsel %vm2099_vm8, 1.0, %v6729_v15  ;;  %vm2100_vm15 = vmand %vm2041_vm13, %vm2081_vm1 }
 0x207   : > { %3293 = vst.msk [vmem:[#allocation3 + $0x28] sm:$0xff] %vm270_vm0, %v3270_v30  ;;  %3426 = vrot.lane.b32.xlu0 %v3370_v34, %s6730_s4  ;;  %3642 = vrot.lane.b32.xlu1 %v3587_v36, %s6730_s4  ;;  %v7777_v38 = vpop.f32.mrb[18].mxu0  ;;  %v3605_v49 = vld [vmem:[#allocation3 + $0x1c] sm:$0xff]  ;;  %v2465_v60 = vrot.slane %v5553_v3, %v7607_v19  ;;  %v2472_v17 = vrot.slane %v5553_v3, %v7610_v20  ;;  %v5554_v34 = vsel %vm2100_vm15, 1.0, %v6729_v15  ;;  %vm2061_vm10 = vmand %vm2033_vm4, %vm2041_vm13 }
 0x208   : > { %v1905_v40 = vpop.f32.mrb[8].mxu1  ;;  %v6016_v43 = vpop.f32.mrb[19].mxu0  ;;  %v3371_v57 = vld [vmem:[#allocation3 + $0x19] sm:$0xff]  ;;  %v2479_v29 = vrot.slane %v5553_v3, %v7615_v25  ;;  %v2486_v22 = vrot.slane %v5553_v3, %v7630_v39  ;;  %vm2101_vm13 = vmand %vm2061_vm10, %vm2081_vm1 }
 0x209   : > { %v6444_v44 = vadd.f32 %v1905_v40, %v7685_v21  ;;  %v6100_v46 = vpop.f32.mrb[9].mxu1  ;;  %v2437_v21 = vrot.slane %v5551_v32, %v7610_v20  ;;  %v7807_v7 = vld [vmem:[#allocation3 + $0x1a] sm:$0xff]  ;;  %v3013_v33 = vcombine.low %v2465_v60, %v2472_v17  ;;  %v2500_v43 = vrot.slane %v5554_v34, %v7610_v20 }
 0x20a   : > { %v3014_v37 = vcombine.low %v2479_v29, %v2486_v22  ;;  %v2514_v46 = vrot.slane %v5554_v34, %v7630_v39 }
 0x20b   : > { %v2843_v45 = vmax.f32 %v6444_v44, 0.0  ;;  %3498 = vrot.lane.b32.xlu0 %v7782_v48, %s6731_s6  ;;  %3714 = vrot.lane.b32.xlu1 %v3605_v49, %s6731_s6  ;;  %v2996_v63 = vcombine.low %v2437_v21, %v2444_v50  ;;  %v2507_v44 = vrot.slane %v5554_v34, %v7615_v25  ;;  %v3021_v2 = vrot.slane %v3013_v33, %v7627_v42 }
 0x20c   : > { %v3028_v12 = vrot.slane %v3014_v37, %v7627_v42 }
 0x20d   : > { %v3271_v56 = vmul.f32 %v2978_v41, %v2843_v45  ;;  %v3004_v13 = vrot.slane %v2996_v63, %v7627_v42 }
 0x20e   : > { %v3588_v58 = vld [vmem:[#allocation3 + $0x23] sm:$0xff]  ;;  %v3029_v52 = vcombine.low %v3021_v2, %v3028_v12 }
 0x20f   : > { %3294 = vst.msk [vmem:[#allocation3 + $0x30] sm:$0xff] %vm270_vm0, %v3271_v56  ;;  %3428 = vrot.lane.b32.xlu1 %v3371_v57, %s6730_s4  ;;  %3644 = vrot.lane.b32.xlu0 %v3588_v58, %s6730_s4  ;;  %v7803_v59 = vpop.f32.mrb[20].mxu0  ;;  %v3606_v8 = vld [vmem:[#allocation3 + $0x24] sm:$0xff]  ;;  %v3012_v4 = vcombine.low %v3004_v13, %v3011_v14  ;;  %v3031_v56 = vcombine.low %v2507_v44, %v2514_v46  ;;  %v5555_v57 = vsel %vm2101_vm13, 1.0, %v6729_v15 }
 0x210   : > { %v1910_v61 = vpop.f32.mrb[10].mxu1  ;;  %v6019_v62 = vpop.f32.mrb[21].mxu0  ;;  %v3372_v23 = vld [vmem:[#allocation3 + $0x21] sm:$0xff] }
 0x211   : > { %v6445_v0 = vadd.f32 %v1910_v61, %v7729_v35  ;;  %v6103_v1 = vpop.f32.mrb[11].mxu1  ;;  %v7816_v35 = vadd.s32 5, %v7586_v24  ;;  %v7833_v36 = vld [vmem:[#allocation3 + $0x22] sm:$0xff] }
 0x212   : > { %v4238_v49 = vld [vmem:[#allocation3 + $0x25] sm:$0xff] }
 0x213   : > { %v2844_v9 = vmax.f32 %v6445_v0, 0.0  ;;  %3500 = vrot.lane.b32.xlu1 %v7807_v7, %s6731_s6  ;;  %3716 = vrot.lane.b32.xlu0 %v3606_v8, %s6731_s6  ;;  %vm2042_vm7 = vcmp.ge.s32.totalorder %v7816_v35, 0  ;;  %vm2082_vm11 = vcmp.lt.s32.totalorder %v7816_v35, 16  ;;  %v3045_v0 = vrot.slane %v3031_v56, %v7627_v42 }
 0x214   : > { %vm2062_vm12 = vmand %vm2028_vm6, %vm2042_vm7 }
 0x215   : > { %v3272_v16 = vmul.f32 %v2995_v54, %v2844_v9  ;;  %vm2102_vm14 = vmand %vm2062_vm12, %vm2082_vm11  ;;  %v7877_v9 = vadd.s32 6, %v7586_v24 }
 0x216   : > { %v3589_v32 = vld [vmem:[#allocation3 + $0x2b] sm:$0xff]  ;;  %v5556_v58 = vsel %vm2102_vm14, 1.0, %v6729_v15  ;;  %vm2103_vm1 = vmand %vm2042_vm7, %vm2082_vm11 }
 0x217   : > { %3295 = vst.msk [vmem:[#allocation3 + $0x38] sm:$0xff] %vm270_vm0, %v3272_v16  ;;  %3430 = vrot.lane.b32.xlu0 %v3372_v23, %s6730_s4  ;;  %3646 = vrot.lane.b32.xlu1 %v3589_v32, %s6730_s4  ;;  %v7828_v26 = vpop.f32.mrb[22].mxu0  ;;  %v3607_v40 = vld [vmem:[#allocation3 + $0x2c] sm:$0xff]  ;;  %v2528_v54 = vrot.slane %v5556_v58, %v7607_v19  ;;  %v2535_v3 = vrot.slane %v5556_v58, %v7610_v20  ;;  %vm2043_vm8 = vcmp.ge.s32.totalorder %v7877_v9, 0  ;;  %vm2064_vm15 = vmand %vm2033_vm4, %vm2042_vm7  ;;  %vm2083_vm12 = vcmp.lt.s32.totalorder %v7877_v9, 16 }
 0x218   : > { %v1915_v27 = vpop.f32.mrb[12].mxu1  ;;  %v6022_v28 = vpop.f32.mrb[23].mxu0  ;;  %v3373_v45 = vld [vmem:[#allocation3 + $0x29] sm:$0xff]  ;;  %v2542_v8 = vrot.slane %v5556_v58, %v7615_v25  ;;  %v2549_v33 = vrot.slane %v5556_v58, %v7630_v39  ;;  %vm2065_vm10 = vmand %vm2028_vm6, %vm2043_vm8 }
 0x219   : > { %v6446_v30 = vadd.f32 %v1915_v27, %v7750_v11  ;;  %v6106_v31 = vpop.f32.mrb[13].mxu1  ;;  %v2493_v11 = vrot.slane %v5554_v34, %v7607_v19  ;;  %v7865_v61 = vld [vmem:[#allocation3 + $0x2a] sm:$0xff]  ;;  %vm2104_vm7 = vmand %vm2064_vm15, %vm2082_vm11 }
 0x21a   : > { %v4239_v13 = vld [vmem:[#allocation3 + $0x2d] sm:$0xff]  ;;  %v3048_v27 = vcombine.low %v2535_v3, %v2542_v8  ;;  %vm2105_vm13 = vmand %vm2065_vm10, %vm2083_vm12 }
 0x21b   : > { %v2845_v41 = vmax.f32 %v6446_v30, 0.0  ;;  %3502 = vrot.lane.b32.xlu0 %v7833_v36, %s6731_s6  ;;  %3718 = vrot.lane.b32.xlu1 %v3607_v40, %s6731_s6  ;;  %v3030_v53 = vcombine.low %v2493_v11, %v2500_v43  ;;  %vm2106_vm11 = vmand %vm2043_vm8, %vm2083_vm12 }
 0x21c   : > { %v3062_v11 = vrot.slane %v3048_v27, %v7627_v42 }
 0x21d   : > { %v3273_v47 = vmul.f32 %v3012_v4, %v2845_v41  ;;  %v3038_v10 = vrot.slane %v3030_v53, %v7627_v42  ;;  %v5557_v4 = vsel %vm2103_vm1, 1.0, %v6729_v15  ;;  %vm2067_vm1 = vmand %vm2033_vm4, %vm2043_vm8 }
 0x21e   : > { %v3590_v62 = vld [vmem:[#allocation3 + $0x33] sm:$0xff]  ;;  %v2563_v37 = vrot.slane %v5557_v4, %v7610_v20  ;;  %v2570_v34 = vrot.slane %v5557_v4, %v7615_v25  ;;  %v2577_v58 = vrot.slane %v5557_v4, %v7630_v39  ;;  %vm2107_vm8 = vmand %vm2067_vm1, %vm2083_vm12 }
 0x21f   : > { %3296 = vst.msk [vmem:[#allocation3 + $0x40] sm:$0xff] %vm270_vm0, %v3273_v47  ;;  %4292 = vrot.lane.b32.xlu0 %v4238_v49, %s6730_s4  ;;  %3432 = vrot.lane.b32.xlu1 %v3373_v45, %s6730_s4  ;;  %v7860_v21 = vpop.f32.mrb[24].mxu0  ;;  %v3608_v14 = vld [vmem:[#allocation3 + $0x34] sm:$0xff]  ;;  %v3046_v17 = vcombine.low %v3038_v10, %v3045_v0  ;;  %v7932_v0 = vadd.s32 7, %v7586_v24 }
 0x220   : > { %v1920_v50 = vpop.f32.mrb[14].mxu1  ;;  %v6025_v51 = vpop.f32.mrb[25].mxu0  ;;  %v3374_v28 = vld [vmem:[#allocation3 + $0x31] sm:$0xff]  ;;  %v3065_v49 = vcombine.low %v2563_v37, %v2570_v34 }
 0x221   : > { %v6447_v55 = vadd.f32 %v1920_v50, %v7777_v38  ;;  %v6109_v18 = vpop.f32.mrb[15].mxu1  ;;  %v2521_v38 = vrot.slane %v5555_v57, %v7607_v19  ;;  %v7908_v43 = vld [vmem:[#allocation3 + $0x32] sm:$0xff]  ;;  %v5558_v51 = vsel %vm2104_vm7, 1.0, %v6729_v15  ;;  %vm2044_vm14 = vcmp.ge.s32.totalorder %v7932_v0, 0 }
 0x222   : > { %v3079_v57 = vrot.slane %v3065_v49, %v7627_v42  ;;  %vm2068_vm15 = vmand %vm2028_vm6, %vm2044_vm14  ;;  %vm2084_vm10 = vcmp.lt.s32.totalorder %v7932_v0, 16 }
 0x223   : > { %v2846_v63 = vmax.f32 %v6447_v55, 0.0  ;;  %3504 = vrot.lane.b32.xlu1 %v7865_v61, %s6731_s6  ;;  %3648 = vrot.lane.b32.xlu0 %v3590_v62, %s6730_s4  ;;  %v3047_v22 = vcombine.low %v2521_v38, %v2528_v54  ;;  %v5559_v55 = vsel %vm2105_vm13, 1.0, %v6729_v15  ;;  %vm2108_vm7 = vmand %vm2068_vm15, %vm2084_vm10 }
 0x224   : > { %v2598_v10 = vrot.slane %v5559_v55, %v7610_v20  ;;  %vm2109_vm12 = vmand %vm2044_vm14, %vm2084_vm10 }
 0x225   : > { %v3274_v1 = vmul.f32 %v3029_v52, %v2846_v63  ;;  %v3055_v41 = vrot.slane %v3047_v22, %v7627_v42  ;;  %v2591_v63 = vrot.slane %v5559_v55, %v7607_v19  ;;  %v5560_v22 = vsel %vm2106_vm11, 1.0, %v6729_v15  ;;  %vm2070_vm13 = vmand %vm2033_vm4, %vm2044_vm14 }
 0x226   : > { %v3591_v30 = vld [vmem:[#allocation3 + $0x3b] sm:$0xff]  ;;  %vm2110_vm11 = vmand %vm2070_vm13, %vm2084_vm10 }
 0x227   : > { %3297 = vst.msk [vmem:[#allocation3 + $0x48] sm:$0xff] %vm270_vm0, %v3274_v1  ;;  %4294 = vrot.lane.b32.xlu1 %v4239_v13, %s6730_s4  ;;  %3720 = vrot.lane.b32.xlu0 %v3608_v14, %s6731_s6  ;;  %v7886_v60 = vpop.f32.mrb[26].mxu0  ;;  %v3609_v44 = vld [vmem:[#allocation3 + $0x3c] sm:$0xff]  ;;  %v3063_v35 = vcombine.low %v3055_v41, %v3062_v11 }
 0x228   : > { %v1925_v16 = vpop.f32.mrb[16].mxu1  ;;  %v6028_v29 = vpop.f32.mrb[27].mxu0  ;;  %v3375_v53 = vld [vmem:[#allocation3 + $0x39] sm:$0xff] }
 0x229   : > { %v6448_v23 = vadd.f32 %v1925_v16, %v7803_v59  ;;  %v6112_v32 = vpop.f32.mrb[17].mxu1  ;;  %v2556_v59 = vrot.slane %v5557_v4, %v7607_v19  ;;  %v7934_v38 = vld [vmem:[#allocation3 + $0x3a] sm:$0xff]  ;;  %v3082_v29 = vcombine.low %v2591_v63, %v2598_v10  ;;  %v2605_v4 = vrot.slane %v5559_v55, %v7615_v25 }
 0x22b   : > { %v2847_v31 = vmax.f32 %v6448_v23, 0.0  ;;  %3434 = vrot.lane.b32.xlu0 %v3374_v28, %s6730_s4  ;;  %3650 = vrot.lane.b32.xlu1 %v3591_v30, %s6730_s4  ;;  %v3064_v12 = vcombine.low %v2549_v33, %v2556_v59  ;;  %v2619_v28 = vrot.slane %v5560_v22, %v7607_v19  ;;  %v2626_v30 = vrot.slane %v5560_v22, %v7610_v20 }
 0x22c   : > { %v3096_v59 = vrot.slane %v3082_v29, %v7627_v42 }
 0x22d   : > { %v3275_v40 = vmul.f32 %v3046_v17, %v2847_v31  ;;  %v3072_v18 = vrot.slane %v3064_v12, %v7627_v42 }
 0x22e   : > { %v3592_v56 = vld [vmem:[#allocation3 + $0x43] sm:$0xff] }
 0x22f   : > { %3298 = vst.msk [vmem:[#allocation3 + $0x50] sm:$0xff] %vm270_vm0, %v3275_v40  ;;  %3506 = vrot.lane.b32.xlu0 %v7908_v43, %s6731_s6  ;;  %3722 = vrot.lane.b32.xlu1 %v3609_v44, %s6731_s6  ;;  %v7916_v46 = vpop.f32.mrb[28].mxu0  ;;  %v3610_v54 = vld [vmem:[#allocation3 + $0x44] sm:$0xff]  ;;  %v3080_v8 = vcombine.low %v3072_v18, %v3079_v57 }
 0x230   : > { %v1930_v47 = vpop.f32.mrb[18].mxu1  ;;  %v6031_v2 = vpop.f32.mrb[29].mxu0  ;;  %v3376_v23 = vld [vmem:[#allocation3 + $0x41] sm:$0xff] }
 0x231   : > { %v6449_v45 = vadd.f32 %v1930_v47, %v7828_v26  ;;  %v6115_v50 = vpop.f32.mrb[19].mxu1  ;;  %v2584_v26 = vrot.slane %v5558_v51, %v7607_v19  ;;  %v7966_v37 = vld [vmem:[#allocation3 + $0x42] sm:$0xff]  ;;  %v3099_v47 = vcombine.low %v2619_v28, %v2626_v30 }
 0x232   : > { %v5562_v50 = vsel %vm2108_vm7, 1.0, %v6729_v15 }
 0x233   : > { %v2848_v52 = vmax.f32 %v6449_v45, 0.0  ;;  %3436 = vrot.lane.b32.xlu1 %v3375_v53, %s6730_s4  ;;  %3652 = vrot.lane.b32.xlu0 %v3592_v56, %s6730_s4  ;;  %v3081_v14 = vcombine.low %v2577_v58, %v2584_v26  ;;  %v3113_v56 = vrot.slane %v3099_v47, %v7627_v42  ;;  %v2654_v57 = vrot.slane %v5562_v50, %v7607_v19 }
 0x235   : > { %v3276_v62 = vmul.f32 %v3063_v35, %v2848_v52  ;;  %v3089_v33 = vrot.slane %v3081_v14, %v7627_v42  ;;  %v5561_v35 = vsel %vm2107_vm8, 1.0, %v6729_v15  ;;  %v2640_v52 = vrot.slane %v5560_v22, %v7630_v39 }
 0x236   : > { %v3593_v32 = vld [vmem:[#allocation3 + $0x4b] sm:$0xff]  ;;  %v2647_v18 = vrot.slane %v5561_v35, %v7607_v19 }
 0x237   : > { %3299 = vst.msk [vmem:[#allocation3 + $0x58] sm:$0xff] %vm270_vm0, %v3276_v62  ;;  %3508 = vrot.lane.b32.xlu1 %v7934_v38, %s6731_s6  ;;  %3724 = vrot.lane.b32.xlu0 %v3610_v54, %s6731_s6  ;;  %v7944_v1 = vpop.f32.mrb[30].mxu0  ;;  %v3611_v34 = vld [vmem:[#allocation3 + $0x4c] sm:$0xff]  ;;  %v3097_v9 = vcombine.low %v3089_v33, %v3096_v59 }
 0x238   : > { %v1935_v3 = vpop.f32.mrb[20].mxu1  ;;  %v6034_v13 = vpop.f32.mrb[31].mxu0  ;;  %v3377_v49 = vld [vmem:[#allocation3 + $0x49] sm:$0xff]  ;;  %v3116_v14 = vcombine.low %v2647_v18, %v2654_v57 }
 0x239   : > { %v6450_v16 = vadd.f32 %v1935_v3, %v7860_v21  ;;  %v6118_v17 = vpop.f32.mrb[21].mxu1  ;;  %v2612_v21 = vrot.slane %v5559_v55, %v7630_v39  ;;  %v2633_v55 = vrot.slane %v5560_v22, %v7615_v25  ;;  %v7989_v58 = vld [vmem:[#allocation3 + $0x4a] sm:$0xff] }
 0x23a   : > { %v3130_v30 = vrot.slane %v3116_v14, %v7627_v42 }
 0x23b   : > { %v2849_v27 = vmax.f32 %v6450_v16, 0.0  ;;  %3438 = vrot.lane.b32.xlu0 %v3376_v23, %s6730_s4  ;;  %3654 = vrot.lane.b32.xlu1 %v3593_v32, %s6730_s4  ;;  %v3098_v44 = vcombine.low %v2605_v4, %v2612_v21  ;;  %v3115_v13 = vcombine.low %v2633_v55, %v2640_v52  ;;  %v5563_v16 = vsel %vm2109_vm12, 1.0, %v6729_v15  ;;  %vm2047_vm12 = vmand %vm2028_vm6, %vm2037_vm5 }
 0x23c   : > { %v2661_v23 = vrot.slane %v5562_v50, %v7610_v20  ;;  %v2668_v32 = vrot.slane %v5562_v50, %v7615_v25  ;;  %v8014_v4 = vadd.s32 8, %v7586_v24 }
 0x23d   : > { %v3277_v31 = vmul.f32 %v3080_v8, %v2849_v27  ;;  %v3106_v53 = vrot.slane %v3098_v44, %v7627_v42  ;;  %v2675_v27 = vrot.slane %v5562_v50, %v7630_v39  ;;  %v3123_v28 = vrot.slane %v3115_v13, %v7627_v42 }
 0x23e   : > { %v3594_v45 = vld [vmem:[#allocation3 + $0x53] sm:$0xff]  ;;  %vm2045_vm14 = vcmp.ge.s32.totalorder %v8014_v4, 0  ;;  %vm2085_vm15 = vcmp.lt.s32.totalorder %v8014_v4, 16  ;;  %v2689_v50 = vrot.slane %v5563_v16, %v7610_v20 }
 0x23f   : > { %3300 = vst.msk [vmem:[#allocation3 + $0x60] sm:$0xff] %vm270_vm0, %v3277_v31  ;;  %3510 = vrot.lane.b32.xlu0 %v7966_v37, %s6731_s6  ;;  %3726 = vrot.lane.b32.xlu1 %v3611_v34, %s6731_s6  ;;  %v7974_v40 = vpop.f32.mrb[32].mxu0  ;;  %v3612_v26 = vld [vmem:[#allocation3 + $0x54] sm:$0xff]  ;;  %v3114_v10 = vcombine.low %v3106_v53, %v3113_v56  ;;  %vm2071_vm1 = vmand %vm2028_vm6, %vm2045_vm14  ;;  %v2696_v53 = vrot.slane %v5563_v16, %v7615_v25 }
 0x240   : > { %v1940_v41 = vpop.f32.mrb[22].mxu1  ;;  %v6037_v11 = vpop.f32.mrb[33].mxu0  ;;  %v3378_v17 = vld [vmem:[#allocation3 + $0x51] sm:$0xff]  ;;  %v2703_v56 = vrot.slane %v5563_v16, %v7630_v39  ;;  %vm2111_vm10 = vmand %vm2071_vm1, %vm2085_vm15 }
 0x241   : > { %v6451_v2 = vadd.f32 %v1940_v41, %v7886_v60  ;;  %v6121_v12 = vpop.f32.mrb[23].mxu1  ;;  %v8018_v31 = vld [vmem:[#allocation3 + $0x52] sm:$0xff]  ;;  %v3132_v11 = vcombine.low %v2661_v23, %v2668_v32  ;;  %v5565_v13 = vsel %vm2111_vm10, 1.0, %v6729_v15  ;;  %vm2112_vm8 = vmand %vm2045_vm14, %vm2085_vm15 }
 0x242   : > { %v2724_v23 = vrot.slane %v5565_v13, %v7610_v20  ;;  %v2738_v32 = vrot.slane %v5565_v13, %v7630_v39  ;;  %vm2073_vm13 = vmand %vm2033_vm4, %vm2045_vm14 }
 0x243   : > { %v2850_v51 = vmax.f32 %v6451_v2, 0.0  ;;  %3440 = vrot.lane.b32.xlu1 %v3377_v49, %s6730_s4  ;;  %3656 = vrot.lane.b32.xlu0 %v3594_v45, %s6730_s4  ;;  %v3131_v2 = vcombine.low %v3123_v28, %v3130_v30  ;;  %v5564_v45 = vsel %vm2110_vm11, 1.0, %v6729_v15  ;;  %v3140_v0 = vrot.slane %v3132_v11, %v7627_v42  ;;  %vm8099_vm10 = vmand %vm2047_vm12, %vm2077_vm9 }
 0x244   : > { %v2710_v55 = vrot.slane %v5564_v45, %v7607_v19 }
 0x245   : > { %v3278_v60 = vmul.f32 %v3097_v9, %v2850_v51 }
 0x246   : > { %v3595_v29 = vld [vmem:[#allocation3 + $0x5b] sm:$0xff] }
 0x247   : > { %3301 = vst.msk [vmem:[#allocation3 + $0x68] sm:$0xff] %vm270_vm0, %v3278_v60  ;;  %3512 = vrot.lane.b32.xlu1 %v7989_v58, %s6731_s6  ;;  %3728 = vrot.lane.b32.xlu0 %v3612_v26, %s6731_s6  ;;  %v7999_v62 = vpop.f32.mrb[34].mxu0  ;;  %v3613_v33 = vld [vmem:[#allocation3 + $0x5c] sm:$0xff] }
 0x248   : > { %v1945_v63 = vpop.f32.mrb[24].mxu1  ;;  %v6040_v54 = vpop.f32.mrb[35].mxu0  ;;  %v3379_v12 = vld [vmem:[#allocation3 + $0x59] sm:$0xff] }
 0x249   : > { %v6452_v3 = vadd.f32 %v1945_v63, %v7916_v46  ;;  %v6124_v8 = vpop.f32.mrb[25].mxu1  ;;  %v2682_v46 = vrot.slane %v5563_v16, %v7607_v19  ;;  %v8044_v60 = vld [vmem:[#allocation3 + $0x5a] sm:$0xff] }
 0x24a   : > { %v3150_v8 = vcombine.low %v2703_v56, %v2710_v55 }
 0x24b   : > { %v2851_v22 = vmax.f32 %v6452_v3, 0.0  ;;  %3442 = vrot.lane.b32.xlu0 %v3378_v17, %s6730_s4  ;;  %3658 = vrot.lane.b32.xlu1 %v3595_v29, %s6730_s4  ;;  %v3133_v44 = vcombine.low %v2675_v27, %v2682_v46  ;;  %v3149_v3 = vcombine.low %v2689_v50, %v2696_v53  ;;  %v8059_v29 = vadd.s32 9, %v7586_v24 }
 0x24d   : > { %v3279_v21 = vmul.f32 %v3114_v10, %v2851_v22  ;;  %v2717_v22 = vrot.slane %v5565_v13, %v7607_v19  ;;  %v3157_v46 = vrot.slane %v3149_v3, %v7627_v42  ;;  %vm2046_vm7 = vcmp.ge.s32.totalorder %v8059_v29, 0 }
 0x24e   : > { %v3596_v49 = vld [vmem:[#allocation3 + $0x63] sm:$0xff]  ;;  %vm2074_vm11 = vmand %vm2028_vm6, %vm2046_vm7  ;;  %vm2086_vm1 = vcmp.lt.s32.totalorder %v8059_v29, 16 }
 0x24f   : > { %3302 = vst.msk [vmem:[#allocation3 + $0x70] sm:$0xff] %vm270_vm0, %v3279_v21  ;;  %3514 = vrot.lane.b32.xlu0 %v8018_v31, %s6731_s6  ;;  %3730 = vrot.lane.b32.xlu1 %v3613_v33, %s6731_s6  ;;  %v8024_v59 = vpop.f32.mrb[36].mxu0  ;;  %v3614_v52 = vld [vmem:[#allocation3 + $0x64] sm:$0xff]  ;;  %v3164_v21 = vrot.slane %v3150_v8, %v7627_v42  ;;  %v3166_v11 = vcombine.low %v2717_v22, %v2724_v23  ;;  %vm8108_vm6 = vmand %vm2073_vm13, %vm2085_vm15 }
 0x250   : > { %v1950_v34 = vpop.f32.mrb[26].mxu1  ;;  %v6043_v41 = vpop.f32.mrb[37].mxu0  ;;  %v3380_v14 = vld [vmem:[#allocation3 + $0x61] sm:$0xff]  ;;  %vm2114_vm14 = vmand %vm2074_vm11, %vm2086_vm1  ;;  %v5567_v3 = vsel %vm8108_vm6, 1.0, %v6729_v15 }
 0x251   : > { %v6453_v47 = vadd.f32 %v1950_v34, %v7944_v1  ;;  %v6127_v9 = vpop.f32.mrb[27].mxu1  ;;  %v3147_v1 = vrot.slane %v3133_v44, %v7627_v42  ;;  %v8067_v28 = vld [vmem:[#allocation3 + $0x62] sm:$0xff]  ;;  %v8132_v8 = vsel %vm2114_vm14, 1.0, %v6729_v15  ;;  %vm2088_vm15 = vmand %vm2037_vm5, %vm2077_vm9  ;;  %v2773_v24 = vrot.slane %v5567_v3, %v7607_v19 }
 0x252   : > { %vm2115_vm5 = vmand %vm2046_vm7, %vm2086_vm1 }
 0x253   : > { %v2852_v35 = vmax.f32 %v6453_v47, 0.0  ;;  %3444 = vrot.lane.b32.xlu1 %v3379_v12, %s6730_s4  ;;  %3660 = vrot.lane.b32.xlu0 %v3596_v49, %s6730_s4  ;;  %v3148_v26 = vcombine.low %v3140_v0, %v3147_v1  ;;  %v5566_v12 = vsel %vm2112_vm8, 1.0, %v6729_v15  ;;  %v3174_v0 = vrot.slane %v3166_v11, %v7627_v42  ;;  %vm8194_vm9 = vmand %vm2033_vm4, %vm2046_vm7 }
 0x254   : > { %v2745_v5 = vrot.slane %v5566_v12, %v7607_v19  ;;  %v2752_v53 = vrot.slane %v5566_v12, %v7610_v20  ;;  %v2759_v56 = vrot.slane %v5566_v12, %v7615_v25  ;;  %v2766_v55 = vrot.slane %v5566_v12, %v7630_v39  ;;  %vm8221_vm4 = vmand %vm8194_vm9, %vm2086_vm1 }
 0x255   : > { %v3280_v51 = vmul.f32 %v3131_v2, %v2852_v35  ;;  %v3165_v2 = vcombine.low %v3157_v46, %v3164_v21  ;;  %v2787_v11 = vrot.slane %v8132_v8, %v7610_v20  ;;  %vm3310_vm8 = vcmask 257024  }
 0x256   : > { %v3597_v16 = vld [vmem:[#allocation3 + $0x6b] sm:$0xff]  ;;  %v3183_v22 = vcombine.low %v2745_v5, %v2752_v53  ;;  %v3184_v23 = vcombine.low %v2759_v56, %v2766_v55 }
 0x257   : > { %3303 = vst.msk [vmem:[#allocation3 + $0x78] sm:$0xff] %vm270_vm0, %v3280_v51  ;;  %3516 = vrot.lane.b32.xlu1 %v8044_v60, %s6731_s6  ;;  %3732 = vrot.lane.b32.xlu0 %v3614_v52, %s6731_s6  ;;  %v8052_v18 = vpop.f32.mrb[38].mxu0  ;;  %v3615_v30 = vld [vmem:[#allocation3 + $0x6c] sm:$0xff] }
 0x258   : > { %v1955_v57 = vpop.f32.mrb[28].mxu1  ;;  %v6046_v63 = vpop.f32.mrb[39].mxu0  ;;  %v3381_v49 = vld [vmem:[#allocation3 + $0x69] sm:$0xff]  ;;  %v3198_v12 = vrot.slane %v3184_v23, %v7627_v42 }
 0x259   : > { %v6454_v10 = vadd.f32 %v1955_v57, %v7974_v40  ;;  %v6130_v54 = vpop.f32.mrb[29].mxu1  ;;  %v2731_v40 = vrot.slane %v5565_v13, %v7615_v25  ;;  %v8117_v52 = vld [vmem:[#allocation3 + $0x6a] sm:$0xff]  ;;  %v5571_v13 = vld [vmem:[%s8821_s2 + $0x120] sm:$0xff] }
 0x25b   : > { %v2853_v17 = vmax.f32 %v6454_v10, 0.0  ;;  %3446 = vrot.lane.b32.xlu0 %v3380_v14, %s6730_s4  ;;  %3662 = vrot.lane.b32.xlu1 %v3597_v16, %s6730_s4  ;;  %v3167_v44 = vcombine.low %v2731_v40, %v2738_v32  ;;  %v5572_v14 = vld [vmem:[%s8821_s2 + $0x128] sm:$0xff] }
 0x25c   : > { %v8145_v40 = vpack.c.bf16 %v5572_v14, %v5571_v13 }
 0x25d   : > { %v3281_v27 = vmul.f32 %v3148_v26, %v2853_v17  ;;  %v3181_v1 = vrot.slane %v3167_v44, %v7627_v42  ;;  %v5541_v26 = vsel %vm8099_vm10, 1.0, %v6729_v15  ;;  %v2794_v44 = vrot.slane %v8132_v8, %v7615_v25 }
 0x25e   : > { %v3598_v45 = vld [vmem:[#allocation3 + $0x73] sm:$0xff]  ;;  %v2213_v46 = vrot.slane %v5541_v26, %v7607_v19  ;;  %v2220_v21 = vrot.slane %v5541_v26, %v7610_v20  ;;  %6381 = vmatprep.subr.bf16.mxu1 %v8145_v40 }
 0x25f   : > { %3304 = vst.msk [vmem:[#allocation3 + $0x80] sm:$0xff] %vm270_vm0, %v3281_v27  ;;  %3518 = vrot.lane.b32.xlu0 %v8067_v28, %s6731_s6  ;;  %3734 = vrot.lane.b32.xlu1 %v3615_v30, %s6731_s6  ;;  %v8077_v33 = vpop.f32.mrb[40].mxu0  ;;  %v3616_v57 = vld [vmem:[#allocation3 + $0x74] sm:$0xff]  ;;  %v3182_v10 = vcombine.low %v3174_v0, %v3181_v1  ;;  %v2227_v30 = vrot.slane %v5541_v26, %v7615_v25 }
 0x260   : > { %v1960_v34 = vpop.f32.mrb[30].mxu1  ;;  %v6049_v41 = vpop.f32.mrb[41].mxu0  ;;  %v3382_v32 = vld [vmem:[#allocation3 + $0x71] sm:$0xff]  ;;  %v3201_v53 = vcombine.low %v2787_v11, %v2794_v44 }
 0x261   : > { %v6455_v47 = vadd.f32 %v1960_v34, %v7999_v62  ;;  %v6133_v9 = vpop.f32.mrb[31].mxu1  ;;  %v2780_v41 = vrot.slane %v8132_v8, %v7607_v19 }
 0x262   : > { %v3191_v9 = vrot.slane %v3183_v22, %v7627_v42 }
 0x263   : > { %v2854_v35 = vmax.f32 %v6455_v47, 0.0  ;;  %3448 = vrot.lane.b32.xlu1 %v3381_v49, %s6730_s4  ;;  %3664 = vrot.lane.b32.xlu0 %v3598_v45, %s6730_s4  ;;  %v5542_v47 = vsel %vm2088_vm15, 1.0, %v6729_v15  ;;  %v8164_v49 = vld [vmem:[#allocation3 + $0x72] sm:$0xff]  ;;  %v3200_v1 = vcombine.low %v2773_v24, %v2780_v41 }
 0x264   : > { %v2241_v5 = vrot.slane %v5542_v47, %v7607_v19  ;;  %v2248_v56 = vrot.slane %v5542_v47, %v7610_v20  ;;  %v2255_v55 = vrot.slane %v5542_v47, %v7615_v25 }
 0x265   : > { %v3282_v51 = vmul.f32 %v3165_v2, %v2854_v35  ;;  %v2860_v35 = vcombine.low %v2213_v46, %v2220_v21  ;;  %v3208_v23 = vrot.slane %v3200_v1, %v7627_v42 }
 0x266   : > { %v3599_v27 = vld [vmem:[#allocation3 + $0x7b] sm:$0xff] }
 0x267   : > { %3305 = vst.msk [vmem:[#allocation3 + $0x88] sm:$0xff] %vm270_vm0, %v3282_v51  ;;  %3520 = vrot.lane.b32.xlu1 %v8117_v52, %s6731_s6  ;;  %3736 = vrot.lane.b32.xlu0 %v3616_v57, %s6731_s6  ;;  %v8123_v4 = vpop.f32.mrb[42].mxu0  ;;  %v3617_v45 = vld [vmem:[#allocation3 + $0x7c] sm:$0xff]  ;;  %v2262_v57 = vrot.slane %v5542_v47, %v7630_v39  ;;  %v2868_v14 = vrot.slane %v2860_v35, %v7627_v42 }
 0x268   : > { %v1965_v63 = vpop.f32.mrb[32].mxu1  ;;  %v6052_v54 = vpop.f32.mrb[43].mxu0  ;;  %v3383_v3 = vld [vmem:[#allocation3 + $0x79] sm:$0xff] }
 0x269   : > { %v6456_v16 = vadd.f32 %v1965_v63, %v8024_v59  ;;  %v6136_v17 = vpop.f32.mrb[33].mxu1  ;;  %v2234_v59 = vrot.slane %v5541_v26, %v7630_v39  ;;  %v3199_v63 = vcombine.low %v3191_v9, %v3198_v12  ;;  %v8205_v11 = vld [vmem:[#allocation3 + $0x7a] sm:$0xff] }
 0x26a   : > { %v8184_v17 = vsel %vm2115_vm5, 1.0, %v6729_v15 }
 0x26b   : > { %v2855_v34 = vmax.f32 %v6456_v16, 0.0  ;;  %3450 = vrot.lane.b32.xlu0 %v3382_v32, %s6730_s4  ;;  %3666 = vrot.lane.b32.xlu1 %v3599_v27, %s6730_s4  ;;  %v2861_v62 = vcombine.low %v2227_v30, %v2234_v59  ;;  %v2877_v32 = vcombine.low %v2241_v5, %v2248_v56  ;;  %v2878_v27 = vcombine.low %v2255_v55, %v2262_v57 }
 0x26c   : > { %v2808_v24 = vrot.slane %v8184_v17, %v7607_v19  ;;  %v2815_v44 = vrot.slane %v8184_v17, %v7610_v20  ;;  %v2822_v47 = vrot.slane %v8184_v17, %v7615_v25  ;;  %v5570_v55 = vsel %vm8221_vm4, 1.0, %v6729_v15 }
 0x26d   : > { %v3283_v2 = vmul.f32 %v3182_v10, %v2855_v34  ;;  %v2875_v16 = vrot.slane %v2861_v62, %v7627_v42  ;;  %v2801_v34 = vrot.slane %v8132_v8, %v7630_v39  ;;  %v2885_v12 = vrot.slane %v2877_v32, %v7627_v42 }
 0x26e   : > { %v3600_v13 = vld [vmem:[#allocation3 + $0x83] sm:$0xff]  ;;  %v3218_v56 = vcombine.low %v2815_v44, %v2822_v47 }
 0x26f   : > { %3306 = vst.msk [vmem:[#allocation3 + $0x90] sm:$0xff] %vm270_vm0, %v3283_v2  ;;  %3522 = vrot.lane.b32.xlu0 %v8164_v49, %s6731_s6  ;;  %3738 = vrot.lane.b32.xlu1 %v3617_v45, %s6731_s6  ;;  %v8170_v0 = vpop.f32.mrb[44].mxu0  ;;  %v2876_v6 = vcombine.low %v2868_v14, %v2875_v16  ;;  %v2892_v45 = vrot.slane %v2878_v27, %v7627_v42 }
 0x270   : > { %v1970_v50 = vpop.f32.mrb[34].mxu1  ;;  %v6055_v51 = vpop.f32.mrb[45].mxu0  ;;  %v3217_v5 = vcombine.low %v2801_v34, %v2808_v24  ;;  %v2829_v14 = vrot.slane %v8184_v17, %v7630_v39  ;;  %v2836_v16 = vrot.slane %v5570_v55, %v7607_v19  ;;  %v3232_v46 = vrot.slane %v3218_v56, %v7627_v42  ;;  %v5575_v19 = vld [vmem:[%s8821_s2 + $0x140] sm:$0xff]  ;;  %v5576_v39 = vld [vmem:[%s8821_s2 + $0x148] sm:$0xff] }
 0x271   : > { %v6457_v26 = vadd.f32 %v1970_v50, %v8052_v18  ;;  %v6139_v10 = vpop.f32.mrb[35].mxu1  ;;  %v3641_v54 = vpop.permute.xlu0 %3640  ;;  %v3215_v18 = vrot.slane %v3201_v53, %v7627_v42  ;;  %v6388_v2 = vpack.c.bf16 %v5576_v39, %v5575_v19  ;;  %v5580_v55 = vld [vmem:[%s8821_s2 + $0x168] sm:$0xff] }
 0x272   : > { %v3766_v30 = vsel %vm270_vm0, %v7782_v48, %v3641_v54  ;;  %v8215_v48 = vld [vmem:[#allocation3 + $0x84] sm:$0xff]  ;;  %v2893_v10 = vcombine.low %v2885_v12, %v2892_v45  ;;  %v3234_v24 = vcombine.low %v2829_v14, %v2836_v16  ;;  %v5582_v14 = vld [vmem:[%s8821_s2 + $0x178] sm:$0xff] }
 0x273   : > { %v2856_v22 = vmax.f32 %v6457_v26, 0.0  ;;  %3452 = vrot.lane.b32.xlu1 %v3383_v3, %s6730_s4  ;;  %3668 = vrot.lane.b32.xlu0 %v3600_v13, %s6730_s4  ;;  %v3216_v62 = vcombine.low %v3208_v23, %v3215_v18  ;;  %v3384_v26 = vld [vmem:[#allocation3 + $0x81] sm:$0xff]  ;;  %v3225_v13 = vrot.slane %v3217_v5, %v7627_v42 }
 0x274   : > { %v3241_v45 = vrot.slane %v3234_v24, %v7627_v42  ;;  %v3354_v16 = vld [vmem:[#allocation3 + $0x20] sm:$0xff] }
 0x275   : > { %v3284_v21 = vmul.f32 %v3199_v63, %v2856_v22  ;;  %v3713_v59 = vpop.permute.xlu0 %3712  ;;  %v5574_v63 = vld [vmem:[%s8821_s2 + $0x138] sm:$0xff] }
 0x276   : > { %v3784_v41 = vsel %vm639_vm2, %v3766_v30, %v3713_v59  ;;  %v3601_v53 = vld [vmem:[#allocation3 + $0x8b] sm:$0xff]  ;;  %v8257_v59 = vld [vmem:[#allocation3 + $0x82] sm:$0xff] }
 0x277   : > { %3307 = vst.msk [vmem:[#allocation3 + $0x98] sm:$0xff] %vm270_vm0, %v3284_v21  ;;  %6173 = vmatprep.mubr.msk.f32.mxu1 %vm942_vm3, %v3784_v41  ;;  %3524 = vrot.lane.b32.xlu1 %v8205_v11, %s6731_s6  ;;  %v1875_v8 = vpop.f32.mrb[0].mxu0  ;;  %v8252_v27 = vld [vmem:[#allocation3 + $0x8c] sm:$0xff] }
 0x278   : > { %3740 = vrot.lane.b32.xlu0 %v8215_v48, %s6731_s6  ;;  %v2837_v20 = vmax.f32 %v1875_v8, 0.0  ;;  %v1975_v25 = vpop.f32.mrb[36].mxu1  ;;  %v6082_v9 = vpop.f32.mrb[1].mxu0  ;;  %v3385_v47 = vld [vmem:[#allocation3 + $0x89] sm:$0xff] }
 0x279   : > { %v6458_v35 = vadd.f32 %v1975_v25, %v8077_v33  ;;  %v6142_v29 = vpop.f32.mrb[37].mxu1  ;;  %v8230_v1 = vpop.permute.xlu0 %3426  ;;  %v5573_v33 = vld [vmem:[%s8821_s2 + $0x130] sm:$0xff] }
 0x27a   : > { %v3265_v50 = vmul.f32 %v2876_v6, %v2837_v20  ;;  %v3643_v51 = vpop.permute.xlu1 %3642  ;;  %v6384_v21 = vpack.c.bf16 %v5574_v63, %v5573_v33  ;;  %v3233_v6 = vcombine.low %v3225_v13, %v3232_v46  ;;  %v5577_v25 = vld [vmem:[%s8821_s2 + $0x150] sm:$0xff] }
 0x27b   : > { %v2857_v57 = vmax.f32 %v6458_v35, 0.0  ;;  %3670 = vrot.lane.b32.xlu1 %v3601_v53, %s6730_s4  ;;  %v3767_v22 = vsel %vm270_vm0, %v7807_v7, %v3643_v51  ;;  %v8290_v51 = vld [vmem:[#allocation3 + $0x8a] sm:$0xff] }
 0x27c   : > { %3288 = vst.msk [vmem:[#allocation3] sm:$0xff] %vm270_vm0, %v3265_v50  ;;  %3454 = vrot.lane.b32.xlu0 %v3384_v26, %s6730_s4  ;;  %v5581_v13 = vld [vmem:[%s8821_s2 + $0x170] sm:$0xff] }
 0x27d   : > { %v3285_v54 = vmul.f32 %v3216_v62, %v2857_v57  ;;  %v8244_v3 = vpop.permute.xlu0 %3498  ;;  %v1880_v15 = vpop.f32.mrb[2].mxu0 }
 0x27e   : > { %v3715_v23 = vpop.permute.xlu1 %3714  ;;  %v2838_v18 = vmax.f32 %v1880_v15, 0.0  ;;  %v6085_v32 = vpop.f32.mrb[3].mxu0  ;;  %v3602_v20 = vld [vmem:[#allocation3 + $0x93] sm:$0xff] }
 0x27f   : > { %3308 = vst.msk [vmem:[#allocation3 + $0xa0] sm:$0xff] %vm270_vm0, %v3285_v54  ;;  %v3785_v30 = vsel %vm639_vm2, %v3767_v22, %v3715_v23  ;;  %3742 = vrot.lane.b32.xlu1 %v8252_v27, %s6731_s6 }
 0x280   : > { %v3266_v7 = vmul.f32 %v2893_v10, %v2838_v18  ;;  %6174 = vmatmul.mubr.msk.f32.vlgmr.msra.gmra.mrb[42].mxu1 %vm942_vm3, %v3785_v30  ;;  %3526 = vrot.lane.b32.xlu0 %v8257_v59, %s6731_s6  ;;  %v6400_v30 = vpack.c.bf16 %v5582_v14, %v5581_v13 }
 0x281   : > { %v1980_v17 = vpop.f32.mrb[38].mxu1  ;;  %v3645_v34 = vpop.permute.xlu0 %3644  ;;  %6383 = vmatpush3.bf16.msra.mxu1 %v8145_v40  ;;  %v5578_v40 = vld [vmem:[%s8821_s2 + $0x158] sm:$0xff] }
 0x282   : > { %3289 = vst.msk [vmem:[#allocation3 + $0x8] sm:$0xff] %vm270_vm0, %v3266_v7  ;;  %v6459_v41 = vadd.f32 %v1980_v17, %v8123_v4  ;;  %v8273_v44 = vpop.permute.xlu1 %3428  ;;  %v6145_v8 = vpop.f32.mrb[39].mxu1  ;;  %6385 = vmatprep.subr.bf16.mxu1 %v6384_v21  ;;  %v3768_v4 = vsel %vm270_vm0, %v7833_v36, %v3645_v34  ;;  %v6392_v56 = vpack.c.bf16 %v5578_v40, %v5577_v25  ;;  %v8295_v36 = vld [vmem:[#allocation3 + $0x94] sm:$0xff] }
 0x283   : > { %3456 = vrot.lane.b32.xlu1 %v3385_v47, %s6730_s4  ;;  %v5595_v7 = vld [vmem:[%s8821_s2 + $0x1e0] sm:$0xff]  ;;  %v3355_v47 = vld [vmem:[#allocation3 + $0x28] sm:$0xff] }
 0x284   : > { %v2858_v9 = vmax.f32 %v6459_v41, 0.0  ;;  %3672 = vrot.lane.b32.xlu0 %v3602_v20, %s6730_s4 }
 0x285   : > { %v1985_v12 = vpop.f32.mrb[40].mxu1  ;;  %v3717_v35 = vpop.permute.xlu0 %3716  ;;  %6387 = vmatpush3.bf16.msra.mxu1 %v6384_v21 }
 0x286   : > { %v3286_v62 = vmul.f32 %v3233_v6, %v2858_v9  ;;  %v6460_v29 = vadd.f32 %v1985_v12, %v8170_v0  ;;  %v8287_v5 = vpop.permute.xlu1 %3500  ;;  %v3786_v50 = vsel %vm639_vm2, %v3768_v4, %v3717_v35  ;;  %v6148_v53 = vpop.f32.mrb[41].mxu1  ;;  %6389 = vmatprep.subr.bf16.mxu1 %v6388_v2  ;;  %v5579_v0 = vld [vmem:[%s8821_s2 + $0x160] sm:$0xff]  ;;  %v4256_v6 = vld [vmem:[#allocation3 + $0x26] sm:$0xff] }
 0x287   : > { %6176 = vmatprep.mubr.msk.f32.mxu1 %vm942_vm3, %v3786_v50  ;;  %3528 = vrot.lane.b32.xlu1 %v8290_v51, %s6731_s6  ;;  %v3603_v54 = vld [vmem:[#allocation3 + $0x9b] sm:$0xff]  ;;  %v6396_v15 = vpack.c.bf16 %v5580_v55, %v5579_v0  ;;  %v4242_v0 = vld [vmem:[#allocation3 + $0x45] sm:$0xff] }
 0x288   : > { %3309 = vst.msk [vmem:[#allocation3 + $0xa8] sm:$0xff] %vm270_vm0, %v3286_v62  ;;  %v2859_v57 = vmax.f32 %v6460_v29, 0.0  ;;  %3744 = vrot.lane.b32.xlu0 %v8295_v36, %s6731_s6  ;;  %v8320_v21 = vld [vmem:[#allocation3 + $0x9c] sm:$0xff]  ;;  %v4257_v62 = vld [vmem:[#allocation3 + $0x2e] sm:$0xff] }
 0x289   : > { %v3431_v26 = vpop.permute.xlu0 %3430  ;;  %v3368_v33 = vld [vmem:[#allocation3 + $0x1] sm:$0xff]  ;;  %6391 = vmatpush3.bf16.msra.mxu1 %v6388_v2  ;;  %v3369_v24 = vld [vmem:[#allocation3 + $0x9] sm:$0xff]  ;;  %v4240_v9 = vld [vmem:[#allocation3 + $0x35] sm:$0xff] }
 0x28a   : > { %v3287_v63 = vmul.f32 %v3241_v45, %v2859_v57  ;;  %v3647_v10 = vpop.permute.xlu1 %3646  ;;  %6393 = vmatprep.subr.bf16.mxu1 %v6392_v56  ;;  %v3552_v22 = vsel %vm270_vm0, %v3354_v16, %v3431_v26  ;;  %v3386_v39 = vld [vmem:[#allocation3 + $0x2] sm:$0xff]  ;;  %v3387_v25 = vld [vmem:[#allocation3 + $0xa] sm:$0xff]  ;;  %v4258_v29 = vld [vmem:[#allocation3 + $0x36] sm:$0xff] }
 0x28b   : > { %3674 = vrot.lane.b32.xlu1 %v3603_v54, %s6730_s4  ;;  %v3769_v18 = vsel %vm270_vm0, %v7865_v61, %v3647_v10  ;;  %v5596_v61 = vld [vmem:[%s8821_s2 + $0x1e8] sm:$0xff]  ;;  %v4243_v16 = vld [vmem:[#allocation3 + $0x4d] sm:$0xff] }
 0x28c   : > { %3311 = vst.msk [vmem:[#allocation3 + $0xb0] sm:$0xf] %vm3310_vm8, %v3287_v63  ;;  %3422 = vrot.lane.b32.xlu0 %v3368_v33, %s6730_s4  ;;  %v8335_v41 = vpack.c.bf16 %v5596_v61, %v5595_v7  ;;  %v4259_v10 = vld [vmem:[#allocation3 + $0x3e] sm:$0xff]  ;;  %v4262_v61 = vld [vmem:[#allocation3 + $0x56] sm:$0xff] }
 0x28d   : > { %v3503_v23 = vpop.permute.xlu0 %3502  ;;  %6395 = vmatpush3.bf16.msra.mxu1 %v6392_v56  ;;  %v4241_v56 = vld [vmem:[#allocation3 + $0x3d] sm:$0xff] }
 0x28e   : > { %v8318_v32 = vsel %vm639_vm2, %v3552_v22, %v3503_v23  ;;  %v3719_v46 = vpop.permute.xlu1 %3718  ;;  %6397 = vmatprep.subr.bf16.mxu1 %v6396_v15  ;;  %v3357_v22 = vld [vmem:[#allocation3 + $0x38] sm:$0xff] }
 0x28f   : > { %v3787_v19 = vsel %vm639_vm2, %v3769_v18, %v3719_v46  ;;  %3746 = vrot.lane.b32.xlu1 %v8320_v21, %s6731_s6 }
 0x290   : > { %6177 = vmatmul.mubr.msk.f32.gmra.mrb[44].mxu1 %vm942_vm3, %v3787_v19  ;;  %3494 = vrot.lane.b32.xlu0 %v3386_v39, %s6731_s6  ;;  %v4261_v39 = vld [vmem:[#allocation3 + $0x4e] sm:$0xff] }
 0x291   : > { %v8333_v17 = vpop.permute.xlu0 %4292  ;;  %6399 = vmatpush3.bf16.msra.mxu1 %v6396_v15  ;;  %v4260_v15 = vld [vmem:[#allocation3 + $0x46] sm:$0xff] }
 0x292   : > { %v3433_v34 = vpop.permute.xlu1 %3432  ;;  %6401 = vmatprep.subr.bf16.mxu1 %v6400_v30 }
 0x293   : > { %3424 = vrot.lane.b32.xlu1 %v3369_v24, %s6730_s4  ;;  %v3553_v2 = vsel %vm270_vm0, %v3355_v47, %v3433_v34  ;;  %v3358_v47 = vld [vmem:[#allocation3 + $0x40] sm:$0xff] }
 0x294   : > { %4364 = vrot.lane.b32.xlu0 %v4256_v6, %s6731_s6  ;;  %v4246_v6 = vld [vmem:[#allocation3 + $0x65] sm:$0xff] }
 0x295   : > { %v3649_v8 = vpop.permute.xlu0 %3648  ;;  %6403 = vmatpush3.bf16.msra.mxu1 %v6400_v30 }
 0x296   : > { %v3505_v20 = vpop.permute.xlu1 %3504  ;;  %6405 = vmatprep.subr.bf16.mxu1 %v8335_v41  ;;  %v3770_v4 = vsel %vm270_vm0, %v7908_v43, %v3649_v8  ;;  %v3356_v43 = vld [vmem:[#allocation3 + $0x30] sm:$0xff] }
 0x297   : > { %v8342_v40 = vsel %vm639_vm2, %v3553_v2, %v3505_v20  ;;  %3496 = vrot.lane.b32.xlu1 %v3387_v25, %s6731_s6 }
 0x298   : > { %4296 = vrot.lane.b32.xlu0 %v4240_v9, %s6730_s4 }
 0x299   : > { %v3721_v12 = vpop.permute.xlu0 %3720 }
 0x29a   : > { %v8348_v45 = vpop.permute.xlu1 %4294  ;;  %v3788_v35 = vsel %vm639_vm2, %v3770_v4, %v3721_v12  ;;  %v4263_v4 = vld [vmem:[#allocation3 + $0x5e] sm:$0xff] }
 0x29b   : > { %6179 = vmatprep.mubr.msk.f32.mxu1 %vm942_vm3, %v3788_v35  ;;  %4366 = vrot.lane.b32.xlu1 %v4257_v62, %s6731_s6  ;;  %v4264_v35 = vld [vmem:[#allocation3 + $0x66] sm:$0xff] }
 0x29c   : > { %4368 = vrot.lane.b32.xlu0 %v4258_v29, %s6731_s6 }
 0x29d   : > { %v3435_v50 = vpop.permute.xlu0 %3434 }
 0x29e   : > { %v3651_v53 = vpop.permute.xlu1 %3650  ;;  %v3554_v55 = vsel %vm270_vm0, %v3356_v43, %v3435_v50  ;;  %v4247_v50 = vld [vmem:[#allocation3 + $0x6d] sm:$0xff] }
 0x29f   : > { %4298 = vrot.lane.b32.xlu1 %v4241_v56, %s6730_s4  ;;  %v3771_v26 = vsel %vm270_vm0, %v7934_v38, %v3651_v53  ;;  %v4244_v38 = vld [vmem:[#allocation3 + $0x55] sm:$0xff]  ;;  %v3359_v53 = vld [vmem:[#allocation3 + $0x48] sm:$0xff] }
 0x2a0   : > { %4300 = vrot.lane.b32.xlu0 %v4242_v0, %s6730_s4 }
 0x2a1   : > { %v3507_v57 = vpop.permute.xlu0 %3506 }
 0x2a2   : > { %v8360_v33 = vsel %vm639_vm2, %v3554_v55, %v3507_v57  ;;  %v3723_v63 = vpop.permute.xlu1 %3722 }
 0x2a3   : > { %v3789_v54 = vsel %vm639_vm2, %v3771_v26, %v3723_v63  ;;  %4370 = vrot.lane.b32.xlu1 %v4259_v10, %s6731_s6  ;;  %v4265_v26 = vld [vmem:[#allocation3 + $0x6e] sm:$0xff]  ;;  %v4266_v10 = vld [vmem:[#allocation3 + $0x76] sm:$0xff] }
 0x2a4   : > { %6180 = vmatmul.mubr.msk.f32.gmra.mrb[46].mxu1 %vm942_vm3, %v3789_v54  ;;  %4372 = vrot.lane.b32.xlu0 %v4260_v15, %s6731_s6 }
 0x2a5   : > { %v3653_v13 = vpop.permute.xlu0 %3652 }
 0x2a6   : > { %v3437_v14 = vpop.permute.xlu1 %3436  ;;  %v3772_v23 = vsel %vm270_vm0, %v7966_v37, %v3653_v13  ;;  %v4245_v37 = vld [vmem:[#allocation3 + $0x5d] sm:$0xff]  ;;  %v4250_v13 = vld [vmem:[#allocation3 + $0x85] sm:$0xff] }
 0x2a7   : > { %4302 = vrot.lane.b32.xlu1 %v4243_v16, %s6730_s4  ;;  %v3555_v46 = vsel %vm270_vm0, %v3357_v22, %v3437_v14  ;;  %v3360_v14 = vld [vmem:[#allocation3 + $0x50] sm:$0xff] }
 0x2a8   : > { %4304 = vrot.lane.b32.xlu0 %v4244_v38, %s6730_s4 }
 0x2a9   : > { %v3725_v18 = vpop.permute.xlu0 %3724 }
 0x2aa   : > { %v3509_v30 = vpop.permute.xlu1 %3508  ;;  %v3790_v19 = vsel %vm639_vm2, %v3772_v23, %v3725_v18 }
 0x2ab   : > { %v8373_v7 = vsel %vm639_vm2, %v3555_v46, %v3509_v30  ;;  %6182 = vmatprep.mubr.msk.f32.mxu1 %vm942_vm3, %v3790_v19  ;;  %4374 = vrot.lane.b32.xlu1 %v4261_v39, %s6731_s6  ;;  %v4267_v46 = vld [vmem:[#allocation3 + $0x7e] sm:$0xff]  ;;  %v4268_v19 = vld [vmem:[#allocation3 + $0x86] sm:$0xff] }
 0x2ac   : > { %4376 = vrot.lane.b32.xlu0 %v4262_v61, %s6731_s6 }
 0x2ad   : > { %v3439_v34 = vpop.permute.xlu0 %3438 }
 0x2ae   : > { %v3655_v24 = vpop.permute.xlu1 %3654  ;;  %v3556_v8 = vsel %vm270_vm0, %v3358_v47, %v3439_v34  ;;  %v4251_v34 = vld [vmem:[#allocation3 + $0x8d] sm:$0xff] }
 0x2af   : > { %4306 = vrot.lane.b32.xlu1 %v4245_v37, %s6730_s4  ;;  %v3773_v20 = vsel %vm270_vm0, %v7989_v58, %v3655_v24  ;;  %v4248_v58 = vld [vmem:[#allocation3 + $0x75] sm:$0xff] }
 0x2b0   : > { %4308 = vrot.lane.b32.xlu0 %v4246_v6, %s6730_s4  ;;  %v3361_v24 = vld [vmem:[#allocation3 + $0x58] sm:$0xff] }
 0x2b1   : > { %v3511_v2 = vpop.permute.xlu0 %3510 }
 0x2b2   : > { %v8384_v25 = vsel %vm639_vm2, %v3556_v8, %v3511_v2  ;;  %v3727_v9 = vpop.permute.xlu1 %3726 }
 0x2b3   : > { %v3791_v12 = vsel %vm639_vm2, %v3773_v20, %v3727_v9  ;;  %4378 = vrot.lane.b32.xlu1 %v4263_v4, %s6731_s6  ;;  %v4269_v20 = vld [vmem:[#allocation3 + $0x8e] sm:$0xff]  ;;  %v4270_v4 = vld [vmem:[#allocation3 + $0x96] sm:$0xff] }
 0x2b4   : > { %6183 = vmatmul.mubr.msk.f32.gmra.mrb[48].mxu1 %vm942_vm3, %v3791_v12  ;;  %4380 = vrot.lane.b32.xlu0 %v4264_v35, %s6731_s6 }
 0x2b5   : > { %v3657_v62 = vpop.permute.xlu0 %3656 }
 0x2b6   : > { %v3441_v29 = vpop.permute.xlu1 %3440  ;;  %v3774_v56 = vsel %vm270_vm0, %v8018_v31, %v3657_v62  ;;  %v4249_v31 = vld [vmem:[#allocation3 + $0x7d] sm:$0xff]  ;;  %v4254_v62 = vld [vmem:[#allocation3 + $0xa5] sm:$0xff] }
 0x2b7   : > { %4310 = vrot.lane.b32.xlu1 %v4247_v50, %s6730_s4  ;;  %v3557_v43 = vsel %vm270_vm0, %v3359_v53, %v3441_v29  ;;  %v3362_v29 = vld [vmem:[#allocation3 + $0x60] sm:$0xff] }
 0x2b8   : > { %4312 = vrot.lane.b32.xlu0 %v4248_v58, %s6730_s4 }
 0x2b9   : > { %v3729_v0 = vpop.permute.xlu0 %3728 }
 0x2ba   : > { %v3513_v55 = vpop.permute.xlu1 %3512  ;;  %v3792_v57 = vsel %vm639_vm2, %v3774_v56, %v3729_v0 }
 0x2bb   : > { %v8397_v63 = vsel %vm639_vm2, %v3557_v43, %v3513_v55  ;;  %6185 = vmatprep.mubr.msk.f32.mxu1 %vm942_vm3, %v3792_v57  ;;  %4382 = vrot.lane.b32.xlu1 %v4265_v26, %s6731_s6  ;;  %v4271_v43 = vld [vmem:[#allocation3 + $0x9e] sm:$0xff]  ;;  %v4272_v57 = vld [vmem:[#allocation3 + $0xa6] sm:$0xff] }
 0x2bc   : > { %4384 = vrot.lane.b32.xlu0 %v4266_v10, %s6731_s6 }
 0x2bd   : > { %v3443_v54 = vpop.permute.xlu0 %3442 }
 0x2be   : > { %v3659_v15 = vpop.permute.xlu1 %3658  ;;  %v3558_v16 = vsel %vm270_vm0, %v3360_v14, %v3443_v54  ;;  %v4255_v54 = vld [vmem:[#allocation3 + $0xad] sm:$0xff] }
 0x2bf   : > { %4314 = vrot.lane.b32.xlu1 %v4249_v31, %s6730_s4  ;;  %v3775_v22 = vsel %vm270_vm0, %v8044_v60, %v3659_v15  ;;  %v4252_v60 = vld [vmem:[#allocation3 + $0x95] sm:$0xff] }
 0x2c0   : > { %4316 = vrot.lane.b32.xlu0 %v4250_v13, %s6730_s4 }
 0x2c1   : > { %v3515_v38 = vpop.permute.xlu0 %3514 }
 0x2c2   : > { %v8408_v23 = vsel %vm639_vm2, %v3558_v16, %v3515_v38  ;;  %v3731_v18 = vpop.permute.xlu1 %3730  ;;  %v4273_v38 = vld [vmem:[#allocation3 + $0xae] sm:$0xff] }
 0x2c3   : > { %v3793_v30 = vsel %vm639_vm2, %v3775_v22, %v3731_v18  ;;  %4386 = vrot.lane.b32.xlu1 %v4267_v46, %s6731_s6 }
 0x2c4   : > { %6186 = vmatmul.mubr.msk.f32.gmra.mrb[50].mxu1 %vm942_vm3, %v3793_v30  ;;  %4388 = vrot.lane.b32.xlu0 %v4268_v19, %s6731_s6  ;;  %v3364_v30 = vld [vmem:[#allocation3 + $0x70] sm:$0xff] }
 0x2c5   : > { %v3661_v39 = vpop.permute.xlu0 %3660 }
 0x2c6   : > { %v3445_v61 = vpop.permute.xlu1 %3444  ;;  %v3776_v37 = vsel %vm270_vm0, %v8067_v28, %v3661_v39  ;;  %v4253_v28 = vld [vmem:[#allocation3 + $0x9d] sm:$0xff] }
 0x2c7   : > { %4318 = vrot.lane.b32.xlu1 %v4251_v34, %s6730_s4  ;;  %v3559_v47 = vsel %vm270_vm0, %v3361_v24, %v3445_v61 }
 0x2c8   : > { %4320 = vrot.lane.b32.xlu0 %v4252_v60, %s6730_s4 }
 0x2c9   : > { %v3733_v6 = vpop.permute.xlu0 %3732 }
 0x2ca   : > { %v3517_v8 = vpop.permute.xlu1 %3516  ;;  %v3794_v2 = vsel %vm639_vm2, %v3776_v37, %v3733_v6 }
 0x2cb   : > { %v8421_v9 = vsel %vm639_vm2, %v3559_v47, %v3517_v8  ;;  %6188 = vmatprep.mubr.msk.f32.mxu1 %vm942_vm3, %v3794_v2  ;;  %4390 = vrot.lane.b32.xlu1 %v4269_v20, %s6731_s6 }
 0x2cc   : > { %4392 = vrot.lane.b32.xlu0 %v4270_v4, %s6731_s6 }
 0x2cd   : > { %v3447_v12 = vpop.permute.xlu0 %3446 }
 0x2ce   : > { %v3663_v35 = vpop.permute.xlu1 %3662  ;;  %v3560_v50 = vsel %vm270_vm0, %v3362_v29, %v3447_v12  ;;  %v3584_v29 = vld [vmem:[#allocation3 + $0x92] sm:$0xff] }
 0x2cf   : > { %4322 = vrot.lane.b32.xlu1 %v4253_v28, %s6730_s4  ;;  %v3777_v53 = vsel %vm270_vm0, %v8117_v52, %v3663_v35  ;;  %v3363_v52 = vld [vmem:[#allocation3 + $0x68] sm:$0xff] }
 0x2d0   : > { %4324 = vrot.lane.b32.xlu0 %v4254_v62, %s6730_s4 }
 0x2d1   : > { %v3519_v58 = vpop.permute.xlu0 %3518 }
 0x2d2   : > { %v8432_v56 = vsel %vm639_vm2, %v3560_v50, %v3519_v58  ;;  %v3735_v0 = vpop.permute.xlu1 %3734 }
 0x2d3   : > { %v3795_v55 = vsel %vm639_vm2, %v3777_v53, %v3735_v0  ;;  %4394 = vrot.lane.b32.xlu1 %v4271_v43, %s6731_s6 }
 0x2d4   : > { %6189 = vmatmul.mubr.msk.f32.gmra.mrb[52].mxu1 %vm942_vm3, %v3795_v55  ;;  %4396 = vrot.lane.b32.xlu0 %v4272_v57, %s6731_s6  ;;  %v3585_v55 = vld [vmem:[#allocation3 + $0x9a] sm:$0xff] }
 0x2d5   : > { %v3665_v26 = vpop.permute.xlu0 %3664  ;;  %v3350_v57 = vld [vmem:[#allocation3] sm:$0xff] }
 0x2d6   : > { %v3449_v10 = vpop.permute.xlu1 %3448  ;;  %v3778_v15 = vsel %vm270_vm0, %v8164_v49, %v3665_v26 }
 0x2d7   : > { %4326 = vrot.lane.b32.xlu1 %v4255_v54, %s6730_s4  ;;  %v3561_v13 = vsel %vm270_vm0, %v3363_v52, %v3449_v10  ;;  %s8757_s4 = scalar_lea.hbm %s8822_s3, %s5665_s16 }
 0x2d9   : > { %v3737_v31 = vpop.permute.xlu0 %3736 }
 0x2da   : > { %v3521_v14 = vpop.permute.xlu1 %3520  ;;  %v3796_v16 = vsel %vm639_vm2, %v3778_v15, %v3737_v31 }
 0x2db   : > { %v8444_v22 = vsel %vm639_vm2, %v3561_v13, %v3521_v14  ;;  %6191 = vmatprep.mubr.msk.f32.mxu1 %vm942_vm3, %v3796_v16  ;;  %4398 = vrot.lane.b32.xlu1 %v4273_v38, %s6731_s6  ;;  %v5597_v16 = vld [vmem:[%s8821_s2 + $0x1f0] sm:$0xff]  ;;  %v5598_v38 = vld [vmem:[%s8821_s2 + $0x1f8] sm:$0xff]  ;;  %s8767_s6 = scalar_lea.sflag [#allocation5], %s234_s7 }
 0x2dd   : > { %v3451_v18 = vpop.permute.xlu0 %3450 }
 0x2de   : > { %v3667_v46 = vpop.permute.xlu1 %3666  ;;  %v3562_v19 = vsel %vm270_vm0, %v3364_v30, %v3451_v18  ;;  %v3351_v18 = vld [vmem:[#allocation3 + $0x8] sm:$0xff] }
 0x2df   : > { %v3779_v39 = vsel %vm270_vm0, %v8205_v11, %v3667_v46  ;;  %v3352_v46 = vld [vmem:[#allocation3 + $0x10] sm:$0xff] }
 0x2e1   : > { %v3523_v49 = vpop.permute.xlu0 %3522 }
 0x2e2   : > { %v8452_v61 = vsel %vm639_vm2, %v3562_v19, %v3523_v49  ;;  %v3739_v34 = vpop.permute.xlu1 %3738 }
 0x2e3   : > { %v3797_v60 = vsel %vm639_vm2, %v3779_v39, %v3739_v34  ;;  %v6408_v39 = vpack.c.bf16 %v5598_v38, %v5597_v16  ;;  %v3550_v34 = vsel %vm270_vm0, %v3352_v46, %v8230_v1  ;;  %v4221_v16 = vld [vmem:[#allocation3 + $0x2c] sm:$0xff] }
 0x2e4   : > { %6192 = vmatmul.mubr.msk.f32.gmra.mrb[54].mxu1 %vm942_vm3, %v3797_v60  ;;  %v4419_v38 = vsel %vm270_vm0, %v4221_v16, %v8348_v45 }
 0x2e5   : > { %v3669_v24 = vpop.permute.xlu0 %3668 }
 0x2e6   : > { %v8456_v37 = vpop.permute.xlu1 %3452  ;;  %v3780_v6 = vsel %vm270_vm0, %v8257_v59, %v3669_v24  ;;  %v5599_v24 = vld [vmem:[%s8821_s2 + $0x200] sm:$0xff] }
 0x2ea   : > { %v8460_v47 = vpop.permute.xlu1 %3524  ;;  %v3741_v8 = vpop.permute.xlu0 %3740 }
 0x2eb   : > { %v3798_v2 = vsel %vm639_vm2, %v3780_v6, %v3741_v8  ;;  %v5600_v6 = vld [vmem:[%s8821_s2 + $0x208] sm:$0xff]  ;;  %v3568_v8 = vsel %vm639_vm2, %v3550_v34, %v8244_v3  ;;  %v5601_v3 = vld [vmem:[%s8821_s2 + $0x210] sm:$0xff] }
 0x2ec   : > { %6194 = vmatprep.mubr.msk.f32.mxu1 %vm942_vm3, %v3798_v2  ;;  %v3353_v2 = vld [vmem:[#allocation3 + $0x18] sm:$0xff] }
 0x2ed   : > { %v3551_v1 = vsel %vm270_vm0, %v3353_v2, %v8273_v44  ;;  %v4226_v2 = vld [vmem:[#allocation3 + $0x54] sm:$0xff] }
 0x2ee   : > { %v8464_v11 = vpop.permute.xlu0 %3454  ;;  %v3671_v20 = vpop.permute.xlu1 %3670 }
 0x2ef   : > { %v3781_v4 = vsel %vm270_vm0, %v8290_v51, %v3671_v20 }
 0x2f2   : > { %v8468_v12 = vpop.permute.xlu0 %3526  ;;  %v3743_v35 = vpop.permute.xlu1 %3742 }
 0x2f3   : > { %v3799_v28 = vsel %vm639_vm2, %v3781_v4, %v3743_v35  ;;  %v6412_v35 = vpack.c.bf16 %v5600_v6, %v5599_v24  ;;  %v4225_v6 = vld [vmem:[#allocation3 + $0x4c] sm:$0xff] }
 0x2f4   : > { %6195 = vmatmul.mubr.msk.f32.gmra.mrb[56].mxu1 %vm942_vm3, %v3799_v28  ;;  %v3569_v28 = vsel %vm639_vm2, %v3551_v1, %v8287_v5 }
 0x2f6   : > { %v8472_v59 = vpop.permute.xlu1 %3456  ;;  %v3673_v62 = vpop.permute.xlu0 %3672 }
 0x2f7   : > { %v3782_v50 = vsel %vm270_vm0, %v3584_v29, %v3673_v62  ;;  %v5603_v29 = vld [vmem:[%s8821_s2 + $0x220] sm:$0xff] }
 0x2fa   : > { %v8475_v58 = vpop.permute.xlu1 %3528  ;;  %v3745_v53 = vpop.permute.xlu0 %3744 }
 0x2fb   : > { %v3800_v0 = vsel %vm639_vm2, %v3782_v50, %v3745_v53  ;;  %v5604_v50 = vld [vmem:[%s8821_s2 + $0x228] sm:$0xff] }
 0x2fc   : > { %6197 = vmatprep.mubr.msk.f32.mxu1 %vm942_vm3, %v3800_v0  ;;  %v6420_v0 = vpack.c.bf16 %v5604_v50, %v5603_v29 }
 0x2fe   : > { %v3675_v51 = vpop.permute.xlu1 %3674  ;;  %v3423_v43 = vpop.permute.xlu0 %3422 }
 0x2ff   : > { %v3783_v26 = vsel %vm270_vm0, %v3585_v55, %v3675_v51  ;;  %v3548_v10 = vsel %vm270_vm0, %v3350_v57, %v3423_v43  ;;  %v5605_v51 = vld [vmem:[%s8821_s2 + $0x230] sm:$0xff]  ;;  %v5606_v43 = vld [vmem:[%s8821_s2 + $0x238] sm:$0xff] }
 0x300   : > { %v6424_v55 = vpack.c.bf16 %v5606_v43, %v5605_v51  ;;  %v4230_v51 = vld [vmem:[#allocation3 + $0x74] sm:$0xff] }
 0x302   : > { %v3747_v54 = vpop.permute.xlu1 %3746  ;;  %v3495_v52 = vpop.permute.xlu0 %3494 }
 0x303   : > { %v3801_v15 = vsel %vm639_vm2, %v3783_v26, %v3747_v54  ;;  %v3566_v31 = vsel %vm639_vm2, %v3548_v10, %v3495_v52  ;;  %v3366_v10 = vld [vmem:[#allocation3 + $0x80] sm:$0xff] }
 0x304   : > { %6198 = vmatmul.mubr.msk.f32.gmra.mrb[58].mxu1 %vm942_vm3, %v3801_v15 }
 0x305   : > { %6224 = vmatprep.mubr.msk.f32.mxu1 %vm942_vm3, %v3566_v31 }
 0x306   : > { %v3425_v13 = vpop.permute.xlu1 %3424  ;;  %v8485_v14 = vpop.permute.xlu0 %4364 }
 0x307   : > { %v3549_v30 = vsel %vm270_vm0, %v3351_v18, %v3425_v13 }
 0x30a   : > { %v3497_v19 = vpop.permute.xlu1 %3496  ;;  %v8494_v49 = vpop.permute.xlu0 %4296 }
 0x30b   : > { %v3567_v60 = vsel %vm639_vm2, %v3549_v30, %v3497_v19  ;;  %v4223_v30 = vld [vmem:[#allocation3 + $0x3c] sm:$0xff]  ;;  %v4224_v19 = vld [vmem:[#allocation3 + $0x44] sm:$0xff] }
 0x30c   : > { %6225 = vmatmul.mubr.msk.f32.vlgmr.msra.gmra.mrb[42].mxu1 %vm942_vm3, %v3567_v60 }
 0x30d   : > { %6407 = vmatpush3.bf16.msra.mxu1 %v8335_v41  ;;  %6227 = vmatprep.mubr.msk.f32.mxu1 %vm942_vm3, %v3568_v8  ;;  %v5602_v41 = vld [vmem:[%s8821_s2 + $0x218] sm:$0xff] }
 0x30e   : > { %v8512_v20 = vpop.permute.xlu1 %4366  ;;  %v8514_v4 = vpop.permute.xlu0 %4368  ;;  %6409 = vmatprep.subr.bf16.mxu1 %v6408_v39  ;;  %v6416_v5 = vpack.c.bf16 %v5602_v41, %v5601_v3  ;;  %v4227_v3 = vld [vmem:[#allocation3 + $0x5c] sm:$0xff] }
 0x310   : > { %6228 = vmatmul.mubr.msk.f32.gmra.mrb[44].mxu1 %vm942_vm3, %v3569_v28 }
 0x311   : > { %6230 = vmatprep.mubr.msk.f32.mxu1 %vm942_vm3, %v8318_v32  ;;  %6411 = vmatpush3.bf16.msra.mxu1 %v6408_v39 }
 0x312   : > { %v8527_v44 = vpop.permute.xlu1 %4298  ;;  %v8529_v62 = vpop.permute.xlu0 %4300  ;;  %6413 = vmatprep.subr.bf16.mxu1 %v6412_v35 }
 0x313   : > { %v4421_v45 = vsel %vm270_vm0, %v4223_v30, %v8527_v44  ;;  %v4228_v44 = vld [vmem:[#allocation3 + $0x64] sm:$0xff] }
 0x314   : > { %6231 = vmatmul.mubr.msk.f32.gmra.mrb[46].mxu1 %vm942_vm3, %v8342_v40 }
 0x315   : > { %6233 = vmatprep.mubr.msk.f32.mxu1 %vm942_vm3, %v8360_v33  ;;  %6415 = vmatpush3.bf16.msra.mxu1 %v6412_v35 }
 0x316   : > { %v8541_v32 = vpop.permute.xlu1 %4370  ;;  %v8543_v53 = vpop.permute.xlu0 %4372  ;;  %6417 = vmatprep.subr.bf16.mxu1 %v6416_v5 }
 0x317   : > { %v4439_v60 = vsel %vm639_vm2, %v4421_v45, %v8541_v32  ;;  %v4683_v45 = vld [vmem:[#allocation2 + $0x3d] sm:$0xff] }
 0x318   : > { %6234 = vmatmul.mubr.msk.f32.gmra.mrb[48].mxu1 %vm942_vm3, %v8373_v7 }
 0x319   : > { %6236 = vmatprep.mubr.msk.f32.mxu1 %vm942_vm3, %v8384_v25  ;;  %6419 = vmatpush3.bf16.msra.mxu1 %v6416_v5 }
 0x31a   : > { %v4303_v40 = vpop.permute.xlu1 %4302  ;;  %v4305_v33 = vpop.permute.xlu0 %4304  ;;  %6421 = vmatprep.subr.bf16.mxu1 %v6420_v0 }
 0x31b   : > { %v4423_v8 = vsel %vm270_vm0, %v4225_v6, %v4303_v40 }
 0x31c   : > { %6237 = vmatmul.mubr.msk.f32.gmra.mrb[50].mxu1 %vm942_vm3, %v8397_v63  ;;  %v3365_v63 = vld [vmem:[#allocation3 + $0x78] sm:$0xff] }
 0x31d   : > { %6239 = vmatprep.mubr.msk.f32.mxu1 %vm942_vm3, %v8408_v23  ;;  %6423 = vmatpush3.bf16.msra.mxu1 %v6420_v0  ;;  %v3563_v23 = vsel %vm270_vm0, %v3365_v63, %v8456_v37 }
 0x31e   : > { %v4375_v57 = vpop.permute.xlu1 %4374  ;;  %v4377_v26 = vpop.permute.xlu0 %4376  ;;  %6425 = vmatprep.subr.bf16.mxu1 %v6424_v55 }
 0x31f   : > { %v4441_v35 = vsel %vm639_vm2, %v4423_v8, %v4375_v57 }
 0x320   : > { %6240 = vmatmul.mubr.msk.f32.gmra.mrb[52].mxu1 %vm942_vm3, %v8421_v9  ;;  %v3581_v9 = vsel %vm639_vm2, %v3563_v23, %v8460_v47 }
 0x321   : > { %6242 = vmatprep.mubr.msk.f32.mxu1 %vm942_vm3, %v8432_v56  ;;  %6427 = vmatpush3.bf16.msra.mxu1 %v6424_v55  ;;  %v3564_v56 = vsel %vm270_vm0, %v3366_v10, %v8464_v11 }
 0x322   : > { %v4307_v7 = vpop.permute.xlu1 %4306  ;;  %v4309_v25 = vpop.permute.xlu0 %4308  ;;  %v3582_v15 = vsel %vm639_vm2, %v3564_v56, %v8468_v12 }
 0x323   : > { %v4425_v41 = vsel %vm270_vm0, %v4227_v3, %v4307_v7  ;;  %v4426_v29 = vsel %vm270_vm0, %v4228_v44, %v4309_v25 }
 0x324   : > { %6243 = vmatmul.mubr.msk.f32.gmra.mrb[54].mxu1 %vm942_vm3, %v8444_v22  ;;  %v3367_v22 = vld [vmem:[#allocation3 + $0x88] sm:$0xff] }
 0x325   : > { %6245 = vmatprep.mubr.msk.f32.mxu1 %vm942_vm3, %v8452_v61  ;;  %v4220_v61 = vld [vmem:[#allocation3 + $0x24] sm:$0xff]  ;;  %v3565_v37 = vsel %vm270_vm0, %v3367_v22, %v8472_v59  ;;  %v4222_v59 = vld [vmem:[#allocation3 + $0x34] sm:$0xff] }
 0x326   : > { %v4379_v54 = vpop.permute.xlu1 %4378  ;;  %v4381_v52 = vpop.permute.xlu0 %4380  ;;  %v4418_v47 = vsel %vm270_vm0, %v4220_v61, %v8333_v17  ;;  %v3583_v11 = vsel %vm639_vm2, %v3565_v37, %v8475_v58  ;;  %v4420_v17 = vsel %vm270_vm0, %v4222_v59, %v8494_v49  ;;  %v4437_v58 = vsel %vm639_vm2, %v4419_v38, %v8512_v20  ;;  %v4236_v37 = vld [vmem:[#allocation3 + $0xa4] sm:$0xff] }
 0x327   : > { %v4436_v12 = vsel %vm639_vm2, %v4418_v47, %v8485_v14  ;;  %v4438_v14 = vsel %vm639_vm2, %v4420_v17, %v8514_v4  ;;  %v4422_v49 = vsel %vm270_vm0, %v4224_v19, %v8529_v62  ;;  %v4424_v4 = vsel %vm270_vm0, %v4226_v2, %v4305_v33  ;;  %v4237_v47 = vld [vmem:[#allocation3 + $0xac] sm:$0xff] }
 0x328   : > { %6246 = vmatmul.mubr.msk.f32.gmra.mrb[56].mxu1 %vm942_vm3, %v3581_v9  ;;  %v4440_v24 = vsel %vm639_vm2, %v4422_v49, %v8543_v53  ;;  %v4442_v28 = vsel %vm639_vm2, %v4424_v4, %v4377_v26  ;;  %v4443_v50 = vsel %vm639_vm2, %v4425_v41, %v4379_v54  ;;  %v4444_v32 = vsel %vm639_vm2, %v4426_v29, %v4381_v52  ;;  %v4229_v53 = vld [vmem:[#allocation3 + $0x6c] sm:$0xff]  ;;  %v4231_v26 = vld [vmem:[#allocation3 + $0x7c] sm:$0xff] }
 0x329   : > { %6248 = vmatprep.mubr.msk.f32.mxu1 %vm942_vm3, %v3582_v15  ;;  %v4681_v38 = vld [vmem:[#allocation2 + $0x2d] sm:$0xff]  ;;  %v4686_v29 = vld [vmem:[#allocation2 + $0x55] sm:$0xff] }
 0x32a   : > { %v4311_v31 = vpop.permute.xlu1 %4310  ;;  %v4313_v13 = vpop.permute.xlu0 %4312 }
 0x32b   : > { %v4427_v0 = vsel %vm270_vm0, %v4229_v53, %v4311_v31  ;;  %v4428_v33 = vsel %vm270_vm0, %v4230_v51, %v4313_v13 }
 0x32c   : > { %6249 = vmatmul.mubr.msk.f32.gmra.mrb[58].mxu1 %vm942_vm3, %v3583_v11 }
 0x32d   : > { %6275 = vmatprep.mubr.msk.f32.mxu1 %vm942_vm3, %v4436_v12 }
 0x32e   : > { %v4383_v18 = vpop.permute.xlu1 %4382  ;;  %v4385_v46 = vpop.permute.xlu0 %4384 }
 0x32f   : > { %v4445_v55 = vsel %vm639_vm2, %v4427_v0, %v4383_v18  ;;  %v4446_v57 = vsel %vm639_vm2, %v4428_v33, %v4385_v46 }
 0x330   : > { %6276 = vmatmul.mubr.msk.f32.vlgmr.msra.gmra.mrb[42].mxu1 %vm942_vm3, %v4437_v58  ;;  %v4684_v58 = vld [vmem:[#allocation2 + $0x45] sm:$0xff] }
 0x331   : > { %6278 = vmatprep.mubr.msk.f32.mxu1 %vm942_vm3, %v4438_v14 }
 0x332   : > { %v4315_v39 = vpop.permute.xlu1 %4314  ;;  %v4317_v34 = vpop.permute.xlu0 %4316 }
 0x333   : > { %v4429_v7 = vsel %vm270_vm0, %v4231_v26, %v4315_v39  ;;  %v4430_v63 = vsel %vm270_vm0, %v8215_v48, %v4317_v34 }
 0x334   : > { %6279 = vmatmul.mubr.msk.f32.gmra.mrb[44].mxu1 %vm942_vm3, %v4439_v60 }
 0x335   : > { %6281 = vmatprep.mubr.msk.f32.mxu1 %vm942_vm3, %v4440_v24 }
 0x336   : > { %v4387_v1 = vpop.permute.xlu1 %4386  ;;  %v4389_v20 = vpop.permute.xlu0 %4388 }
 0x337   : > { %v4447_v23 = vsel %vm639_vm2, %v4429_v7, %v4387_v1  ;;  %v4448_v54 = vsel %vm639_vm2, %v4430_v63, %v4389_v20 }
 0x338   : > { %6282 = vmatmul.mubr.msk.f32.gmra.mrb[46].mxu1 %vm942_vm3, %v4441_v35 }
 0x339   : > { %6284 = vmatprep.mubr.msk.f32.mxu1 %vm942_vm3, %v4442_v28 }
 0x33a   : > { %v4319_v62 = vpop.permute.xlu1 %4318  ;;  %v4321_v5 = vpop.permute.xlu0 %4320 }
 0x33b   : > { %v4431_v52 = vsel %vm270_vm0, %v8252_v27, %v4319_v62  ;;  %v4432_v56 = vsel %vm270_vm0, %v8295_v36, %v4321_v5 }
 0x33c   : > { %6285 = vmatmul.mubr.msk.f32.gmra.mrb[48].mxu1 %vm942_vm3, %v4443_v50  ;;  %v4685_v50 = vld [vmem:[#allocation2 + $0x4d] sm:$0xff] }
 0x33d   : > { %6287 = vmatprep.mubr.msk.f32.mxu1 %vm942_vm3, %v4444_v32 }
 0x33e   : > { %v4391_v43 = vpop.permute.xlu1 %4390  ;;  %v4393_v40 = vpop.permute.xlu0 %4392 }
 0x33f   : > { %v4449_v15 = vsel %vm639_vm2, %v4431_v52, %v4391_v43  ;;  %v4450_v48 = vsel %vm639_vm2, %v4432_v56, %v4393_v40 }
 0x340   : > { %6288 = vmatmul.mubr.msk.f32.gmra.mrb[50].mxu1 %vm942_vm3, %v4445_v55 }
 0x341   : > { %6290 = vmatprep.mubr.msk.f32.mxu1 %vm942_vm3, %v4446_v57 }
 0x342   : > { %v4323_v25 = vpop.permute.xlu1 %4322  ;;  %v4325_v10 = vpop.permute.xlu0 %4324 }
 0x343   : > { %v4433_v61 = vsel %vm270_vm0, %v8320_v21, %v4323_v25  ;;  %v4434_v27 = vsel %vm270_vm0, %v4236_v37, %v4325_v10  ;;  %v4682_v21 = vld [vmem:[#allocation2 + $0x35] sm:$0xff]  ;;  %v4687_v37 = vld [vmem:[#allocation2 + $0x5d] sm:$0xff] }
 0x344   : > { %6291 = vmatmul.mubr.msk.f32.gmra.mrb[52].mxu1 %vm942_vm3, %v4447_v23 }
 0x345   : > { %6293 = vmatprep.mubr.msk.f32.mxu1 %vm942_vm3, %v4448_v54 }
 0x346   : > { %v4395_v9 = vpop.permute.xlu1 %4394  ;;  %v4397_v22 = vpop.permute.xlu0 %4396 }
 0x347   : > { %v4451_v13 = vsel %vm639_vm2, %v4433_v61, %v4395_v9  ;;  %v4452_v36 = vsel %vm639_vm2, %v4434_v27, %v4397_v22  ;;  %v4688_v9 = vld [vmem:[#allocation2 + $0x65] sm:$0xff] }
 0x348   : > { %6294 = vmatmul.mubr.msk.f32.gmra.mrb[54].mxu1 %vm942_vm3, %v4449_v15 }
 0x349   : > { %6296 = vmatprep.mubr.msk.f32.mxu1 %vm942_vm3, %v4450_v48 }
 0x34a   : > { %v4327_v31 = vpop.permute.xlu1 %4326 }
 0x34b   : > { %v4435_v11 = vsel %vm270_vm0, %v4237_v47, %v4327_v31 }
 0x34c   : > { %6297 = vmatmul.mubr.msk.f32.gmra.mrb[56].mxu1 %vm942_vm3, %v4451_v13 }
 0x34d   : > { %6299 = vmatprep.mubr.msk.f32.mxu1 %vm942_vm3, %v4452_v36 }
 0x34e   : > { %v4399_v12 = vpop.permute.xlu1 %4398 }
 0x34f   : > { %v4453_v16 = vsel %vm639_vm2, %v4435_v11, %v4399_v12 }
 0x350   : > { %6300 = vmatmul.mubr.msk.f32.gmra.mrb[58].mxu1 %vm942_vm3, %v4453_v16 }
 0x403   : > { %v6277_v59 = vpop.f32.mrb[42].mxu1 }
 0x404   : > { %v4700_v18 = vadd.f32 %v6277_v59, %v4682_v21  ;;  %v4574_v46 = vpop.f32.mrb[43].mxu1 }
 0x405   : > { %v4699_v17 = vadd.f32 %v4681_v38, %v4574_v46 }
 0x406   : > { %v4752_v14 = vcombine.high %v4700_v18, %v4700_v18  ;;  %v4759_v30 = vrot.slane %v4700_v18, %v7627_v42 }
 0x407   : > { %v4735_v19 = vcombine.high %v4699_v17, %v4699_v17  ;;  %v4742_v39 = vrot.slane %v4699_v17, %v7627_v42  ;;  %v6280_v34 = vpop.f32.mrb[44].mxu1 }
 0x408   : > { %v4766_v49 = vrot.slane %v4752_v14, %v7627_v42  ;;  %v4767_v60 = vcombine.high %v4759_v30, %v4759_v30  ;;  %v4702_v24 = vadd.f32 %v6280_v34, %v4684_v58  ;;  %v4584_v6 = vpop.f32.mrb[45].mxu1 }
 0x409   : > { %v4749_v8 = vrot.slane %v4735_v19, %v7627_v42  ;;  %v4750_v2 = vcombine.high %v4742_v39, %v4742_v39  ;;  %v4701_v1 = vadd.f32 %v4683_v45, %v4584_v6 }
 0x40a   : > { %v4768_v20 = vcombine.high %v4766_v49, %v4766_v49  ;;  %v5054_v4 = vcombine.low %v4759_v30, %v4767_v60  ;;  %v4786_v35 = vcombine.high %v4702_v24, %v4702_v24  ;;  %v4793_v28 = vrot.slane %v4702_v24, %v7627_v42  ;;  %v4690_v60 = vld [vmem:[#allocation2 + $0x75] sm:$0xff]  ;;  %v4689_v24 = vld [vmem:[#allocation2 + $0x6d] sm:$0xff] }
 0x40b   : > { %v4751_v3 = vcombine.high %v4749_v8, %v4749_v8  ;;  %v5037_v41 = vcombine.low %v4742_v39, %v4750_v2  ;;  %v4769_v44 = vcombine.high %v4701_v1, %v4701_v1  ;;  %v4776_v62 = vrot.slane %v4701_v1, %v7627_v42  ;;  %v6283_v5 = vpop.f32.mrb[46].mxu1 }
 0x40c   : > { %v5055_v32 = vcombine.low %v4766_v49, %v4768_v20  ;;  %v4800_v53 = vrot.slane %v4786_v35, %v7627_v42  ;;  %v4801_v0 = vcombine.high %v4793_v28, %v4793_v28  ;;  %v4594_v51 = vpop.f32.mrb[47].mxu1  ;;  %v5062_v43 = vrot.slane %v5054_v4, %v7627_v42 }
 0x40d   : > { %v5038_v40 = vcombine.low %v4749_v8, %v4751_v3  ;;  %v4783_v33 = vrot.slane %v4769_v44, %v7627_v42  ;;  %v4784_v55 = vcombine.high %v4776_v62, %v4776_v62  ;;  %v4704_v7 = vadd.f32 %v6283_v5, %v4686_v29 }
 0x40e   : > { %v5069_v57 = vrot.slane %v5055_v32, %v7627_v42  ;;  %v5088_v26 = vcombine.low %v4801_v0, %v4800_v53  ;;  %v4703_v25 = vadd.f32 %v4685_v50, %v4594_v51  ;;  %v5045_v63 = vrot.slane %v5037_v41, %v7627_v42 }
 0x40f   : > { %v5052_v23 = vrot.slane %v5038_v40, %v7627_v42  ;;  %v4785_v10 = vcombine.high %v4783_v33, %v4783_v33  ;;  %v5071_v54 = vcombine.low %v4784_v55, %v4783_v33  ;;  %v6286_v52 = vpop.f32.mrb[48].mxu1  ;;  %v4819_v15 = vcombine.high %v4704_v7, %v4704_v7  ;;  %v4692_v55 = vld [vmem:[#allocation2 + $0x85] sm:$0xff] }
 0x410   : > { %v5070_v56 = vcombine.low %v5062_v43, %v5069_v57  ;;  %v4826_v48 = vrot.slane %v4704_v7, %v7627_v42  ;;  %v4802_v22 = vcombine.high %v4800_v53, %v4800_v53  ;;  %v4604_v61 = vpop.f32.mrb[49].mxu1  ;;  %v5096_v27 = vrot.slane %v5088_v26, %v7627_v42  ;;  %v4691_v57 = vld [vmem:[#allocation2 + $0x7d] sm:$0xff] }
 0x411   : > { %v5053_v31 = vcombine.low %v5045_v63, %v5052_v23  ;;  %v5072_v13 = vcombine.low %v4785_v10, %v4793_v28  ;;  %v4803_v36 = vcombine.high %v4703_v25, %v4703_v25  ;;  %v4833_v47 = vrot.slane %v4819_v15, %v7627_v42 }
 0x412   : > { %5326 = vst.msk [vmem:[%s8667_s10 + $0x8] sm:$0xff] %vm270_vm0, %v5070_v56  ;;  %v4834_v11 = vcombine.high %v4826_v48, %v4826_v48  ;;  %v4810_v12 = vrot.slane %v4703_v25, %v7627_v42  ;;  %v4706_v16 = vadd.f32 %v6286_v52, %v4688_v9  ;;  %v5079_v21 = vrot.slane %v5071_v54, %v7627_v42 }
 0x413   : > { %5325 = vst.msk [vmem:[%s8667_s10] sm:$0xff] %vm270_vm0, %v5053_v31  ;;  %v5086_v38 = vrot.slane %v5072_v13, %v7627_v42  ;;  %v4817_v59 = vrot.slane %v4803_v36, %v7627_v42  ;;  %v4705_v18 = vadd.f32 %v4687_v37, %v4604_v61  ;;  %v6289_v46 = vpop.f32.mrb[50].mxu1  ;;  %v4835_v17 = vcombine.high %v4833_v47, %v4833_v47 }
 0x414   : > { %v5106_v58 = vcombine.low %v4826_v48, %v4834_v11  ;;  %v5089_v14 = vcombine.low %v4802_v22, %v4810_v12  ;;  %v4853_v30 = vcombine.high %v4706_v16, %v4706_v16  ;;  %v4614_v45 = vpop.f32.mrb[51].mxu1  ;;  %v4860_v34 = vrot.slane %v4706_v16, %v7627_v42  ;;  %v4694_v16 = vld [vmem:[#allocation2 + $0x95] sm:$0xff] }
 0x415   : > { %v5087_v19 = vcombine.low %v5079_v21, %v5086_v38  ;;  %v4818_v39 = vcombine.high %v4817_v59, %v4817_v59  ;;  %v4836_v49 = vcombine.high %v4705_v18, %v4705_v18  ;;  %v5122_v8 = vcombine.low %v4833_v47, %v4835_v17  ;;  %v4693_v21 = vld [vmem:[#allocation2 + $0x8d] sm:$0xff] }
 0x416   : > { %v5120_v6 = vrot.slane %v5106_v58, %v7627_v42  ;;  %v5103_v2 = vrot.slane %v5089_v14, %v7627_v42  ;;  %v4867_v1 = vrot.slane %v4853_v30, %v7627_v42  ;;  %v4868_v4 = vcombine.high %v4860_v34, %v4860_v34 }
 0x417   : > { %5327 = vst.msk [vmem:[%s8667_s10 + $0x10] sm:$0xff] %vm270_vm0, %v5087_v19  ;;  %v5105_v20 = vcombine.low %v4817_v59, %v4818_v39  ;;  %v4843_v35 = vrot.slane %v4705_v18, %v7627_v42  ;;  %v4850_v28 = vrot.slane %v4836_v49, %v7627_v42  ;;  %v6292_v3 = vpop.f32.mrb[52].mxu1  ;;  %v5130_v41 = vrot.slane %v5122_v8, %v7627_v42 }
 0x418   : > { %v5104_v44 = vcombine.low %v5096_v27, %v5103_v2  ;;  %v4708_v62 = vadd.f32 %v6289_v46, %v4690_v60  ;;  %v4707_v5 = vadd.f32 %v4689_v24, %v4614_v45  ;;  %v4624_v29 = vpop.f32.mrb[53].mxu1  ;;  %v5140_v32 = vcombine.low %v4868_v4, %v4867_v1  ;;  %v4696_v2 = vld [vmem:[#allocation2 + $0xa5] sm:$0xff] }
 0x419   : > { %v5113_v50 = vrot.slane %v5105_v20, %v7627_v42  ;;  %v4851_v53 = vcombine.high %v4843_v35, %v4843_v35  ;;  %v4852_v0 = vcombine.high %v4850_v28, %v4850_v28  ;;  %v4869_v40 = vcombine.high %v4867_v1, %v4867_v1  ;;  %v4695_v1 = vld [vmem:[#allocation2 + $0x9d] sm:$0xff] }
 0x41a   : > { %5328 = vst.msk [vmem:[%s8667_s10 + $0x18] sm:$0xff] %vm270_vm0, %v5104_v44  ;;  %v4886_v51 = vcombine.high %v4708_v62, %v4708_v62  ;;  %v4893_v43 = vrot.slane %v4708_v62, %v7627_v42  ;;  %v4870_v33 = vcombine.high %v4707_v5, %v4707_v5  ;;  %v5154_v7 = vrot.slane %v5140_v32, %v7627_v42 }
 0x41b   : > { %v5121_v26 = vcombine.low %v5113_v50, %v5120_v6  ;;  %v5123_v25 = vcombine.low %v4843_v35, %v4851_v53  ;;  %v5139_v63 = vcombine.low %v4852_v0, %v4860_v34  ;;  %v6295_v23 = vpop.f32.mrb[54].mxu1  ;;  %v4877_v52 = vrot.slane %v4707_v5, %v7627_v42 }
 0x41c   : > { %v4900_v10 = vrot.slane %v4886_v51, %v7627_v42  ;;  %v4901_v54 = vcombine.high %v4893_v43, %v4893_v43  ;;  %v4884_v9 = vrot.slane %v4870_v33, %v7627_v42  ;;  %v4634_v56 = vpop.f32.mrb[55].mxu1  ;;  %v4710_v22 = vadd.f32 %v6292_v3, %v4692_v55  ;;  %v4698_v55 = vld [vmem:[#allocation2 + $0xb5] sm:$0xff] }
 0x41d   : > { %5329 = vst.msk [vmem:[%s8667_s10 + $0x20] sm:$0xff] %vm270_vm0, %v5121_v26  ;;  %v5137_v15 = vrot.slane %v5123_v25, %v7627_v42  ;;  %v5147_v48 = vrot.slane %v5139_v63, %v7627_v42  ;;  %v4709_v61 = vadd.f32 %v4691_v57, %v4624_v29  ;;  %v4885_v27 = vcombine.high %v4877_v52, %v4877_v52 }
 0x41e   : > { %v4902_v37 = vcombine.high %v4900_v10, %v4900_v10  ;;  %v5173_v31 = vcombine.low %v4893_v43, %v4901_v54  ;;  %v5156_v13 = vcombine.low %v4869_v40, %v4877_v52  ;;  %v4920_v11 = vcombine.high %v4710_v22, %v4710_v22 }
 0x41f   : > { %v5138_v36 = vcombine.low %v5130_v41, %v5137_v15  ;;  %v5155_v47 = vcombine.low %v5147_v48, %v5154_v7  ;;  %v4927_v12 = vrot.slane %v4710_v22, %v7627_v42  ;;  %v6298_v38 = vpop.f32.mrb[56].mxu1  ;;  %v5157_v46 = vcombine.low %v4885_v27, %v4884_v9 }
 0x420   : > { %v5174_v59 = vcombine.low %v4900_v10, %v4902_v37  ;;  %v5181_v18 = vrot.slane %v5173_v31, %v7627_v42  ;;  %v5164_v17 = vrot.slane %v5156_v13, %v7627_v42  ;;  %v4644_v58 = vpop.f32.mrb[57].mxu1  ;;  %v4934_v14 = vrot.slane %v4920_v11, %v7627_v42  ;;  %v4697_v31 = vld [vmem:[#allocation2 + $0xad] sm:$0xff] }
 0x421   : > { %5330 = vst.msk [vmem:[%s8667_s10 + $0x28] sm:$0xff] %vm270_vm0, %v5138_v36  ;;  %5331 = vst.msk [vmem:[%s8667_s10 + $0x30] sm:$0xff] %vm270_vm0, %v5155_v47  ;;  %v4935_v30 = vcombine.high %v4927_v12, %v4927_v12  ;;  %v4903_v45 = vcombine.high %v4709_v61, %v4709_v61  ;;  %v4910_v19 = vrot.slane %v4709_v61, %v7627_v42 }
 0x422   : > { %v5188_v39 = vrot.slane %v5174_v59, %v7627_v42  ;;  %v5171_v34 = vrot.slane %v5157_v46, %v7627_v42  ;;  %v4712_v49 = vadd.f32 %v6295_v23, %v4694_v16  ;;  %v4711_v60 = vadd.f32 %v4693_v21, %v4634_v56 }
 0x423   : > { %v5207_v24 = vcombine.low %v4935_v30, %v4934_v14  ;;  %v4917_v6 = vrot.slane %v4903_v45, %v7627_v42  ;;  %v4918_v8 = vcombine.high %v4910_v19, %v4910_v19  ;;  %v6301_v20 = vpop.f32.mrb[58].mxu1  ;;  %v4936_v3 = vcombine.high %v4934_v14, %v4934_v14 }
 0x424   : > { %v5189_v4 = vcombine.low %v5181_v18, %v5188_v39  ;;  %v5172_v35 = vcombine.low %v5164_v17, %v5171_v34  ;;  %v4954_v28 = vcombine.high %v4712_v49, %v4712_v49  ;;  %v4654_v41 = vpop.f32.mrb[59].mxu1  ;;  %v4961_v5 = vrot.slane %v4712_v49, %v7627_v42 }
 0x425   : > { %v4919_v44 = vcombine.high %v4917_v6, %v4917_v6  ;;  %v5190_v62 = vcombine.low %v4910_v19, %v4918_v8  ;;  %v4937_v29 = vcombine.high %v4711_v60, %v4711_v60  ;;  %v4944_v32 = vrot.slane %v4711_v60, %v7627_v42 }
 0x426   : > { %5333 = vst.msk [vmem:[%s8667_s10 + $0x40] sm:$0xff] %vm270_vm0, %v5189_v4  ;;  %5332 = vst.msk [vmem:[%s8667_s10 + $0x38] sm:$0xff] %vm270_vm0, %v5172_v35  ;;  %v4968_v50 = vrot.slane %v4954_v28, %v7627_v42  ;;  %v4714_v53 = vadd.f32 %v6298_v38, %v4696_v2  ;;  %v4713_v0 = vadd.f32 %v4695_v1, %v4644_v58 }
 0x427   : > { %v5215_v51 = vrot.slane %v5207_v24, %v7627_v42  ;;  %v5191_v43 = vcombine.low %v4917_v6, %v4919_v44  ;;  %v5198_v40 = vrot.slane %v5190_v62, %v7627_v42  ;;  %v4951_v33 = vrot.slane %v4937_v29, %v7627_v42 }
 0x428   : > { %v4969_v57 = vcombine.high %v4968_v50, %v4968_v50  ;;  %v4952_v26 = vcombine.high %v4944_v32, %v4944_v32  ;;  %v5208_v7 = vcombine.low %v4936_v3, %v4944_v32  ;;  %v4987_v25 = vcombine.high %v4714_v53, %v4714_v53 }
 0x429   : > { %v5205_v63 = vrot.slane %v5191_v43, %v7627_v42  ;;  %v4953_v23 = vcombine.high %v4951_v33, %v4951_v33  ;;  %v4994_v10 = vrot.slane %v4714_v53, %v7627_v42  ;;  %v4970_v54 = vcombine.high %v4713_v0, %v4713_v0 }
 0x42a   : > { %v5222_v52 = vrot.slane %v5208_v7, %v7627_v42  ;;  %v5224_v9 = vcombine.low %v4952_v26, %v4951_v33  ;;  %v5001_v56 = vrot.slane %v4987_v25, %v7627_v42  ;;  %v4716_v15 = vadd.f32 %v6301_v20, %v4698_v55 }
 0x42b   : > { %v5206_v48 = vcombine.low %v5198_v40, %v5205_v63  ;;  %v5225_v22 = vcombine.low %v4953_v23, %v4961_v5  ;;  %v5002_v61 = vcombine.high %v4994_v10, %v4994_v10  ;;  %v4977_v37 = vrot.slane %v4713_v0, %v7627_v42 }
 0x42c   : > { %v5241_v27 = vcombine.low %v4968_v50, %v4969_v57  ;;  %v5223_v13 = vcombine.low %v5215_v51, %v5222_v52  ;;  %v5232_v36 = vrot.slane %v5224_v9, %v7627_v42  ;;  %v4984_v11 = vrot.slane %v4970_v54, %v7627_v42 }
 0x42d   : > { %5334 = vst.msk [vmem:[%s8667_s10 + $0x48] sm:$0xff] %vm270_vm0, %v5206_v48  ;;  %v5239_v47 = vrot.slane %v5225_v22, %v7627_v42  ;;  %v4985_v12 = vcombine.high %v4977_v37, %v4977_v37  ;;  %v5003_v16 = vcombine.high %v5001_v56, %v5001_v56  ;;  %v5021_v21 = vcombine.high %v4716_v15, %v4716_v15 }
 0x42e   : > { %5335 = vst.msk [vmem:[%s8667_s10 + $0x50] sm:$0xff] %vm270_vm0, %v5223_v13  ;;  %v5028_v38 = vrot.slane %v4716_v15, %v7627_v42  ;;  %v4715_v59 = vadd.f32 %v4697_v31, %v4654_v41  ;;  %v5259_v46 = vcombine.low %v4994_v10, %v5002_v61  ;;  %v4986_v17 = vcombine.high %v4984_v11, %v4984_v11 }
 0x42f   : > { %v5240_v18 = vcombine.low %v5232_v36, %v5239_v47  ;;  %v5242_v58 = vcombine.low %v4977_v37, %v4985_v12  ;;  %v5035_v14 = vrot.slane %v5021_v21, %v7627_v42  ;;  %v5249_v39 = vrot.slane %v5241_v27, %v7627_v42 }
 0x430   : > { %v5036_v30 = vcombine.high %v5028_v38, %v5028_v38  ;;  %v5004_v45 = vcombine.high %v4715_v59, %v4715_v59  ;;  %v5011_v19 = vrot.slane %v4715_v59, %v7627_v42  ;;  %v5258_v49 = vcombine.low %v4984_v11, %v4986_v17 }
 0x431   : > { %5336 = vst.msk [vmem:[%s8667_s10 + $0x58] sm:$0xff] %vm270_vm0, %v5240_v18  ;;  %v5256_v34 = vrot.slane %v5242_v58, %v7627_v42  ;;  %v5273_v8 = vrot.slane %v5259_v46, %v7627_v42 }
 0x432   : > { %v5018_v60 = vrot.slane %v5004_v45, %v7627_v42  ;;  %v5019_v24 = vcombine.high %v5011_v19, %v5011_v19  ;;  %v5275_v6 = vcombine.low %v5003_v16, %v5011_v19  ;;  %v5266_v1 = vrot.slane %v5258_v49, %v7627_v42 }
 0x433   : > { %v5257_v2 = vcombine.low %v5249_v39, %v5256_v34  ;;  %v5293_v20 = vcombine.low %v5036_v30, %v5035_v14 }
 0x434   : > { %v5020_v4 = vcombine.high %v5018_v60, %v5018_v60  ;;  %v5276_v35 = vcombine.low %v5019_v24, %v5018_v60  ;;  %v5274_v28 = vcombine.low %v5266_v1, %v5273_v8  ;;  %v5283_v3 = vrot.slane %v5275_v6, %v7627_v42 }
 0x435   : > { %5337 = vst.msk [vmem:[%s8667_s10 + $0x60] sm:$0xff] %vm270_vm0, %v5257_v2  ;;  %v5307_v62 = vrot.slane %v5293_v20, %v7627_v42 }
 0x436   : > { %v5290_v41 = vrot.slane %v5276_v35, %v7627_v42  ;;  %v5292_v44 = vcombine.low %v5020_v4, %v5028_v38  ;;  %5338 = vst.msk [vmem:[%s8667_s10 + $0x68] sm:$0xff] %vm270_vm0, %v5274_v28 }
 0x438   : > { %v5291_v5 = vcombine.low %v5283_v3, %v5290_v41  ;;  %v5300_v29 = vrot.slane %v5292_v44, %v7627_v42 }
 0x43a   : > { %v5308_v50 = vcombine.low %v5300_v29, %v5307_v62  ;;  %5339 = vst.msk [vmem:[%s8667_s10 + $0x70] sm:$0xff] %vm270_vm0, %v5291_v5 }
 0x43c   : > { %5340 = vst.msk [vmem:[%s8667_s10 + $0x78] sm:$0xff] %vm270_vm0, %v5308_v50 }
 0x43d   : > { %6644 = shalt.err (!%p6641_p9)
}
 0x43e   : > { %s6645_s7 = scalar_lea.hbm %s8757_s4, 2048  ;;  %s6649_s11 = scalar_lea.hbm %s8822_s3, 8192 }
 0x43f   : > { %p6646_p10 = scmp.ne.s32.totalorder %s8757_s4, %s6645_s7  ;;  %p6650_p13 = scmp.lt.u32.totalorder %s8757_s4, %s8822_s3 }
 0x440   : > { %p6651_p0 = scmp.lt.u32.totalorder %s6649_s11, %s6645_s7  ;;  %p6653_p2 = scmp.lt.u32.totalorder %s6645_s7, %s8757_s4 }
 0x441   : > { %p6647_p11 = pnand %p6646_p10, %p6811_p3 }
 0x442   : > { %p6652_p1 = por %p6651_p0, %p6650_p13 }
 0x443   : > { %p6648_p12 = pneg %p6647_p11 }
 0x444   : > { %p6654_p4 = por %p6653_p2, %p6652_p1 }
 0x446   : > { %p6655_p5 = pnand %p6654_p4, %p6648_p12 }
 0x448   : > { %6658 = shalt.err (!%p6655_p5)
}
 0x449   : > { %s6738_s16 = smov 128   ;;  %s6739_s20 = smov 8  }
 0x44a   : > { %6548 = dma.vmem_to_hbm [thread:$0]  (%p6811_p3), %s8759_s27, 2048, %s8757_s4, %s8767_s6, %s6738_s16, %s6738_s16, %s6739_s20  }
 0x44b PF: > { %p6554_p6 = scmp.ge.s32.totalorder %s6725_s19, 2  ;;  %s5373_s28 = sand.u32 1, %s6697_s12  }
 0x44c   : > { %s5374_s29 = scalar_lea.sflag [#allocation5], %s5373_s28 }
 0x44d   : > { %p6551_p7 = pnand %p6554_p6, %p6820_p8 }
 0x44f   : > { %6692 = dma.done.wait (!%p6551_p7), %s5374_s29, 2048  }
 0x450   : > { %6694 = vsyncadd (!%p6551_p7), %s5374_s29, 4294965248  ;;  %s16_s19 = sadd.s32 1, %s6725_s19   ;;  %s8835_s12 = smov %s6701_s13 }
 0x451   : > { %p13_p9 = scmp.ge.s32.totalorder %s16_s19, 6   ;;  %s8836_s13 = smov %s6705_s14 }
 0x452   : > { %s8837_s14 = smov %s6829_s30  ;;  %s8838_s15 = smov %s6717_s17 }
 0x453   : > { %s8839_s16 = smov %s6721_s18  ;;  %s8840_s17 = smov %s8843_s22 }
 0x454   : > { %s8841_s18 = smov %s8847_s23  ;;  %15 = sbr.rel (!%p13_p9) target bundleno = 5 (0x5), region = 71 }
 0x45b   :  { %5379 = vsyncpa [#allocation5], 1 }
 0x45c   :  { %5381 = vsyncpa [#allocation5 + $0x1], 1 }

</bundles_post_ra>
